<compile_context>
chip_gen: v5e
topology: v5e:2x2
jax: 0.10.0
libtpu: 0.0.40
codegen_flags: <defaults>
</compile_context>

<pallas_src>
import functools

import numpy as np
import jax
import jax.numpy as jnp
from jax.experimental import pallas as pl
from jax.experimental.pallas import tpu as pltpu

_BN_EPS = 1e-5


# --------------------------------------------------------------------------------------
# GlobalFilter as a pre-composed per-channel (HW, HW) linear operator.
# --------------------------------------------------------------------------------------
@functools.lru_cache(maxsize=None)
def _fft_basis(H, W):
    """Channel-independent basis responses of rfft2 / irfft2 (ortho) as numpy constants."""
    Wf = W // 2 + 1
    HW = H * W
    # rfft2 of the spatial delta basis: (HW, H, Wf) complex.
    basis_sp = np.eye(HW, dtype=np.float64).reshape(HW, H, W)
    F = np.fft.rfft2(basis_sp, axes=(1, 2), norm="ortho")
    # irfft2 of the real / imaginary half-spectrum delta basis: (H*Wf, H, W) real.
    basis_fr = np.eye(H * Wf, dtype=np.float64).reshape(H * Wf, H, Wf)
    Gr = np.fft.irfft2(basis_fr.astype(np.complex128), s=(H, W), axes=(1, 2), norm="ortho")
    Gi = np.fft.irfft2(1j * basis_fr, s=(H, W), axes=(1, 2), norm="ortho")
    return (np.ascontiguousarray(F.real, dtype=np.float32),
            np.ascontiguousarray(F.imag, dtype=np.float32),
            Gr.reshape(H, Wf, HW).astype(np.float32),
            Gi.reshape(H, Wf, HW).astype(np.float32))


def _gf_operator(complex_weight, H, W):
    """Compose rfft2 -> (* spectral weight) -> irfft2 into (C, HW, HW), bf16 for the MXU."""
    Wf = W // 2 + 1
    # TODO(synk): bicubic interpolation branch of GlobalFilter (weight grid != rfft2 grid)
    # is not implemented; weight must already live on the (H, W//2+1) spectrum grid.
    assert complex_weight.shape[0] == H and complex_weight.shape[1] == Wf
    Fr, Fi, Gr, Gi = _fft_basis(H, W)
    wr = jnp.transpose(complex_weight[..., 0], (2, 0, 1)).astype(jnp.float32)   # (C, H, Wf)
    wi = jnp.transpose(complex_weight[..., 1], (2, 0, 1)).astype(jnp.float32)
    ar = wr[..., None] * Gr[None] + wi[..., None] * Gi[None]                    # (C, H, Wf, HW)
    ai = wr[..., None] * Gi[None] - wi[..., None] * Gr[None]
    m = jnp.einsum("nuv,cuvp->cnp", Fr, ar) + jnp.einsum("nuv,cuvp->cnp", Fi, ai)
    return m.astype(jnp.bfloat16)                                               # (C, HW, HW)


# --------------------------------------------------------------------------------------
# Kernel 1: GlobalFilter (one MXU matmul per channel) + BatchNorm1, fused.
# Grid: one channel per step ("parallel").
# --------------------------------------------------------------------------------------
def gf_bn1_kernel(x_ref, m_ref, g1_ref, b1_ref, z1_ref):
    # x_ref: (1, B, HW) f32   m_ref: (1, HW, HW) bf16   g1/b1: (C,) f32 in SMEM
    # z1_ref: (1, B, HW) bf16
    c = pl.program_id(0)
    xb = x_ref[0]                                                    # (B, HW) f32
    y = jnp.dot(xb.astype(jnp.bfloat16), m_ref[0],
                preferred_element_type=jnp.float32)                  # (B, HW) f32, MXU
    # BatchNorm (training mode): exact stats over the full (B, H, W) slice of this channel.
    inv_n = 1.0 / (y.shape[0] * y.shape[1])
    mu = jnp.sum(y) * inv_n
    d = y - mu
    var = jnp.sum(d * d) * inv_n                                     # biased, centered (2-pass)
    z = d * jax.lax.rsqrt(var + _BN_EPS) * g1_ref[c] + b1_ref[c]
    z1_ref[0] = z.astype(z1_ref.dtype)


# --------------------------------------------------------------------------------------
# Kernel 2: 3x3 conv (on reflect-padded input) + BatchNorm2 + ReLU + residual, fused.
# Grid: one output channel per step ("parallel").  Writes the NCHW output directly.
# --------------------------------------------------------------------------------------
def conv_bn2_act_res_kernel(zp_ref, w_ref, g2_ref, b2_ref, x_ref, o_ref):
    # zp_ref: (C, B, H+2, W+2) bf16 (all input channels; constant block index -> resident)
    # w_ref : (C*C*9,) f32 conv weights in SMEM (OIHW, flattened)
    # g2/b2 : (C,) f32 in SMEM   x_ref/o_ref: (B, 1, H, W) f32 (residual / final output)
    co = pl.program_id(0)
    cin, b, hp, wp = zp_ref.shape
    H, W = hp - 2, wp - 2
    zp = zp_ref[...]
    # TODO(synk): for large channel counts, tile `co` into blocks and contract (ci, kh, kw)
    # on the MXU; for tiny C the scalar-weighted plane FMAs below beat matrix-vector pushes.
    acc = jnp.zeros((b, H, W), jnp.float32)
    for ci in range(cin):
        for kh in range(3):
            for kw in range(3):
                wv = w_ref[((co * cin + ci) * 3 + kh) * 3 + kw]      # SMEM scalar
                acc = acc + wv * zp[ci, :, kh:kh + H, kw:kw + W].astype(jnp.float32)
    # BatchNorm2 (training mode, exact per-output-channel stats) + ReLU + residual.
    inv_n = 1.0 / (b * H * W)
    mu = jnp.sum(acc) * inv_n
    d = acc - mu
    var = jnp.sum(d * d) * inv_n
    zn = d * jax.lax.rsqrt(var + _BN_EPS) * g2_ref[co] + b2_ref[co]
    o_ref[...] = x_ref[...] + jnp.maximum(zn, 0.0)[:, None, :, :]


# --------------------------------------------------------------------------------------
# GFBlock forward
# --------------------------------------------------------------------------------------
def gf_block_forward(x_nchw, complex_weight, conv_w_oihw, g1, b1, g2, b2):
    B, C, H, W = x_nchw.shape
    HW = H * W
    x_nchw = x_nchw.astype(jnp.float32)

    # Per-channel spectral operator (built from the GlobalFilter weight).
    m_op = _gf_operator(complex_weight, H, W)                        # (C, HW, HW) bf16

    # Channel-major, lane-dense (256-wide) view of x for the GF matmul (one small transpose).
    x_cb = jnp.transpose(x_nchw.reshape(B, C, HW), (1, 0, 2))        # (C, B, HW) f32

    g1 = g1.reshape(C).astype(jnp.float32)
    b1 = b1.reshape(C).astype(jnp.float32)
    g2 = g2.reshape(C).astype(jnp.float32)
    b2 = b2.reshape(C).astype(jnp.float32)
    w_flat = conv_w_oihw.reshape(C * C * 9).astype(jnp.float32)      # OIHW, flattened

    smem = pl.BlockSpec(memory_space=pltpu.MemorySpace.SMEM)
    cparams = pltpu.CompilerParams(dimension_semantics=("parallel",),
                                   vmem_limit_bytes=32 * 1024 * 1024)

    # ---- Kernel 1: GlobalFilter + BN1 ----
    z1 = pl.pallas_call(
        gf_bn1_kernel,
        out_shape=jax.ShapeDtypeStruct((C, B, HW), jnp.bfloat16),
        grid=(C,),
        in_specs=[
            pl.BlockSpec((1, B, HW), lambda c: (c, 0, 0)),           # x, per channel
            pl.BlockSpec((1, HW, HW), lambda c: (c, 0, 0)),          # spectral operator
            smem, smem,                                              # g1, b1
        ],
        out_specs=pl.BlockSpec((1, B, HW), lambda c: (c, 0, 0)),
        compiler_params=cparams,
    )(x_cb, m_op, g1, b1)

    # 1-pixel reflect pad on the small bf16 activation (XLA); see TODO at top of file.
    zp = jnp.pad(z1.reshape(C, B, H, W),
                 ((0, 0), (0, 0), (1, 1), (1, 1)), mode="reflect")   # (C, B, H+2, W+2) bf16

    # ---- Kernel 2: conv3x3 + BN2 + ReLU + residual (writes NCHW directly) ----
    out = pl.pallas_call(
        conv_bn2_act_res_kernel,
        out_shape=jax.ShapeDtypeStruct((B, C, H, W), jnp.float32),
        grid=(C,),
        in_specs=[
            pl.BlockSpec((C, B, H + 2, W + 2), lambda c: (0, 0, 0, 0)),  # all input channels
            smem, smem, smem,                                            # conv weights, g2, b2
            pl.BlockSpec((B, 1, H, W), lambda c: (0, c, 0, 0)),          # residual x[:, c]
        ],
        out_specs=pl.BlockSpec((B, 1, H, W), lambda c: (0, c, 0, 0)),
        compiler_params=cparams,
    )(zp, w_flat, g2, b2, x_nchw)

    return out                                                        # (B, C, H, W)


# --------------------------------------------------------------------------------------
if __name__ == "__main__":
    B, C, H, W = 2, 4, 16, 16
    Wf = W // 2 + 1

    key = jax.random.PRNGKey(0)
    kx, kw_, kc = jax.random.split(key, 3)
    x = jax.random.normal(kx, (B, C, H, W), jnp.float32)
    # GlobalFilter parameter on the (H, W//2+1) spectrum grid (no-interp branch).
    complex_weight = 0.02 * jax.random.normal(kw_, (H, Wf, C, 2), jnp.float32)
    conv_w = 0.1 * jax.random.normal(kc, (C, C, 3, 3), jnp.float32)   # OIHW, like torch
    g1 = jnp.ones((C,), jnp.float32)
    b1 = jnp.zeros((C,), jnp.float32)
    g2 = jnp.ones((C,), jnp.float32)
    b2 = jnp.zeros((C,), jnp.float32)

    out = jax.block_until_ready(
        jax.jit(gf_block_forward)(x, complex_weight, conv_w, g1, b1, g2, b2))

    # ---- float64 numpy reference (same math as the PyTorch module) ----
    xn = np.asarray(x, np.float64)
    cwn = np.asarray(complex_weight, np.float64)
    wcn = np.asarray(conv_w, np.float64)
    xp = np.transpose(xn, (0, 2, 3, 1))                                # NHWC
    xf = np.fft.rfft2(xp, axes=(1, 2), norm="ortho")
    xf = xf * (cwn[..., 0] + 1j * cwn[..., 1])[None]
    yref = np.fft.irfft2(xf, s=(H, W), axes=(1, 2), norm="ortho")

    def bn_np(v):
        mu = v.mean(axis=(0, 1, 2), keepdims=True)
        var = v.var(axis=(0, 1, 2), keepdims=True)                     # biased
        return (v - mu) / np.sqrt(var + 1e-5)

    z1r = bn_np(yref)
    zpr = np.pad(z1r, ((0, 0), (1, 1), (1, 1), (0, 0)), mode="reflect")
    w_hwio = np.transpose(wcn, (2, 3, 1, 0))
    convr = np.zeros_like(z1r)
    for kh in range(3):
        for kw in range(3):
            convr += zpr[:, kh:kh + H, kw:kw + W, :] @ w_hwio[kh, kw]
    z2r = bn_np(convr)
    ref = np.transpose(xp + np.maximum(z2r, 0.0), (0, 3, 1, 2))

    np.testing.assert_allclose(np.asarray(out, np.float64), ref, rtol=5e-2, atol=5e-2)
    print("KERNEL_OK")
</pallas_src>

<mosaic_0001>
module attributes {stable_mosaic.version = 11 : i64} {
  func.func @gf_bn1_kernel(%arg0: i32, %arg1: memref<1x2x256xf32, #tpu.memory_space<vmem>>, %arg2: memref<1x256x256xbf16, #tpu.memory_space<vmem>>, %arg3: memref<4xf32, #tpu.memory_space<smem>>, %arg4: memref<4xf32, #tpu.memory_space<smem>>, %arg5: memref<1x2x256xbf16, #tpu.memory_space<vmem>>) attributes {dimension_semantics = [#tpu.dimension_semantics<parallel>], iteration_bounds = array<i64: 4>, scalar_prefetch = 0 : i64, scratch_operands = 0 : i64, tpu.core_type = #tpu.core_type<tc>, window_params = [{transform_indices = @transform_0, window_bounds = array<i64: 1, 2, 256>}, {transform_indices = @transform_1, window_bounds = array<i64: 1, 256, 256>}, {transform_indices = @transform_2, window_bounds = array<i64: 4>}, {transform_indices = @transform_3, window_bounds = array<i64: 4>}, {transform_indices = @transform_4, window_bounds = array<i64: 1, 2, 256>}]} {
    %c0 = arith.constant 0 : index
    %c0_0 = arith.constant 0 : index
    %c0_1 = arith.constant 0 : index
    %0 = vector.load %arg1[%c0, %c0_0, %c0_1] : memref<1x2x256xf32, #tpu.memory_space<vmem>>, vector<1x2x256xf32>
    %1 = vector.shape_cast %0 : vector<1x2x256xf32> to vector<2x256xf32>
    %2 = arith.truncf %1 : vector<2x256xf32> to vector<2x256xbf16>
    %c0_2 = arith.constant 0 : index
    %c0_3 = arith.constant 0 : index
    %c0_4 = arith.constant 0 : index
    %3 = vector.load %arg2[%c0_2, %c0_3, %c0_4] : memref<1x256x256xbf16, #tpu.memory_space<vmem>>, vector<1x256x256xbf16>
    %4 = vector.shape_cast %3 : vector<1x256x256xbf16> to vector<256x256xbf16>
    %cst = arith.constant dense<0.000000e+00> : vector<2x256xf32>
    %5 = tpu.matmul %2, %4, %cst {dimension_numbers = #tpu.dot_dimension_numbers<[1], [0], [0], [1], [0, 0, 1, 1], [], []>} : vector<2x256xbf16>, vector<256x256xbf16>, vector<2x256xf32> -> vector<2x256xf32>
    %6 = vector.shape_cast %5 : vector<2x256xf32> to vector<1x2x256xf32>
    %cst_5 = arith.constant dense<0.000000e+00> : vector<1xf32>
    %7 = vector.multi_reduction <add>, %6, %cst_5 [1, 2] : vector<1x2x256xf32> to vector<1xf32>
    %8 = vector.shape_cast %7 : vector<1xf32> to vector<1x1x1xf32>
    %9 = vector.extract %8[0, 0, 0] : f32 from vector<1x1x1xf32>
    %cst_6 = arith.constant 0.001953125 : f32
    %10 = arith.mulf %9, %cst_6 : f32
    %11 = vector.broadcast %10 : f32 to vector<2x256xf32>
    %12 = arith.subf %5, %11 : vector<2x256xf32>
    %13 = arith.mulf %12, %12 : vector<2x256xf32>
    %14 = vector.shape_cast %13 : vector<2x256xf32> to vector<1x2x256xf32>
    %cst_7 = arith.constant dense<0.000000e+00> : vector<1xf32>
    %15 = vector.multi_reduction <add>, %14, %cst_7 [1, 2] : vector<1x2x256xf32> to vector<1xf32>
    %16 = vector.shape_cast %15 : vector<1xf32> to vector<1x1x1xf32>
    %17 = vector.extract %16[0, 0, 0] : f32 from vector<1x1x1xf32>
    %cst_8 = arith.constant 0.001953125 : f32
    %18 = arith.mulf %17, %cst_8 : f32
    %cst_9 = arith.constant 9.99999974E-6 : f32
    %19 = arith.addf %18, %cst_9 : f32
    %20 = math.rsqrt %19 : f32
    %21 = vector.broadcast %20 : f32 to vector<2x256xf32>
    %22 = arith.mulf %12, %21 : vector<2x256xf32>
    %23 = arith.index_cast %arg0 : i32 to index
    %24 = memref.load %arg3[%23] : memref<4xf32, #tpu.memory_space<smem>>
    %25 = vector.broadcast %24 : f32 to vector<2x256xf32>
    %26 = arith.mulf %22, %25 : vector<2x256xf32>
    %27 = arith.index_cast %arg0 : i32 to index
    %28 = memref.load %arg4[%27] : memref<4xf32, #tpu.memory_space<smem>>
    %29 = vector.broadcast %28 : f32 to vector<2x256xf32>
    %30 = arith.addf %26, %29 : vector<2x256xf32>
    %31 = arith.truncf %30 : vector<2x256xf32> to vector<2x256xbf16>
    %c0_10 = arith.constant 0 : index
    %c0_11 = arith.constant 0 : index
    %c0_12 = arith.constant 0 : index
    %32 = vector.load %arg5[%c0_10, %c0_11, %c0_12] : memref<1x2x256xbf16, #tpu.memory_space<vmem>>, vector<1x2x256xbf16>
    %33 = vector.shape_cast %32 : vector<1x2x256xbf16> to vector<2x256xbf16>
    %34 = vector.shape_cast %31 : vector<2x256xbf16> to vector<1x2x256xbf16>
    tpu.vector_store %arg5[%c0_10, %c0_11, %c0_12], %34 {strides = array<i32>} : memref<1x2x256xbf16, #tpu.memory_space<vmem>>, vector<1x2x256xbf16>,
    return
  }
  func.func @transform_0(%arg0: i32) -> (i32, i32, i32) {
    %c0_i32 = arith.constant 0 : i32
    %c0_i32_0 = arith.constant 0 : i32
    %c0_i32_1 = arith.constant 0 : i32
    return %arg0, %c0_i32, %c0_i32_0 : i32, i32, i32
  }
  func.func @transform_1(%arg0: i32) -> (i32, i32, i32) {
    %c0_i32 = arith.constant 0 : i32
    %c0_i32_0 = arith.constant 0 : i32
    %c0_i32_1 = arith.constant 0 : i32
    return %arg0, %c0_i32, %c0_i32_0 : i32, i32, i32
  }
  func.func @transform_2(%arg0: i32) -> i32 {
    %c0_i32 = arith.constant 0 : i32
    %c0_i32_0 = arith.constant 0 : i32
    return %c0_i32 : i32
  }
  func.func @transform_3(%arg0: i32) -> i32 {
    %c0_i32 = arith.constant 0 : i32
    %c0_i32_0 = arith.constant 0 : i32
    return %c0_i32 : i32
  }
  func.func @transform_4(%arg0: i32) -> (i32, i32, i32) {
    %c0_i32 = arith.constant 0 : i32
    %c0_i32_0 = arith.constant 0 : i32
    %c0_i32_1 = arith.constant 0 : i32
    return %arg0, %c0_i32, %c0_i32_0 : i32, i32, i32
  }
}

module attributes {stable_mosaic.version = 11 : i64} {
  func.func @conv_bn2_act_res_kernel(%arg0: i32, %arg1: memref<4x2x18x18xbf16, #tpu.memory_space<vmem>>, %arg2: memref<144xf32, #tpu.memory_space<smem>>, %arg3: memref<4xf32, #tpu.memory_space<smem>>, %arg4: memref<4xf32, #tpu.memory_space<smem>>, %arg5: memref<2x1x16x16xf32, #tpu.memory_space<vmem>>, %arg6: memref<2x1x16x16xf32, #tpu.memory_space<vmem>>) attributes {dimension_semantics = [#tpu.dimension_semantics<parallel>], iteration_bounds = array<i64: 4>, scalar_prefetch = 0 : i64, scratch_operands = 0 : i64, tpu.core_type = #tpu.core_type<tc>, window_params = [{pipeline_mode = #tpu.pipeline_mode<synchronous>, transform_indices = @transform_0, window_bounds = array<i64: 4, 2, 18, 18>}, {transform_indices = @transform_1, window_bounds = array<i64: 144>}, {transform_indices = @transform_2, window_bounds = array<i64: 4>}, {transform_indices = @transform_3, window_bounds = array<i64: 4>}, {transform_indices = @transform_4, window_bounds = array<i64: 2, 1, 16, 16>}, {transform_indices = @transform_5, window_bounds = array<i64: 2, 1, 16, 16>}]} {
    %c0 = arith.constant 0 : index
    %c0_0 = arith.constant 0 : index
    %c0_1 = arith.constant 0 : index
    %c0_2 = arith.constant 0 : index
    %0 = vector.load %arg1[%c0, %c0_0, %c0_1, %c0_2] : memref<4x2x18x18xbf16, #tpu.memory_space<vmem>>, vector<4x2x18x18xbf16>
    %cst = arith.constant 0.000000e+00 : f32
    %1 = vector.broadcast %cst : f32 to vector<2x16x16xf32>
    %c4_i32 = arith.constant 4 : i32
    %2 = arith.muli %arg0, %c4_i32 : i32
    %c0_i32 = arith.constant 0 : i32
    %3 = arith.addi %2, %c0_i32 : i32
    %c3_i32 = arith.constant 3 : i32
    %4 = arith.muli %3, %c3_i32 : i32
    %c0_i32_3 = arith.constant 0 : i32
    %5 = arith.addi %4, %c0_i32_3 : i32
    %c3_i32_4 = arith.constant 3 : i32
    %6 = arith.muli %5, %c3_i32_4 : i32
    %c0_i32_5 = arith.constant 0 : i32
    %7 = arith.addi %6, %c0_i32_5 : i32
    %8 = arith.index_cast %7 : i32 to index
    %9 = memref.load %arg2[%8] : memref<144xf32, #tpu.memory_space<smem>>
    %10 = vector.extract_strided_slice %0 {offsets = [0, 0, 0, 0], sizes = [1, 2, 16, 16], strides = [1, 1, 1, 1]} : vector<4x2x18x18xbf16> to vector<1x2x16x16xbf16>
    %11 = vector.shape_cast %10 : vector<1x2x16x16xbf16> to vector<2x16x16xbf16>
    %12 = arith.extf %11 : vector<2x16x16xbf16> to vector<2x16x16xf32>
    %13 = vector.broadcast %9 : f32 to vector<2x16x16xf32>
    %14 = arith.mulf %13, %12 : vector<2x16x16xf32>
    %15 = arith.addf %1, %14 : vector<2x16x16xf32>
    %c4_i32_6 = arith.constant 4 : i32
    %16 = arith.muli %arg0, %c4_i32_6 : i32
    %c0_i32_7 = arith.constant 0 : i32
    %17 = arith.addi %16, %c0_i32_7 : i32
    %c3_i32_8 = arith.constant 3 : i32
    %18 = arith.muli %17, %c3_i32_8 : i32
    %c0_i32_9 = arith.constant 0 : i32
    %19 = arith.addi %18, %c0_i32_9 : i32
    %c3_i32_10 = arith.constant 3 : i32
    %20 = arith.muli %19, %c3_i32_10 : i32
    %c1_i32 = arith.constant 1 : i32
    %21 = arith.addi %20, %c1_i32 : i32
    %22 = arith.index_cast %21 : i32 to index
    %23 = memref.load %arg2[%22] : memref<144xf32, #tpu.memory_space<smem>>
    %24 = vector.extract_strided_slice %0 {offsets = [0, 0, 0, 1], sizes = [1, 2, 16, 16], strides = [1, 1, 1, 1]} : vector<4x2x18x18xbf16> to vector<1x2x16x16xbf16>
    %25 = vector.shape_cast %24 : vector<1x2x16x16xbf16> to vector<2x16x16xbf16>
    %26 = arith.extf %25 : vector<2x16x16xbf16> to vector<2x16x16xf32>
    %27 = vector.broadcast %23 : f32 to vector<2x16x16xf32>
    %28 = arith.mulf %27, %26 : vector<2x16x16xf32>
    %29 = arith.addf %15, %28 : vector<2x16x16xf32>
    %c4_i32_11 = arith.constant 4 : i32
    %30 = arith.muli %arg0, %c4_i32_11 : i32
    %c0_i32_12 = arith.constant 0 : i32
    %31 = arith.addi %30, %c0_i32_12 : i32
    %c3_i32_13 = arith.constant 3 : i32
    %32 = arith.muli %31, %c3_i32_13 : i32
    %c0_i32_14 = arith.constant 0 : i32
    %33 = arith.addi %32, %c0_i32_14 : i32
    %c3_i32_15 = arith.constant 3 : i32
    %34 = arith.muli %33, %c3_i32_15 : i32
    %c2_i32 = arith.constant 2 : i32
    %35 = arith.addi %34, %c2_i32 : i32
    %36 = arith.index_cast %35 : i32 to index
    %37 = memref.load %arg2[%36] : memref<144xf32, #tpu.memory_space<smem>>
    %38 = vector.extract_strided_slice %0 {offsets = [0, 0, 0, 2], sizes = [1, 2, 16, 16], strides = [1, 1, 1, 1]} : vector<4x2x18x18xbf16> to vector<1x2x16x16xbf16>
    %39 = vector.shape_cast %38 : vector<1x2x16x16xbf16> to vector<2x16x16xbf16>
    %40 = arith.extf %39 : vector<2x16x16xbf16> to vector<2x16x16xf32>
    %41 = vector.broadcast %37 : f32 to vector<2x16x16xf32>
    %42 = arith.mulf %41, %40 : vector<2x16x16xf32>
    %43 = arith.addf %29, %42 : vector<2x16x16xf32>
    %c4_i32_16 = arith.constant 4 : i32
    %44 = arith.muli %arg0, %c4_i32_16 : i32
    %c0_i32_17 = arith.constant 0 : i32
    %45 = arith.addi %44, %c0_i32_17 : i32
    %c3_i32_18 = arith.constant 3 : i32
    %46 = arith.muli %45, %c3_i32_18 : i32
    %c1_i32_19 = arith.constant 1 : i32
    %47 = arith.addi %46, %c1_i32_19 : i32
    %c3_i32_20 = arith.constant 3 : i32
    %48 = arith.muli %47, %c3_i32_20 : i32
    %c0_i32_21 = arith.constant 0 : i32
    %49 = arith.addi %48, %c0_i32_21 : i32
    %50 = arith.index_cast %49 : i32 to index
    %51 = memref.load %arg2[%50] : memref<144xf32, #tpu.memory_space<smem>>
    %52 = vector.extract_strided_slice %0 {offsets = [0, 0, 1, 0], sizes = [1, 2, 16, 16], strides = [1, 1, 1, 1]} : vector<4x2x18x18xbf16> to vector<1x2x16x16xbf16>
    %53 = vector.shape_cast %52 : vector<1x2x16x16xbf16> to vector<2x16x16xbf16>
    %54 = arith.extf %53 : vector<2x16x16xbf16> to vector<2x16x16xf32>
    %55 = vector.broadcast %51 : f32 to vector<2x16x16xf32>
    %56 = arith.mulf %55, %54 : vector<2x16x16xf32>
    %57 = arith.addf %43, %56 : vector<2x16x16xf32>
    %c4_i32_22 = arith.constant 4 : i32
    %58 = arith.muli %arg0, %c4_i32_22 : i32
    %c0_i32_23 = arith.constant 0 : i32
    %59 = arith.addi %58, %c0_i32_23 : i32
    %c3_i32_24 = arith.constant 3 : i32
    %60 = arith.muli %59, %c3_i32_24 : i32
    %c1_i32_25 = arith.constant 1 : i32
    %61 = arith.addi %60, %c1_i32_25 : i32
    %c3_i32_26 = arith.constant 3 : i32
    %62 = arith.muli %61, %c3_i32_26 : i32
    %c1_i32_27 = arith.constant 1 : i32
    %63 = arith.addi %62, %c1_i32_27 : i32
    %64 = arith.index_cast %63 : i32 to index
    %65 = memref.load %arg2[%64] : memref<144xf32, #tpu.memory_space<smem>>
    %66 = vector.extract_strided_slice %0 {offsets = [0, 0, 1, 1], sizes = [1, 2, 16, 16], strides = [1, 1, 1, 1]} : vector<4x2x18x18xbf16> to vector<1x2x16x16xbf16>
    %67 = vector.shape_cast %66 : vector<1x2x16x16xbf16> to vector<2x16x16xbf16>
    %68 = arith.extf %67 : vector<2x16x16xbf16> to vector<2x16x16xf32>
    %69 = vector.broadcast %65 : f32 to vector<2x16x16xf32>
    %70 = arith.mulf %69, %68 : vector<2x16x16xf32>
    %71 = arith.addf %57, %70 : vector<2x16x16xf32>
    %c4_i32_28 = arith.constant 4 : i32
    %72 = arith.muli %arg0, %c4_i32_28 : i32
    %c0_i32_29 = arith.constant 0 : i32
    %73 = arith.addi %72, %c0_i32_29 : i32
    %c3_i32_30 = arith.constant 3 : i32
    %74 = arith.muli %73, %c3_i32_30 : i32
    %c1_i32_31 = arith.constant 1 : i32
    %75 = arith.addi %74, %c1_i32_31 : i32
    %c3_i32_32 = arith.constant 3 : i32
    %76 = arith.muli %75, %c3_i32_32 : i32
    %c2_i32_33 = arith.constant 2 : i32
    %77 = arith.addi %76, %c2_i32_33 : i32
    %78 = arith.index_cast %77 : i32 to index
    %79 = memref.load %arg2[%78] : memref<144xf32, #tpu.memory_space<smem>>
    %80 = vector.extract_strided_slice %0 {offsets = [0, 0, 1, 2], sizes = [1, 2, 16, 16], strides = [1, 1, 1, 1]} : vector<4x2x18x18xbf16> to vector<1x2x16x16xbf16>
    %81 = vector.shape_cast %80 : vector<1x2x16x16xbf16> to vector<2x16x16xbf16>
    %82 = arith.extf %81 : vector<2x16x16xbf16> to vector<2x16x16xf32>
    %83 = vector.broadcast %79 : f32 to vector<2x16x16xf32>
    %84 = arith.mulf %83, %82 : vector<2x16x16xf32>
    %85 = arith.addf %71, %84 : vector<2x16x16xf32>
    %c4_i32_34 = arith.constant 4 : i32
    %86 = arith.muli %arg0, %c4_i32_34 : i32
    %c0_i32_35 = arith.constant 0 : i32
    %87 = arith.addi %86, %c0_i32_35 : i32
    %c3_i32_36 = arith.constant 3 : i32
    %88 = arith.muli %87, %c3_i32_36 : i32
    %c2_i32_37 = arith.constant 2 : i32
    %89 = arith.addi %88, %c2_i32_37 : i32
    %c3_i32_38 = arith.constant 3 : i32
    %90 = arith.muli %89, %c3_i32_38 : i32
    %c0_i32_39 = arith.constant 0 : i32
    %91 = arith.addi %90, %c0_i32_39 : i32
    %92 = arith.index_cast %91 : i32 to index
    %93 = memref.load %arg2[%92] : memref<144xf32, #tpu.memory_space<smem>>
    %94 = vector.extract_strided_slice %0 {offsets = [0, 0, 2, 0], sizes = [1, 2, 16, 16], strides = [1, 1, 1, 1]} : vector<4x2x18x18xbf16> to vector<1x2x16x16xbf16>
    %95 = vector.shape_cast %94 : vector<1x2x16x16xbf16> to vector<2x16x16xbf16>
    %96 = arith.extf %95 : vector<2x16x16xbf16> to vector<2x16x16xf32>
    %97 = vector.broadcast %93 : f32 to vector<2x16x16xf32>
    %98 = arith.mulf %97, %96 : vector<2x16x16xf32>
    %99 = arith.addf %85, %98 : vector<2x16x16xf32>
    %c4_i32_40 = arith.constant 4 : i32
    %100 = arith.muli %arg0, %c4_i32_40 : i32
    %c0_i32_41 = arith.constant 0 : i32
    %101 = arith.addi %100, %c0_i32_41 : i32
    %c3_i32_42 = arith.constant 3 : i32
    %102 = arith.muli %101, %c3_i32_42 : i32
    %c2_i32_43 = arith.constant 2 : i32
    %103 = arith.addi %102, %c2_i32_43 : i32
    %c3_i32_44 = arith.constant 3 : i32
    %104 = arith.muli %103, %c3_i32_44 : i32
    %c1_i32_45 = arith.constant 1 : i32
    %105 = arith.addi %104, %c1_i32_45 : i32
    %106 = arith.index_cast %105 : i32 to index
    %107 = memref.load %arg2[%106] : memref<144xf32, #tpu.memory_space<smem>>
    %108 = vector.extract_strided_slice %0 {offsets = [0, 0, 2, 1], sizes = [1, 2, 16, 16], strides = [1, 1, 1, 1]} : vector<4x2x18x18xbf16> to vector<1x2x16x16xbf16>
    %109 = vector.shape_cast %108 : vector<1x2x16x16xbf16> to vector<2x16x16xbf16>
    %110 = arith.extf %109 : vector<2x16x16xbf16> to vector<2x16x16xf32>
    %111 = vector.broadcast %107 : f32 to vector<2x16x16xf32>
    %112 = arith.mulf %111, %110 : vector<2x16x16xf32>
    %113 = arith.addf %99, %112 : vector<2x16x16xf32>
    %c4_i32_46 = arith.constant 4 : i32
    %114 = arith.muli %arg0, %c4_i32_46 : i32
    %c0_i32_47 = arith.constant 0 : i32
    %115 = arith.addi %114, %c0_i32_47 : i32
    %c3_i32_48 = arith.constant 3 : i32
    %116 = arith.muli %115, %c3_i32_48 : i32
    %c2_i32_49 = arith.constant 2 : i32
    %117 = arith.addi %116, %c2_i32_49 : i32
    %c3_i32_50 = arith.constant 3 : i32
    %118 = arith.muli %117, %c3_i32_50 : i32
    %c2_i32_51 = arith.constant 2 : i32
    %119 = arith.addi %118, %c2_i32_51 : i32
    %120 = arith.index_cast %119 : i32 to index
    %121 = memref.load %arg2[%120] : memref<144xf32, #tpu.memory_space<smem>>
    %122 = vector.extract_strided_slice %0 {offsets = [0, 0, 2, 2], sizes = [1, 2, 16, 16], strides = [1, 1, 1, 1]} : vector<4x2x18x18xbf16> to vector<1x2x16x16xbf16>
    %123 = vector.shape_cast %122 : vector<1x2x16x16xbf16> to vector<2x16x16xbf16>
    %124 = arith.extf %123 : vector<2x16x16xbf16> to vector<2x16x16xf32>
    %125 = vector.broadcast %121 : f32 to vector<2x16x16xf32>
    %126 = arith.mulf %125, %124 : vector<2x16x16xf32>
    %127 = arith.addf %113, %126 : vector<2x16x16xf32>
    %c4_i32_52 = arith.constant 4 : i32
    %128 = arith.muli %arg0, %c4_i32_52 : i32
    %c1_i32_53 = arith.constant 1 : i32
    %129 = arith.addi %128, %c1_i32_53 : i32
    %c3_i32_54 = arith.constant 3 : i32
    %130 = arith.muli %129, %c3_i32_54 : i32
    %c0_i32_55 = arith.constant 0 : i32
    %131 = arith.addi %130, %c0_i32_55 : i32
    %c3_i32_56 = arith.constant 3 : i32
    %132 = arith.muli %131, %c3_i32_56 : i32
    %c0_i32_57 = arith.constant 0 : i32
    %133 = arith.addi %132, %c0_i32_57 : i32
    %134 = arith.index_cast %133 : i32 to index
    %135 = memref.load %arg2[%134] : memref<144xf32, #tpu.memory_space<smem>>
    %136 = vector.extract_strided_slice %0 {offsets = [1, 0, 0, 0], sizes = [1, 2, 16, 16], strides = [1, 1, 1, 1]} : vector<4x2x18x18xbf16> to vector<1x2x16x16xbf16>
    %137 = vector.shape_cast %136 : vector<1x2x16x16xbf16> to vector<2x16x16xbf16>
    %138 = arith.extf %137 : vector<2x16x16xbf16> to vector<2x16x16xf32>
    %139 = vector.broadcast %135 : f32 to vector<2x16x16xf32>
    %140 = arith.mulf %139, %138 : vector<2x16x16xf32>
    %141 = arith.addf %127, %140 : vector<2x16x16xf32>
    %c4_i32_58 = arith.constant 4 : i32
    %142 = arith.muli %arg0, %c4_i32_58 : i32
    %c1_i32_59 = arith.constant 1 : i32
    %143 = arith.addi %142, %c1_i32_59 : i32
    %c3_i32_60 = arith.constant 3 : i32
    %144 = arith.muli %143, %c3_i32_60 : i32
    %c0_i32_61 = arith.constant 0 : i32
    %145 = arith.addi %144, %c0_i32_61 : i32
    %c3_i32_62 = arith.constant 3 : i32
    %146 = arith.muli %145, %c3_i32_62 : i32
    %c1_i32_63 = arith.constant 1 : i32
    %147 = arith.addi %146, %c1_i32_63 : i32
    %148 = arith.index_cast %147 : i32 to index
    %149 = memref.load %arg2[%148] : memref<144xf32, #tpu.memory_space<smem>>
    %150 = vector.extract_strided_slice %0 {offsets = [1, 0, 0, 1], sizes = [1, 2, 16, 16], strides = [1, 1, 1, 1]} : vector<4x2x18x18xbf16> to vector<1x2x16x16xbf16>
    %151 = vector.shape_cast %150 : vector<1x2x16x16xbf16> to vector<2x16x16xbf16>
    %152 = arith.extf %151 : vector<2x16x16xbf16> to vector<2x16x16xf32>
    %153 = vector.broadcast %149 : f32 to vector<2x16x16xf32>
    %154 = arith.mulf %153, %152 : vector<2x16x16xf32>
    %155 = arith.addf %141, %154 : vector<2x16x16xf32>
    %c4_i32_64 = arith.constant 4 : i32
    %156 = arith.muli %arg0, %c4_i32_64 : i32
    %c1_i32_65 = arith.constant 1 : i32
    %157 = arith.addi %156, %c1_i32_65 : i32
    %c3_i32_66 = arith.constant 3 : i32
    %158 = arith.muli %157, %c3_i32_66 : i32
    %c0_i32_67 = arith.constant 0 : i32
    %159 = arith.addi %158, %c0_i32_67 : i32
    %c3_i32_68 = arith.constant 3 : i32
    %160 = arith.muli %159, %c3_i32_68 : i32
    %c2_i32_69 = arith.constant 2 : i32
    %161 = arith.addi %160, %c2_i32_69 : i32
    %162 = arith.index_cast %161 : i32 to index
    %163 = memref.load %arg2[%162] : memref<144xf32, #tpu.memory_space<smem>>
    %164 = vector.extract_strided_slice %0 {offsets = [1, 0, 0, 2], sizes = [1, 2, 16, 16], strides = [1, 1, 1, 1]} : vector<4x2x18x18xbf16> to vector<1x2x16x16xbf16>
    %165 = vector.shape_cast %164 : vector<1x2x16x16xbf16> to vector<2x16x16xbf16>
    %166 = arith.extf %165 : vector<2x16x16xbf16> to vector<2x16x16xf32>
    %167 = vector.broadcast %163 : f32 to vector<2x16x16xf32>
    %168 = arith.mulf %167, %166 : vector<2x16x16xf32>
    %169 = arith.addf %155, %168 : vector<2x16x16xf32>
    %c4_i32_70 = arith.constant 4 : i32
    %170 = arith.muli %arg0, %c4_i32_70 : i32
    %c1_i32_71 = arith.constant 1 : i32
    %171 = arith.addi %170, %c1_i32_71 : i32
    %c3_i32_72 = arith.constant 3 : i32
    %172 = arith.muli %171, %c3_i32_72 : i32
    %c1_i32_73 = arith.constant 1 : i32
    %173 = arith.addi %172, %c1_i32_73 : i32
    %c3_i32_74 = arith.constant 3 : i32
    %174 = arith.muli %173, %c3_i32_74 : i32
    %c0_i32_75 = arith.constant 0 : i32
    %175 = arith.addi %174, %c0_i32_75 : i32
    %176 = arith.index_cast %175 : i32 to index
    %177 = memref.load %arg2[%176] : memref<144xf32, #tpu.memory_space<smem>>
    %178 = vector.extract_strided_slice %0 {offsets = [1, 0, 1, 0], sizes = [1, 2, 16, 16], strides = [1, 1, 1, 1]} : vector<4x2x18x18xbf16> to vector<1x2x16x16xbf16>
    %179 = vector.shape_cast %178 : vector<1x2x16x16xbf16> to vector<2x16x16xbf16>
    %180 = arith.extf %179 : vector<2x16x16xbf16> to vector<2x16x16xf32>
    %181 = vector.broadcast %177 : f32 to vector<2x16x16xf32>
    %182 = arith.mulf %181, %180 : vector<2x16x16xf32>
    %183 = arith.addf %169, %182 : vector<2x16x16xf32>
    %c4_i32_76 = arith.constant 4 : i32
    %184 = arith.muli %arg0, %c4_i32_76 : i32
    %c1_i32_77 = arith.constant 1 : i32
    %185 = arith.addi %184, %c1_i32_77 : i32
    %c3_i32_78 = arith.constant 3 : i32
    %186 = arith.muli %185, %c3_i32_78 : i32
    %c1_i32_79 = arith.constant 1 : i32
    %187 = arith.addi %186, %c1_i32_79 : i32
    %c3_i32_80 = arith.constant 3 : i32
    %188 = arith.muli %187, %c3_i32_80 : i32
    %c1_i32_81 = arith.constant 1 : i32
    %189 = arith.addi %188, %c1_i32_81 : i32
    %190 = arith.index_cast %189 : i32 to index
    %191 = memref.load %arg2[%190] : memref<144xf32, #tpu.memory_space<smem>>
    %192 = vector.extract_strided_slice %0 {offsets = [1, 0, 1, 1], sizes = [1, 2, 16, 16], strides = [1, 1, 1, 1]} : vector<4x2x18x18xbf16> to vector<1x2x16x16xbf16>
    %193 = vector.shape_cast %192 : vector<1x2x16x16xbf16> to vector<2x16x16xbf16>
    %194 = arith.extf %193 : vector<2x16x16xbf16> to vector<2x16x16xf32>
    %195 = vector.broadcast %191 : f32 to vector<2x16x16xf32>
    %196 = arith.mulf %195, %194 : vector<2x16x16xf32>
    %197 = arith.addf %183, %196 : vector<2x16x16xf32>
    %c4_i32_82 = arith.constant 4 : i32
    %198 = arith.muli %arg0, %c4_i32_82 : i32
    %c1_i32_83 = arith.constant 1 : i32
    %199 = arith.addi %198, %c1_i32_83 : i32
    %c3_i32_84 = arith.constant 3 : i32
    %200 = arith.muli %199, %c3_i32_84 : i32
    %c1_i32_85 = arith.constant 1 : i32
    %201 = arith.addi %200, %c1_i32_85 : i32
    %c3_i32_86 = arith.constant 3 : i32
    %202 = arith.muli %201, %c3_i32_86 : i32
    %c2_i32_87 = arith.constant 2 : i32
    %203 = arith.addi %202, %c2_i32_87 : i32
    %204 = arith.index_cast %203 : i32 to index
    %205 = memref.load %arg2[%204] : memref<144xf32, #tpu.memory_space<smem>>
    %206 = vector.extract_strided_slice %0 {offsets = [1, 0, 1, 2], sizes = [1, 2, 16, 16], strides = [1, 1, 1, 1]} : vector<4x2x18x18xbf16> to vector<1x2x16x16xbf16>
    %207 = vector.shape_cast %206 : vector<1x2x16x16xbf16> to vector<2x16x16xbf16>
    %208 = arith.extf %207 : vector<2x16x16xbf16> to vector<2x16x16xf32>
    %209 = vector.broadcast %205 : f32 to vector<2x16x16xf32>
    %210 = arith.mulf %209, %208 : vector<2x16x16xf32>
    %211 = arith.addf %197, %210 : vector<2x16x16xf32>
    %c4_i32_88 = arith.constant 4 : i32
    %212 = arith.muli %arg0, %c4_i32_88 : i32
    %c1_i32_89 = arith.constant 1 : i32
    %213 = arith.addi %212, %c1_i32_89 : i32
    %c3_i32_90 = arith.constant 3 : i32
    %214 = arith.muli %213, %c3_i32_90 : i32
    %c2_i32_91 = arith.constant 2 : i32
    %215 = arith.addi %214, %c2_i32_91 : i32
    %c3_i32_92 = arith.constant 3 : i32
    %216 = arith.muli %215, %c3_i32_92 : i32
    %c0_i32_93 = arith.constant 0 : i32
    %217 = arith.addi %216, %c0_i32_93 : i32
    %218 = arith.index_cast %217 : i32 to index
    %219 = memref.load %arg2[%218] : memref<144xf32, #tpu.memory_space<smem>>
    %220 = vector.extract_strided_slice %0 {offsets = [1, 0, 2, 0], sizes = [1, 2, 16, 16], strides = [1, 1, 1, 1]} : vector<4x2x18x18xbf16> to vector<1x2x16x16xbf16>
    %221 = vector.shape_cast %220 : vector<1x2x16x16xbf16> to vector<2x16x16xbf16>
    %222 = arith.extf %221 : vector<2x16x16xbf16> to vector<2x16x16xf32>
    %223 = vector.broadcast %219 : f32 to vector<2x16x16xf32>
    %224 = arith.mulf %223, %222 : vector<2x16x16xf32>
    %225 = arith.addf %211, %224 : vector<2x16x16xf32>
    %c4_i32_94 = arith.constant 4 : i32
    %226 = arith.muli %arg0, %c4_i32_94 : i32
    %c1_i32_95 = arith.constant 1 : i32
    %227 = arith.addi %226, %c1_i32_95 : i32
    %c3_i32_96 = arith.constant 3 : i32
    %228 = arith.muli %227, %c3_i32_96 : i32
    %c2_i32_97 = arith.constant 2 : i32
    %229 = arith.addi %228, %c2_i32_97 : i32
    %c3_i32_98 = arith.constant 3 : i32
    %230 = arith.muli %229, %c3_i32_98 : i32
    %c1_i32_99 = arith.constant 1 : i32
    %231 = arith.addi %230, %c1_i32_99 : i32
    %232 = arith.index_cast %231 : i32 to index
    %233 = memref.load %arg2[%232] : memref<144xf32, #tpu.memory_space<smem>>
    %234 = vector.extract_strided_slice %0 {offsets = [1, 0, 2, 1], sizes = [1, 2, 16, 16], strides = [1, 1, 1, 1]} : vector<4x2x18x18xbf16> to vector<1x2x16x16xbf16>
    %235 = vector.shape_cast %234 : vector<1x2x16x16xbf16> to vector<2x16x16xbf16>
    %236 = arith.extf %235 : vector<2x16x16xbf16> to vector<2x16x16xf32>
    %237 = vector.broadcast %233 : f32 to vector<2x16x16xf32>
    %238 = arith.mulf %237, %236 : vector<2x16x16xf32>
    %239 = arith.addf %225, %238 : vector<2x16x16xf32>
    %c4_i32_100 = arith.constant 4 : i32
    %240 = arith.muli %arg0, %c4_i32_100 : i32
    %c1_i32_101 = arith.constant 1 : i32
    %241 = arith.addi %240, %c1_i32_101 : i32
    %c3_i32_102 = arith.constant 3 : i32
    %242 = arith.muli %241, %c3_i32_102 : i32
    %c2_i32_103 = arith.constant 2 : i32
    %243 = arith.addi %242, %c2_i32_103 : i32
    %c3_i32_104 = arith.constant 3 : i32
    %244 = arith.muli %243, %c3_i32_104 : i32
    %c2_i32_105 = arith.constant 2 : i32
    %245 = arith.addi %244, %c2_i32_105 : i32
    %246 = arith.index_cast %245 : i32 to index
    %247 = memref.load %arg2[%246] : memref<144xf32, #tpu.memory_space<smem>>
    %248 = vector.extract_strided_slice %0 {offsets = [1, 0, 2, 2], sizes = [1, 2, 16, 16], strides = [1, 1, 1, 1]} : vector<4x2x18x18xbf16> to vector<1x2x16x16xbf16>
    %249 = vector.shape_cast %248 : vector<1x2x16x16xbf16> to vector<2x16x16xbf16>
    %250 = arith.extf %249 : vector<2x16x16xbf16> to vector<2x16x16xf32>
    %251 = vector.broadcast %247 : f32 to vector<2x16x16xf32>
    %252 = arith.mulf %251, %250 : vector<2x16x16xf32>
    %253 = arith.addf %239, %252 : vector<2x16x16xf32>
    %c4_i32_106 = arith.constant 4 : i32
    %254 = arith.muli %arg0, %c4_i32_106 : i32
    %c2_i32_107 = arith.constant 2 : i32
    %255 = arith.addi %254, %c2_i32_107 : i32
    %c3_i32_108 = arith.constant 3 : i32
    %256 = arith.muli %255, %c3_i32_108 : i32
    %c0_i32_109 = arith.constant 0 : i32
    %257 = arith.addi %256, %c0_i32_109 : i32
    %c3_i32_110 = arith.constant 3 : i32
    %258 = arith.muli %257, %c3_i32_110 : i32
    %c0_i32_111 = arith.constant 0 : i32
    %259 = arith.addi %258, %c0_i32_111 : i32
    %260 = arith.index_cast %259 : i32 to index
    %261 = memref.load %arg2[%260] : memref<144xf32, #tpu.memory_space<smem>>
    %262 = vector.extract_strided_slice %0 {offsets = [2, 0, 0, 0], sizes = [1, 2, 16, 16], strides = [1, 1, 1, 1]} : vector<4x2x18x18xbf16> to vector<1x2x16x16xbf16>
    %263 = vector.shape_cast %262 : vector<1x2x16x16xbf16> to vector<2x16x16xbf16>
    %264 = arith.extf %263 : vector<2x16x16xbf16> to vector<2x16x16xf32>
    %265 = vector.broadcast %261 : f32 to vector<2x16x16xf32>
    %266 = arith.mulf %265, %264 : vector<2x16x16xf32>
    %267 = arith.addf %253, %266 : vector<2x16x16xf32>
    %c4_i32_112 = arith.constant 4 : i32
    %268 = arith.muli %arg0, %c4_i32_112 : i32
    %c2_i32_113 = arith.constant 2 : i32
    %269 = arith.addi %268, %c2_i32_113 : i32
    %c3_i32_114 = arith.constant 3 : i32
    %270 = arith.muli %269, %c3_i32_114 : i32
    %c0_i32_115 = arith.constant 0 : i32
    %271 = arith.addi %270, %c0_i32_115 : i32
    %c3_i32_116 = arith.constant 3 : i32
    %272 = arith.muli %271, %c3_i32_116 : i32
    %c1_i32_117 = arith.constant 1 : i32
    %273 = arith.addi %272, %c1_i32_117 : i32
    %274 = arith.index_cast %273 : i32 to index
    %275 = memref.load %arg2[%274] : memref<144xf32, #tpu.memory_space<smem>>
    %276 = vector.extract_strided_slice %0 {offsets = [2, 0, 0, 1], sizes = [1, 2, 16, 16], strides = [1, 1, 1, 1]} : vector<4x2x18x18xbf16> to vector<1x2x16x16xbf16>
    %277 = vector.shape_cast %276 : vector<1x2x16x16xbf16> to vector<2x16x16xbf16>
    %278 = arith.extf %277 : vector<2x16x16xbf16> to vector<2x16x16xf32>
    %279 = vector.broadcast %275 : f32 to vector<2x16x16xf32>
    %280 = arith.mulf %279, %278 : vector<2x16x16xf32>
    %281 = arith.addf %267, %280 : vector<2x16x16xf32>
    %c4_i32_118 = arith.constant 4 : i32
    %282 = arith.muli %arg0, %c4_i32_118 : i32
    %c2_i32_119 = arith.constant 2 : i32
    %283 = arith.addi %282, %c2_i32_119 : i32
    %c3_i32_120 = arith.constant 3 : i32
    %284 = arith.muli %283, %c3_i32_120 : i32
    %c0_i32_121 = arith.constant 0 : i32
    %285 = arith.addi %284, %c0_i32_121 : i32
    %c3_i32_122 = arith.constant 3 : i32
    %286 = arith.muli %285, %c3_i32_122 : i32
    %c2_i32_123 = arith.constant 2 : i32
    %287 = arith.addi %286, %c2_i32_123 : i32
    %288 = arith.index_cast %287 : i32 to index
    %289 = memref.load %arg2[%288] : memref<144xf32, #tpu.memory_space<smem>>
    %290 = vector.extract_strided_slice %0 {offsets = [2, 0, 0, 2], sizes = [1, 2, 16, 16], strides = [1, 1, 1, 1]} : vector<4x2x18x18xbf16> to vector<1x2x16x16xbf16>
    %291 = vector.shape_cast %290 : vector<1x2x16x16xbf16> to vector<2x16x16xbf16>
    %292 = arith.extf %291 : vector<2x16x16xbf16> to vector<2x16x16xf32>
    %293 = vector.broadcast %289 : f32 to vector<2x16x16xf32>
    %294 = arith.mulf %293, %292 : vector<2x16x16xf32>
    %295 = arith.addf %281, %294 : vector<2x16x16xf32>
    %c4_i32_124 = arith.constant 4 : i32
    %296 = arith.muli %arg0, %c4_i32_124 : i32
    %c2_i32_125 = arith.constant 2 : i32
    %297 = arith.addi %296, %c2_i32_125 : i32
    %c3_i32_126 = arith.constant 3 : i32
    %298 = arith.muli %297, %c3_i32_126 : i32
    %c1_i32_127 = arith.constant 1 : i32
    %299 = arith.addi %298, %c1_i32_127 : i32
    %c3_i32_128 = arith.constant 3 : i32
    %300 = arith.muli %299, %c3_i32_128 : i32
    %c0_i32_129 = arith.constant 0 : i32
    %301 = arith.addi %300, %c0_i32_129 : i32
    %302 = arith.index_cast %301 : i32 to index
    %303 = memref.load %arg2[%302] : memref<144xf32, #tpu.memory_space<smem>>
    %304 = vector.extract_strided_slice %0 {offsets = [2, 0, 1, 0], sizes = [1, 2, 16, 16], strides = [1, 1, 1, 1]} : vector<4x2x18x18xbf16> to vector<1x2x16x16xbf16>
    %305 = vector.shape_cast %304 : vector<1x2x16x16xbf16> to vector<2x16x16xbf16>
    %306 = arith.extf %305 : vector<2x16x16xbf16> to vector<2x16x16xf32>
    %307 = vector.broadcast %303 : f32 to vector<2x16x16xf32>
    %308 = arith.mulf %307, %306 : vector<2x16x16xf32>
    %309 = arith.addf %295, %308 : vector<2x16x16xf32>
    %c4_i32_130 = arith.constant 4 : i32
    %310 = arith.muli %arg0, %c4_i32_130 : i32
    %c2_i32_131 = arith.constant 2 : i32
    %311 = arith.addi %310, %c2_i32_131 : i32
    %c3_i32_132 = arith.constant 3 : i32
    %312 = arith.muli %311, %c3_i32_132 : i32
    %c1_i32_133 = arith.constant 1 : i32
    %313 = arith.addi %312, %c1_i32_133 : i32
    %c3_i32_134 = arith.constant 3 : i32
    %314 = arith.muli %313, %c3_i32_134 : i32
    %c1_i32_135 = arith.constant 1 : i32
    %315 = arith.addi %314, %c1_i32_135 : i32
    %316 = arith.index_cast %315 : i32 to index
    %317 = memref.load %arg2[%316] : memref<144xf32, #tpu.memory_space<smem>>
    %318 = vector.extract_strided_slice %0 {offsets = [2, 0, 1, 1], sizes = [1, 2, 16, 16], strides = [1, 1, 1, 1]} : vector<4x2x18x18xbf16> to vector<1x2x16x16xbf16>
    %319 = vector.shape_cast %318 : vector<1x2x16x16xbf16> to vector<2x16x16xbf16>
    %320 = arith.extf %319 : vector<2x16x16xbf16> to vector<2x16x16xf32>
    %321 = vector.broadcast %317 : f32 to vector<2x16x16xf32>
    %322 = arith.mulf %321, %320 : vector<2x16x16xf32>
    %323 = arith.addf %309, %322 : vector<2x16x16xf32>
    %c4_i32_136 = arith.constant 4 : i32
    %324 = arith.muli %arg0, %c4_i32_136 : i32
    %c2_i32_137 = arith.constant 2 : i32
    %325 = arith.addi %324, %c2_i32_137 : i32
    %c3_i32_138 = arith.constant 3 : i32
    %326 = arith.muli %325, %c3_i32_138 : i32
    %c1_i32_139 = arith.constant 1 : i32
    %327 = arith.addi %326, %c1_i32_139 : i32
    %c3_i32_140 = arith.constant 3 : i32
    %328 = arith.muli %327, %c3_i32_140 : i32
    %c2_i32_141 = arith.constant 2 : i32
    %329 = arith.addi %328, %c2_i32_141 : i32
    %330 = arith.index_cast %329 : i32 to index
    %331 = memref.load %arg2[%330] : memref<144xf32, #tpu.memory_space<smem>>
    %332 = vector.extract_strided_slice %0 {offsets = [2, 0, 1, 2], sizes = [1, 2, 16, 16], strides = [1, 1, 1, 1]} : vector<4x2x18x18xbf16> to vector<1x2x16x16xbf16>
    %333 = vector.shape_cast %332 : vector<1x2x16x16xbf16> to vector<2x16x16xbf16>
    %334 = arith.extf %333 : vector<2x16x16xbf16> to vector<2x16x16xf32>
    %335 = vector.broadcast %331 : f32 to vector<2x16x16xf32>
    %336 = arith.mulf %335, %334 : vector<2x16x16xf32>
    %337 = arith.addf %323, %336 : vector<2x16x16xf32>
    %c4_i32_142 = arith.constant 4 : i32
    %338 = arith.muli %arg0, %c4_i32_142 : i32
    %c2_i32_143 = arith.constant 2 : i32
    %339 = arith.addi %338, %c2_i32_143 : i32
    %c3_i32_144 = arith.constant 3 : i32
    %340 = arith.muli %339, %c3_i32_144 : i32
    %c2_i32_145 = arith.constant 2 : i32
    %341 = arith.addi %340, %c2_i32_145 : i32
    %c3_i32_146 = arith.constant 3 : i32
    %342 = arith.muli %341, %c3_i32_146 : i32
    %c0_i32_147 = arith.constant 0 : i32
    %343 = arith.addi %342, %c0_i32_147 : i32
    %344 = arith.index_cast %343 : i32 to index
    %345 = memref.load %arg2[%344] : memref<144xf32, #tpu.memory_space<smem>>
    %346 = vector.extract_strided_slice %0 {offsets = [2, 0, 2, 0], sizes = [1, 2, 16, 16], strides = [1, 1, 1, 1]} : vector<4x2x18x18xbf16> to vector<1x2x16x16xbf16>
    %347 = vector.shape_cast %346 : vector<1x2x16x16xbf16> to vector<2x16x16xbf16>
    %348 = arith.extf %347 : vector<2x16x16xbf16> to vector<2x16x16xf32>
    %349 = vector.broadcast %345 : f32 to vector<2x16x16xf32>
    %350 = arith.mulf %349, %348 : vector<2x16x16xf32>
    %351 = arith.addf %337, %350 : vector<2x16x16xf32>
    %c4_i32_148 = arith.constant 4 : i32
    %352 = arith.muli %arg0, %c4_i32_148 : i32
    %c2_i32_149 = arith.constant 2 : i32
    %353 = arith.addi %352, %c2_i32_149 : i32
    %c3_i32_150 = arith.constant 3 : i32
    %354 = arith.muli %353, %c3_i32_150 : i32
    %c2_i32_151 = arith.constant 2 : i32
    %355 = arith.addi %354, %c2_i32_151 : i32
    %c3_i32_152 = arith.constant 3 : i32
    %356 = arith.muli %355, %c3_i32_152 : i32
    %c1_i32_153 = arith.constant 1 : i32
    %357 = arith.addi %356, %c1_i32_153 : i32
    %358 = arith.index_cast %357 : i32 to index
    %359 = memref.load %arg2[%358] : memref<144xf32, #tpu.memory_space<smem>>
    %360 = vector.extract_strided_slice %0 {offsets = [2, 0, 2, 1], sizes = [1, 2, 16, 16], strides = [1, 1, 1, 1]} : vector<4x2x18x18xbf16> to vector<1x2x16x16xbf16>
    %361 = vector.shape_cast %360 : vector<1x2x16x16xbf16> to vector<2x16x16xbf16>
    %362 = arith.extf %361 : vector<2x16x16xbf16> to vector<2x16x16xf32>
    %363 = vector.broadcast %359 : f32 to vector<2x16x16xf32>
    %364 = arith.mulf %363, %362 : vector<2x16x16xf32>
    %365 = arith.addf %351, %364 : vector<2x16x16xf32>
    %c4_i32_154 = arith.constant 4 : i32
    %366 = arith.muli %arg0, %c4_i32_154 : i32
    %c2_i32_155 = arith.constant 2 : i32
    %367 = arith.addi %366, %c2_i32_155 : i32
    %c3_i32_156 = arith.constant 3 : i32
    %368 = arith.muli %367, %c3_i32_156 : i32
    %c2_i32_157 = arith.constant 2 : i32
    %369 = arith.addi %368, %c2_i32_157 : i32
    %c3_i32_158 = arith.constant 3 : i32
    %370 = arith.muli %369, %c3_i32_158 : i32
    %c2_i32_159 = arith.constant 2 : i32
    %371 = arith.addi %370, %c2_i32_159 : i32
    %372 = arith.index_cast %371 : i32 to index
    %373 = memref.load %arg2[%372] : memref<144xf32, #tpu.memory_space<smem>>
    %374 = vector.extract_strided_slice %0 {offsets = [2, 0, 2, 2], sizes = [1, 2, 16, 16], strides = [1, 1, 1, 1]} : vector<4x2x18x18xbf16> to vector<1x2x16x16xbf16>
    %375 = vector.shape_cast %374 : vector<1x2x16x16xbf16> to vector<2x16x16xbf16>
    %376 = arith.extf %375 : vector<2x16x16xbf16> to vector<2x16x16xf32>
    %377 = vector.broadcast %373 : f32 to vector<2x16x16xf32>
    %378 = arith.mulf %377, %376 : vector<2x16x16xf32>
    %379 = arith.addf %365, %378 : vector<2x16x16xf32>
    %c4_i32_160 = arith.constant 4 : i32
    %380 = arith.muli %arg0, %c4_i32_160 : i32
    %c3_i32_161 = arith.constant 3 : i32
    %381 = arith.addi %380, %c3_i32_161 : i32
    %c3_i32_162 = arith.constant 3 : i32
    %382 = arith.muli %381, %c3_i32_162 : i32
    %c0_i32_163 = arith.constant 0 : i32
    %383 = arith.addi %382, %c0_i32_163 : i32
    %c3_i32_164 = arith.constant 3 : i32
    %384 = arith.muli %383, %c3_i32_164 : i32
    %c0_i32_165 = arith.constant 0 : i32
    %385 = arith.addi %384, %c0_i32_165 : i32
    %386 = arith.index_cast %385 : i32 to index
    %387 = memref.load %arg2[%386] : memref<144xf32, #tpu.memory_space<smem>>
    %388 = vector.extract_strided_slice %0 {offsets = [3, 0, 0, 0], sizes = [1, 2, 16, 16], strides = [1, 1, 1, 1]} : vector<4x2x18x18xbf16> to vector<1x2x16x16xbf16>
    %389 = vector.shape_cast %388 : vector<1x2x16x16xbf16> to vector<2x16x16xbf16>
    %390 = arith.extf %389 : vector<2x16x16xbf16> to vector<2x16x16xf32>
    %391 = vector.broadcast %387 : f32 to vector<2x16x16xf32>
    %392 = arith.mulf %391, %390 : vector<2x16x16xf32>
    %393 = arith.addf %379, %392 : vector<2x16x16xf32>
    %c4_i32_166 = arith.constant 4 : i32
    %394 = arith.muli %arg0, %c4_i32_166 : i32
    %c3_i32_167 = arith.constant 3 : i32
    %395 = arith.addi %394, %c3_i32_167 : i32
    %c3_i32_168 = arith.constant 3 : i32
    %396 = arith.muli %395, %c3_i32_168 : i32
    %c0_i32_169 = arith.constant 0 : i32
    %397 = arith.addi %396, %c0_i32_169 : i32
    %c3_i32_170 = arith.constant 3 : i32
    %398 = arith.muli %397, %c3_i32_170 : i32
    %c1_i32_171 = arith.constant 1 : i32
    %399 = arith.addi %398, %c1_i32_171 : i32
    %400 = arith.index_cast %399 : i32 to index
    %401 = memref.load %arg2[%400] : memref<144xf32, #tpu.memory_space<smem>>
    %402 = vector.extract_strided_slice %0 {offsets = [3, 0, 0, 1], sizes = [1, 2, 16, 16], strides = [1, 1, 1, 1]} : vector<4x2x18x18xbf16> to vector<1x2x16x16xbf16>
    %403 = vector.shape_cast %402 : vector<1x2x16x16xbf16> to vector<2x16x16xbf16>
    %404 = arith.extf %403 : vector<2x16x16xbf16> to vector<2x16x16xf32>
    %405 = vector.broadcast %401 : f32 to vector<2x16x16xf32>
    %406 = arith.mulf %405, %404 : vector<2x16x16xf32>
    %407 = arith.addf %393, %406 : vector<2x16x16xf32>
    %c4_i32_172 = arith.constant 4 : i32
    %408 = arith.muli %arg0, %c4_i32_172 : i32
    %c3_i32_173 = arith.constant 3 : i32
    %409 = arith.addi %408, %c3_i32_173 : i32
    %c3_i32_174 = arith.constant 3 : i32
    %410 = arith.muli %409, %c3_i32_174 : i32
    %c0_i32_175 = arith.constant 0 : i32
    %411 = arith.addi %410, %c0_i32_175 : i32
    %c3_i32_176 = arith.constant 3 : i32
    %412 = arith.muli %411, %c3_i32_176 : i32
    %c2_i32_177 = arith.constant 2 : i32
    %413 = arith.addi %412, %c2_i32_177 : i32
    %414 = arith.index_cast %413 : i32 to index
    %415 = memref.load %arg2[%414] : memref<144xf32, #tpu.memory_space<smem>>
    %416 = vector.extract_strided_slice %0 {offsets = [3, 0, 0, 2], sizes = [1, 2, 16, 16], strides = [1, 1, 1, 1]} : vector<4x2x18x18xbf16> to vector<1x2x16x16xbf16>
    %417 = vector.shape_cast %416 : vector<1x2x16x16xbf16> to vector<2x16x16xbf16>
    %418 = arith.extf %417 : vector<2x16x16xbf16> to vector<2x16x16xf32>
    %419 = vector.broadcast %415 : f32 to vector<2x16x16xf32>
    %420 = arith.mulf %419, %418 : vector<2x16x16xf32>
    %421 = arith.addf %407, %420 : vector<2x16x16xf32>
    %c4_i32_178 = arith.constant 4 : i32
    %422 = arith.muli %arg0, %c4_i32_178 : i32
    %c3_i32_179 = arith.constant 3 : i32
    %423 = arith.addi %422, %c3_i32_179 : i32
    %c3_i32_180 = arith.constant 3 : i32
    %424 = arith.muli %423, %c3_i32_180 : i32
    %c1_i32_181 = arith.constant 1 : i32
    %425 = arith.addi %424, %c1_i32_181 : i32
    %c3_i32_182 = arith.constant 3 : i32
    %426 = arith.muli %425, %c3_i32_182 : i32
    %c0_i32_183 = arith.constant 0 : i32
    %427 = arith.addi %426, %c0_i32_183 : i32
    %428 = arith.index_cast %427 : i32 to index
    %429 = memref.load %arg2[%428] : memref<144xf32, #tpu.memory_space<smem>>
    %430 = vector.extract_strided_slice %0 {offsets = [3, 0, 1, 0], sizes = [1, 2, 16, 16], strides = [1, 1, 1, 1]} : vector<4x2x18x18xbf16> to vector<1x2x16x16xbf16>
    %431 = vector.shape_cast %430 : vector<1x2x16x16xbf16> to vector<2x16x16xbf16>
    %432 = arith.extf %431 : vector<2x16x16xbf16> to vector<2x16x16xf32>
    %433 = vector.broadcast %429 : f32 to vector<2x16x16xf32>
    %434 = arith.mulf %433, %432 : vector<2x16x16xf32>
    %435 = arith.addf %421, %434 : vector<2x16x16xf32>
    %c4_i32_184 = arith.constant 4 : i32
    %436 = arith.muli %arg0, %c4_i32_184 : i32
    %c3_i32_185 = arith.constant 3 : i32
    %437 = arith.addi %436, %c3_i32_185 : i32
    %c3_i32_186 = arith.constant 3 : i32
    %438 = arith.muli %437, %c3_i32_186 : i32
    %c1_i32_187 = arith.constant 1 : i32
    %439 = arith.addi %438, %c1_i32_187 : i32
    %c3_i32_188 = arith.constant 3 : i32
    %440 = arith.muli %439, %c3_i32_188 : i32
    %c1_i32_189 = arith.constant 1 : i32
    %441 = arith.addi %440, %c1_i32_189 : i32
    %442 = arith.index_cast %441 : i32 to index
    %443 = memref.load %arg2[%442] : memref<144xf32, #tpu.memory_space<smem>>
    %444 = vector.extract_strided_slice %0 {offsets = [3, 0, 1, 1], sizes = [1, 2, 16, 16], strides = [1, 1, 1, 1]} : vector<4x2x18x18xbf16> to vector<1x2x16x16xbf16>
    %445 = vector.shape_cast %444 : vector<1x2x16x16xbf16> to vector<2x16x16xbf16>
    %446 = arith.extf %445 : vector<2x16x16xbf16> to vector<2x16x16xf32>
    %447 = vector.broadcast %443 : f32 to vector<2x16x16xf32>
    %448 = arith.mulf %447, %446 : vector<2x16x16xf32>
    %449 = arith.addf %435, %448 : vector<2x16x16xf32>
    %c4_i32_190 = arith.constant 4 : i32
    %450 = arith.muli %arg0, %c4_i32_190 : i32
    %c3_i32_191 = arith.constant 3 : i32
    %451 = arith.addi %450, %c3_i32_191 : i32
    %c3_i32_192 = arith.constant 3 : i32
    %452 = arith.muli %451, %c3_i32_192 : i32
    %c1_i32_193 = arith.constant 1 : i32
    %453 = arith.addi %452, %c1_i32_193 : i32
    %c3_i32_194 = arith.constant 3 : i32
    %454 = arith.muli %453, %c3_i32_194 : i32
    %c2_i32_195 = arith.constant 2 : i32
    %455 = arith.addi %454, %c2_i32_195 : i32
    %456 = arith.index_cast %455 : i32 to index
    %457 = memref.load %arg2[%456] : memref<144xf32, #tpu.memory_space<smem>>
    %458 = vector.extract_strided_slice %0 {offsets = [3, 0, 1, 2], sizes = [1, 2, 16, 16], strides = [1, 1, 1, 1]} : vector<4x2x18x18xbf16> to vector<1x2x16x16xbf16>
    %459 = vector.shape_cast %458 : vector<1x2x16x16xbf16> to vector<2x16x16xbf16>
    %460 = arith.extf %459 : vector<2x16x16xbf16> to vector<2x16x16xf32>
    %461 = vector.broadcast %457 : f32 to vector<2x16x16xf32>
    %462 = arith.mulf %461, %460 : vector<2x16x16xf32>
    %463 = arith.addf %449, %462 : vector<2x16x16xf32>
    %c4_i32_196 = arith.constant 4 : i32
    %464 = arith.muli %arg0, %c4_i32_196 : i32
    %c3_i32_197 = arith.constant 3 : i32
    %465 = arith.addi %464, %c3_i32_197 : i32
    %c3_i32_198 = arith.constant 3 : i32
    %466 = arith.muli %465, %c3_i32_198 : i32
    %c2_i32_199 = arith.constant 2 : i32
    %467 = arith.addi %466, %c2_i32_199 : i32
    %c3_i32_200 = arith.constant 3 : i32
    %468 = arith.muli %467, %c3_i32_200 : i32
    %c0_i32_201 = arith.constant 0 : i32
    %469 = arith.addi %468, %c0_i32_201 : i32
    %470 = arith.index_cast %469 : i32 to index
    %471 = memref.load %arg2[%470] : memref<144xf32, #tpu.memory_space<smem>>
    %472 = vector.extract_strided_slice %0 {offsets = [3, 0, 2, 0], sizes = [1, 2, 16, 16], strides = [1, 1, 1, 1]} : vector<4x2x18x18xbf16> to vector<1x2x16x16xbf16>
    %473 = vector.shape_cast %472 : vector<1x2x16x16xbf16> to vector<2x16x16xbf16>
    %474 = arith.extf %473 : vector<2x16x16xbf16> to vector<2x16x16xf32>
    %475 = vector.broadcast %471 : f32 to vector<2x16x16xf32>
    %476 = arith.mulf %475, %474 : vector<2x16x16xf32>
    %477 = arith.addf %463, %476 : vector<2x16x16xf32>
    %c4_i32_202 = arith.constant 4 : i32
    %478 = arith.muli %arg0, %c4_i32_202 : i32
    %c3_i32_203 = arith.constant 3 : i32
    %479 = arith.addi %478, %c3_i32_203 : i32
    %c3_i32_204 = arith.constant 3 : i32
    %480 = arith.muli %479, %c3_i32_204 : i32
    %c2_i32_205 = arith.constant 2 : i32
    %481 = arith.addi %480, %c2_i32_205 : i32
    %c3_i32_206 = arith.constant 3 : i32
    %482 = arith.muli %481, %c3_i32_206 : i32
    %c1_i32_207 = arith.constant 1 : i32
    %483 = arith.addi %482, %c1_i32_207 : i32
    %484 = arith.index_cast %483 : i32 to index
    %485 = memref.load %arg2[%484] : memref<144xf32, #tpu.memory_space<smem>>
    %486 = vector.extract_strided_slice %0 {offsets = [3, 0, 2, 1], sizes = [1, 2, 16, 16], strides = [1, 1, 1, 1]} : vector<4x2x18x18xbf16> to vector<1x2x16x16xbf16>
    %487 = vector.shape_cast %486 : vector<1x2x16x16xbf16> to vector<2x16x16xbf16>
    %488 = arith.extf %487 : vector<2x16x16xbf16> to vector<2x16x16xf32>
    %489 = vector.broadcast %485 : f32 to vector<2x16x16xf32>
    %490 = arith.mulf %489, %488 : vector<2x16x16xf32>
    %491 = arith.addf %477, %490 : vector<2x16x16xf32>
    %c4_i32_208 = arith.constant 4 : i32
    %492 = arith.muli %arg0, %c4_i32_208 : i32
    %c3_i32_209 = arith.constant 3 : i32
    %493 = arith.addi %492, %c3_i32_209 : i32
    %c3_i32_210 = arith.constant 3 : i32
    %494 = arith.muli %493, %c3_i32_210 : i32
    %c2_i32_211 = arith.constant 2 : i32
    %495 = arith.addi %494, %c2_i32_211 : i32
    %c3_i32_212 = arith.constant 3 : i32
    %496 = arith.muli %495, %c3_i32_212 : i32
    %c2_i32_213 = arith.constant 2 : i32
    %497 = arith.addi %496, %c2_i32_213 : i32
    %498 = arith.index_cast %497 : i32 to index
    %499 = memref.load %arg2[%498] : memref<144xf32, #tpu.memory_space<smem>>
    %500 = vector.extract_strided_slice %0 {offsets = [3, 0, 2, 2], sizes = [1, 2, 16, 16], strides = [1, 1, 1, 1]} : vector<4x2x18x18xbf16> to vector<1x2x16x16xbf16>
    %501 = vector.shape_cast %500 : vector<1x2x16x16xbf16> to vector<2x16x16xbf16>
    %502 = arith.extf %501 : vector<2x16x16xbf16> to vector<2x16x16xf32>
    %503 = vector.broadcast %499 : f32 to vector<2x16x16xf32>
    %504 = arith.mulf %503, %502 : vector<2x16x16xf32>
    %505 = arith.addf %491, %504 : vector<2x16x16xf32>
    %506 = vector.shape_cast %505 : vector<2x16x16xf32> to vector<1x2x16x16xf32>
    %cst_214 = arith.constant dense<0.000000e+00> : vector<1xf32>
    %507 = vector.multi_reduction <add>, %506, %cst_214 [1, 2, 3] : vector<1x2x16x16xf32> to vector<1xf32>
    %508 = vector.shape_cast %507 : vector<1xf32> to vector<1x1x1x1xf32>
    %509 = vector.extract %508[0, 0, 0, 0] : f32 from vector<1x1x1x1xf32>
    %cst_215 = arith.constant 0.001953125 : f32
    %510 = arith.mulf %509, %cst_215 : f32
    %511 = vector.broadcast %510 : f32 to vector<2x16x16xf32>
    %512 = arith.subf %505, %511 : vector<2x16x16xf32>
    %513 = arith.mulf %512, %512 : vector<2x16x16xf32>
    %514 = vector.shape_cast %513 : vector<2x16x16xf32> to vector<1x2x16x16xf32>
    %cst_216 = arith.constant dense<0.000000e+00> : vector<1xf32>
    %515 = vector.multi_reduction <add>, %514, %cst_216 [1, 2, 3] : vector<1x2x16x16xf32> to vector<1xf32>
    %516 = vector.shape_cast %515 : vector<1xf32> to vector<1x1x1x1xf32>
    %517 = vector.extract %516[0, 0, 0, 0] : f32 from vector<1x1x1x1xf32>
    %cst_217 = arith.constant 0.001953125 : f32
    %518 = arith.mulf %517, %cst_217 : f32
    %cst_218 = arith.constant 9.99999974E-6 : f32
    %519 = arith.addf %518, %cst_218 : f32
    %520 = math.rsqrt %519 : f32
    %521 = vector.broadcast %520 : f32 to vector<2x16x16xf32>
    %522 = arith.mulf %512, %521 : vector<2x16x16xf32>
    %523 = arith.index_cast %arg0 : i32 to index
    %524 = memref.load %arg3[%523] : memref<4xf32, #tpu.memory_space<smem>>
    %525 = vector.broadcast %524 : f32 to vector<2x16x16xf32>
    %526 = arith.mulf %522, %525 : vector<2x16x16xf32>
    %527 = arith.index_cast %arg0 : i32 to index
    %528 = memref.load %arg4[%527] : memref<4xf32, #tpu.memory_space<smem>>
    %529 = vector.broadcast %528 : f32 to vector<2x16x16xf32>
    %530 = arith.addf %526, %529 : vector<2x16x16xf32>
    %c0_219 = arith.constant 0 : index
    %c0_220 = arith.constant 0 : index
    %c0_221 = arith.constant 0 : index
    %c0_222 = arith.constant 0 : index
    %531 = vector.load %arg5[%c0_219, %c0_220, %c0_221, %c0_222] : memref<2x1x16x16xf32, #tpu.memory_space<vmem>>, vector<2x1x16x16xf32>
    %cst_223 = arith.constant 0.000000e+00 : f32
    %532 = vector.broadcast %cst_223 : f32 to vector<2x16x16xf32>
    %533 = arith.maximumf %530, %532 : vector<2x16x16xf32>
    %534 = vector.shape_cast %533 : vector<2x16x16xf32> to vector<2x1x16x16xf32>
    %535 = arith.addf %531, %534 : vector<2x1x16x16xf32>
    %c0_224 = arith.constant 0 : index
    %c0_225 = arith.constant 0 : index
    %c0_226 = arith.constant 0 : index
    %c0_227 = arith.constant 0 : index
    %536 = vector.load %arg6[%c0_224, %c0_225, %c0_226, %c0_227] : memref<2x1x16x16xf32, #tpu.memory_space<vmem>>, vector<2x1x16x16xf32>
    tpu.vector_store %arg6[%c0_224, %c0_225, %c0_226, %c0_227], %535 {strides = array<i32>} : memref<2x1x16x16xf32, #tpu.memory_space<vmem>>, vector<2x1x16x16xf32>,
    return
  }
  func.func @transform_0(%arg0: i32) -> (i32, i32, i32, i32) {
    %c0_i32 = arith.constant 0 : i32
    %c0_i32_0 = arith.constant 0 : i32
    %c0_i32_1 = arith.constant 0 : i32
    %c0_i32_2 = arith.constant 0 : i32
    %c0_i32_3 = arith.constant 0 : i32
    return %c0_i32, %c0_i32_0, %c0_i32_1, %c0_i32_2 : i32, i32, i32, i32
  }
  func.func @transform_1(%arg0: i32) -> i32 {
    %c0_i32 = arith.constant 0 : i32
    %c0_i32_0 = arith.constant 0 : i32
    return %c0_i32 : i32
  }
  func.func @transform_2(%arg0: i32) -> i32 {
    %c0_i32 = arith.constant 0 : i32
    %c0_i32_0 = arith.constant 0 : i32
    return %c0_i32 : i32
  }
  func.func @transform_3(%arg0: i32) -> i32 {
    %c0_i32 = arith.constant 0 : i32
    %c0_i32_0 = arith.constant 0 : i32
    return %c0_i32 : i32
  }
  func.func @transform_4(%arg0: i32) -> (i32, i32, i32, i32) {
    %c0_i32 = arith.constant 0 : i32
    %c0_i32_0 = arith.constant 0 : i32
    %c0_i32_1 = arith.constant 0 : i32
    %c0_i32_2 = arith.constant 0 : i32
    return %c0_i32, %arg0, %c0_i32_0, %c0_i32_1 : i32, i32, i32, i32
  }
  func.func @transform_5(%arg0: i32) -> (i32, i32, i32, i32) {
    %c0_i32 = arith.constant 0 : i32
    %c0_i32_0 = arith.constant 0 : i32
    %c0_i32_1 = arith.constant 0 : i32
    %c0_i32_2 = arith.constant 0 : i32
    return %c0_i32, %arg0, %c0_i32_0, %c0_i32_1 : i32, i32, i32, i32
  }
}

</mosaic_0001>

<bundles_post_ra>
// kernel: gf_block_forward.2
= control target key start
LH: loop header
LB: loop body
LE: loop exit
PB: predicated region body
PF: predicated region fallthrough
CT: control target
= control target key end

     0   :  { %9 = vsyncpa [#allocation3], 0  ;;  %s1054_s0 = inlined_call_operand.vmem [shape: f32[4,2,256], index: 0, kind: input, shape index: {}]   ;;  %s1055_s1 = inlined_call_operand.vmem [shape: bf16[4,256,256], index: 1, kind: input, shape index: {}]   ;;  %s1056_s2 = inlined_call_operand.vmem [shape: f32[4], index: 2, kind: input, shape index: {}]   ;;  %s1057_s3 = inlined_call_operand.vmem [shape: f32[4], index: 3, kind: input, shape index: {}]   ;;  %s1058_s4 = inlined_call_operand.vmem [shape: bf16[4,2,256], index: 4, kind: output, shape index: {}]  }
   0x1   :  { %10 = vsyncpa [#allocation5], 0  ;;  %s936_s15 = smov 0  }
   0x2 LB: > { %s942_s16 = sadd.s32 4294967295, %s907_s15   ;;  %p650_p0 = scmp.ge.s32.totalorder %s907_s15, 1  ;;  %s907_s15 = sphi %s936_s15, %s16_s15  }
   0x3   : > { %p141_p1 = scmp.lt.s32.totalorder %s907_s15, 5  ;;  %s153_s19 = sshll.u32 %s1056_s2, 4  ;;  %s154_s19 = int_to_ptr.vmem [resolvable:$true] %s153_s19 }
   0x4   : > { %p847_p3 = scmp.eq.s32.totalorder %s942_s16, 0  ;;  %s163_s22 = sshll.u32 %s1057_s3, 4  ;;  %s164_s22 = int_to_ptr.vmem [resolvable:$true] %s163_s22 }
   0x5   : > { %p142_p2 = pnand %p650_p0, %p141_p1  ;;  %s909_s23 = smov [#allocation2]  }
   0x6   : > { %s910_s24 = smov [#allocation4]  }
   0x7   : > { %p840_p4 = pneg %p142_p2 }
   0x8   : > { %192 = sbr.rel (%p142_p2) target bundleno = 649 (0x289), region = 36 }
   0x9   : > { %p841_p5 = pnand %p847_p3, %p840_p4 }
   0xb   : > { %843 = dma.vmem_to_smem (!%p841_p5), %s154_s19, 16, %s909_s23, [#allocation3]  }
   0xc   : > { %846 = dma.vmem_to_smem (!%p841_p5), %s164_s22, 16, %s910_s24, [#allocation5]  }
   0xd   : > { %898 = dma.done.wait (%p847_p3), [#allocation3], 16  }
   0xe   : > { %900 = vsyncadd (%p847_p3), [#allocation3], 4294967280 }
   0xf   : > { %902 = dma.done.wait (%p847_p3), [#allocation5], 16  }
  0x10   : > { %904 = vsyncadd (%p847_p3), [#allocation5], 4294967280 }
  0x11   : > { %204 = sfence }
  0x12   : > { %p229_p6 = scmp.lt.s32.totalorder %s942_s16, 3  ;;  %vm496_vm0 = vcmask 1041408   ;;  %s544_s13 = sld [smem:[#allocation2 + %s942_s16]]  ;;  %vm555_vm4 = vcmask 1040384  }
  0x13   : > { %s548_s14 = sld [smem:[#allocation4 + %s942_s16]] }
  0x14   : > { %s965_s25 = scalar_select %p229_p6, %s942_s16, 3 }
  0x16   : > { %s793_s26 = sshll.u32 %s965_s25, 8  ;;  %s792_s30 = sshll.u32 %s965_s25, 2 }
  0x17   : > { %s971_s29 = scalar_lea.vmem %s1055_s1, %s793_s26  ;;  %s233_s7 = scalar_lea.vmem %s1054_s0, %s792_s30 }
  0x18   : > { %v720_v0 = vld [vmem:[%s971_s29 + $0x70] sm:$0xf]  ;;  %v809_v1 = vld [vmem:[%s971_s29 + $0x74] sm:$0xf0]  ;;  %v808_v5 = vld [vmem:[%s971_s29 + $0x74] sm:$0xf] }
  0x19   : > { %v784_v2 = vld [vmem:[%s971_s29 + $0xf0] sm:$0xf]  ;;  %v721_v3 = vor.u32 %v809_v1, %v720_v0  ;;  %v825_v4 = vld [vmem:[%s971_s29 + $0xf4] sm:$0xf0]  ;;  %v722_v6 = vld [vmem:[%s971_s29 + $0x78] sm:$0xf0] }
  0x1a   : > { %v785_v7 = vor.u32 %v825_v4, %v784_v2  ;;  %v725_v8 = vor.u32 %v808_v5, %v722_v6  ;;  %v824_v9 = vld [vmem:[%s971_s29 + $0xf4] sm:$0xf]  ;;  %v786_v10 = vld [vmem:[%s971_s29 + $0xf8] sm:$0xf0]  ;;  %v712_v11 = vld [vmem:[%s971_s29 + $0x60] sm:$0xf] }
  0x1b   : > { %444 = vmatpush.bf16.msra.mxu0 %v721_v3  ;;  %v789_v12 = vor.u32 %v824_v9, %v786_v10  ;;  %v807_v13 = vld [vmem:[%s971_s29 + $0x64] sm:$0xf0]  ;;  %v776_v14 = vld [vmem:[%s971_s29 + $0xe0] sm:$0xf]  ;;  %v806_v18 = vld [vmem:[%s971_s29 + $0x64] sm:$0xf] }
  0x1c   : > { %v823_v15 = vld [vmem:[%s971_s29 + $0xe4] sm:$0xf0]  ;;  %457 = vmatpush.bf16.msra.mxu1 %v785_v7  ;;  %470 = vmatpush.bf16.msra.mxu2 %v725_v8  ;;  %v713_v16 = vor.u32 %v807_v13, %v712_v11  ;;  %v714_v19 = vld [vmem:[%s971_s29 + $0x68] sm:$0xf0]  ;;  %v822_v20 = vld [vmem:[%s971_s29 + $0xe4] sm:$0xf] }
  0x1d   : > { %v777_v17 = vor.u32 %v823_v15, %v776_v14  ;;  %483 = vmatpush.bf16.msra.mxu3 %v789_v12  ;;  %v717_v21 = vor.u32 %v806_v18, %v714_v19  ;;  %v778_v22 = vld [vmem:[%s971_s29 + $0xe8] sm:$0xf0]  ;;  %v704_v23 = vld [vmem:[%s971_s29 + $0x50] sm:$0xf]  ;;  %v805_v24 = vld [vmem:[%s971_s29 + $0x54] sm:$0xf0] }
  0x1e   : > { %v781_v25 = vor.u32 %v822_v20, %v778_v22  ;;  %v768_v26 = vld [vmem:[%s971_s29 + $0xd0] sm:$0xf]  ;;  %v821_v27 = vld [vmem:[%s971_s29 + $0xd4] sm:$0xf0]  ;;  %v804_v28 = vld [vmem:[%s971_s29 + $0x54] sm:$0xf]  ;;  %v705_v29 = vor.u32 %v805_v24, %v704_v23 }
  0x1f   : > { %445 = vmatpush.bf16.msra.mxu0 %v713_v16  ;;  %v706_v30 = vld [vmem:[%s971_s29 + $0x58] sm:$0xf0]  ;;  %v820_v31 = vld [vmem:[%s971_s29 + $0xd4] sm:$0xf]  ;;  %v769_v33 = vor.u32 %v821_v27, %v768_v26  ;;  %v696_v35 = vld [vmem:[%s971_s29 + $0x40] sm:$0xf] }
  0x20   : > { %v770_v32 = vld [vmem:[%s971_s29 + $0xd8] sm:$0xf0]  ;;  %458 = vmatpush.bf16.msra.mxu1 %v777_v17  ;;  %471 = vmatpush.bf16.msra.mxu2 %v717_v21  ;;  %v709_v34 = vor.u32 %v804_v28, %v706_v30  ;;  %v803_v36 = vld [vmem:[%s971_s29 + $0x44] sm:$0xf0]  ;;  %v760_v37 = vld [vmem:[%s971_s29 + $0xc0] sm:$0xf] }
  0x21   : > { %484 = vmatpush.bf16.msra.mxu3 %v781_v25  ;;  %v773_v38 = vor.u32 %v820_v31, %v770_v32  ;;  %v819_v39 = vld [vmem:[%s971_s29 + $0xc4] sm:$0xf0]  ;;  %v802_v40 = vld [vmem:[%s971_s29 + $0x44] sm:$0xf]  ;;  %v698_v41 = vld [vmem:[%s971_s29 + $0x48] sm:$0xf0]  ;;  %v697_v44 = vor.u32 %v803_v36, %v696_v35 }
  0x22   : > { %v818_v42 = vld [vmem:[%s971_s29 + $0xc4] sm:$0xf]  ;;  %v762_v43 = vld [vmem:[%s971_s29 + $0xc8] sm:$0xf0]  ;;  %v761_v45 = vor.u32 %v819_v39, %v760_v37  ;;  %v701_v46 = vor.u32 %v802_v40, %v698_v41  ;;  %v688_v47 = vld [vmem:[%s971_s29 + $0x30] sm:$0xf] }
  0x23   : > { %446 = vmatpush.bf16.msra.mxu0 %v705_v29  ;;  %v801_v48 = vld [vmem:[%s971_s29 + $0x34] sm:$0xf0]  ;;  %v752_v49 = vld [vmem:[%s971_s29 + $0xb0] sm:$0xf]  ;;  %v765_v50 = vor.u32 %v818_v42, %v762_v43  ;;  %v800_v52 = vld [vmem:[%s971_s29 + $0x34] sm:$0xf] }
  0x24   : > { %459 = vmatpush.bf16.msra.mxu1 %v769_v33  ;;  %472 = vmatpush.bf16.msra.mxu2 %v709_v34  ;;  %v817_v51 = vld [vmem:[%s971_s29 + $0xb4] sm:$0xf0]  ;;  %v690_v53 = vld [vmem:[%s971_s29 + $0x38] sm:$0xf0]  ;;  %v816_v54 = vld [vmem:[%s971_s29 + $0xb4] sm:$0xf]  ;;  %v689_v56 = vor.u32 %v801_v48, %v688_v47 }
  0x25   : > { %485 = vmatpush.bf16.msra.mxu3 %v773_v38  ;;  %v754_v55 = vld [vmem:[%s971_s29 + $0xb8] sm:$0xf0]  ;;  %v753_v57 = vor.u32 %v817_v51, %v752_v49  ;;  %v693_v58 = vor.u32 %v800_v52, %v690_v53  ;;  %v680_v59 = vld [vmem:[%s971_s29 + $0x20] sm:$0xf]  ;;  %v799_v60 = vld [vmem:[%s971_s29 + $0x24] sm:$0xf0] }
  0x26   : > { %v744_v61 = vld [vmem:[%s971_s29 + $0xa0] sm:$0xf]  ;;  %v757_v62 = vor.u32 %v816_v54, %v754_v55  ;;  %v815_v63 = vld [vmem:[%s971_s29 + $0xa4] sm:$0xf0]  ;;  %v798_v0 = vld [vmem:[%s971_s29 + $0x24] sm:$0xf]  ;;  %v681_v4 = vor.u32 %v799_v60, %v680_v59 }
  0x27   : > { %447 = vmatpush.bf16.msra.mxu0 %v697_v44  ;;  %v682_v1 = vld [vmem:[%s971_s29 + $0x28] sm:$0xf0]  ;;  %v814_v2 = vld [vmem:[%s971_s29 + $0xa4] sm:$0xf]  ;;  %v672_v5 = vld [vmem:[%s971_s29 + $0x10] sm:$0xf]  ;;  %v745_v6 = vor.u32 %v815_v63, %v744_v61 }
  0x28   : > { %460 = vmatpush.bf16.msra.mxu1 %v761_v45  ;;  %473 = vmatpush.bf16.msra.mxu2 %v701_v46  ;;  %v746_v3 = vld [vmem:[%s971_s29 + $0xa8] sm:$0xf0]  ;;  %v685_v7 = vor.u32 %v798_v0, %v682_v1  ;;  %v797_v8 = vld [vmem:[%s971_s29 + $0x14] sm:$0xf0]  ;;  %v736_v9 = vld [vmem:[%s971_s29 + $0x90] sm:$0xf] }
  0x29   : > { %486 = vmatpush.bf16.msra.mxu3 %v765_v50  ;;  %v813_v10 = vld [vmem:[%s971_s29 + $0x94] sm:$0xf0]  ;;  %v749_v11 = vor.u32 %v814_v2, %v746_v3  ;;  %v796_v12 = vld [vmem:[%s971_s29 + $0x14] sm:$0xf]  ;;  %v674_v13 = vld [vmem:[%s971_s29 + $0x18] sm:$0xf0]  ;;  %v673_v17 = vor.u32 %v797_v8, %v672_v5 }
  0x2a   : > { %v243_v14 = vld [vmem:[%s233_s7] sm:$0xf]  ;;  %v812_v15 = vld [vmem:[%s971_s29 + $0x94] sm:$0xf]  ;;  %v738_v16 = vld [vmem:[%s971_s29 + $0x98] sm:$0xf0]  ;;  %v737_v18 = vor.u32 %v813_v10, %v736_v9  ;;  %v677_v19 = vor.u32 %v796_v12, %v674_v13 }
  0x2b   : > { %448 = vmatpush.bf16.msra.mxu0 %v689_v56  ;;  %245 = vst [vmem:[#allocation1] ss:$4 sm:$0xff] %v243_v14  ;;  %v664_v20 = vld [vmem:[%s971_s29] sm:$0xf]  ;;  %v795_v21 = vld [vmem:[%s971_s29 + $0x4] sm:$0xf0]  ;;  %v741_v23 = vor.u32 %v812_v15, %v738_v16 }
  0x2c   : > { %461 = vmatpush.bf16.msra.mxu1 %v753_v57  ;;  %474 = vmatpush.bf16.msra.mxu2 %v693_v58  ;;  %v728_v22 = vld [vmem:[%s971_s29 + $0x80] sm:$0xf]  ;;  %v811_v24 = vld [vmem:[%s971_s29 + $0x84] sm:$0xf0]  ;;  %v794_v25 = vld [vmem:[%s971_s29 + $0x4] sm:$0xf]  ;;  %v665_v29 = vor.u32 %v795_v21, %v664_v20  ;;  %v549_v20 = vstv %s548_s14 }
  0x2d   : > { %487 = vmatpush.bf16.msra.mxu3 %v757_v62  ;;  %v666_v26 = vld [vmem:[%s971_s29 + $0x8] sm:$0xf0]  ;;  %v810_v27 = vld [vmem:[%s971_s29 + $0x84] sm:$0xf]  ;;  %v729_v30 = vor.u32 %v811_v24, %v728_v22  ;;  %s661_s18 = sshll.u32 %s965_s25, 1 }
  0x2e   : > { %v730_v28 = vld [vmem:[%s971_s29 + $0x88] sm:$0xf0]  ;;  %v669_v31 = vor.u32 %v794_v25, %v666_v26  ;;  %s242_s21 = scalar_lea.vmem %s1058_s4, %s661_s18 }
  0x2f   : > { %449 = vmatpush.bf16.msra.mxu0 %v681_v4  ;;  %v733_v32 = vor.u32 %v810_v27, %v730_v28 }
  0x30   : > { %462 = vmatpush.bf16.msra.mxu1 %v745_v6  ;;  %475 = vmatpush.bf16.msra.mxu2 %v685_v7 }
  0x31   : > { %488 = vmatpush.bf16.msra.mxu3 %v749_v11 }
  0x32   : > { %v246_v33 = vld.sshfl [vmem:[#allocation1] sm:$0xff pattern:$0x73625140]  ;;  %v247_v34 = vld.sshfl [vmem:[#allocation1 + $0x8] sm:$0xff pattern:$0x73625140] }
  0x33   : > { %450 = vmatpush.bf16.msra.mxu0 %v673_v17  ;;  %v250_v35 = vpack.c.bf16 %v246_v33, %v246_v33  ;;  %v251_v36 = vpack.c.bf16 %v247_v34, %v247_v34  ;;  %v545_v17 = vstv %s544_s13 }
  0x34   : > { %463 = vmatpush.bf16.msra.mxu1 %v737_v18  ;;  %476 = vmatpush.bf16.msra.mxu2 %v677_v19 }
  0x35   : > { %489 = vmatpush.bf16.msra.mxu3 %v741_v23 }
  0x37   : > { %451 = vmatpush.bf16.msra.mxu0 %v665_v29 }
  0x38   : > { %464 = vmatpush.bf16.msra.mxu1 %v729_v30  ;;  %477 = vmatpush.bf16.msra.mxu2 %v669_v31 }
  0x39   : > { %490 = vmatpush.bf16.msra.mxu3 %v733_v32 }
  0x3a   : > { %452 = vmatmul.bf16.vlgmr.msra.gmra.mxu0 %v250_v35 }
  0x3b   : > { %465 = vmatmul.bf16.vlgmr.msra.gmra.mxu1 %v251_v36  ;;  %478 = vmatmul.bf16.vlgmr.msra.gmra.mxu2 %v250_v35 }
  0x3c   : > { %491 = vmatmul.bf16.vlgmr.msra.gmra.mxu3 %v251_v36 }
  0xb7   : > { %v453_v37 = vpop.f32.mrf.mxu0 }
  0xb8   : > { %v466_v38 = vpop.f32.mrf.mxu1 }
  0xb9   : > { %v467_v39 = vadd.f32 %v466_v38, %v453_v37 }
  0xbb   : > { %v497_v45 = vsel %vm496_vm0, %v467_v39, 0.0 }
  0xbe   : > { %v479_v40 = vpop.f32.mrf.mxu2 }
  0xbf   : > { %v492_v41 = vpop.f32.mrf.mxu3  ;;  %v455_v42 = vpop.f32.mrf.mxu0 }
  0xc0   : > { %v493_v43 = vadd.f32 %v492_v41, %v479_v40  ;;  %v468_v44 = vpop.f32.mrf.mxu1 }
  0xc2   : > { %v498_v46 = vsel %vm496_vm0, %v493_v43, 0.0 }
  0xc3   : > { %v499_v47 = vadd.f32 %v498_v46, %v497_v45 }
  0xc5   : > { %500 = vadd.xlane.f32.xlu0 %v499_v47 }
  0xc6   : > { %v481_v48 = vpop.f32.mrf.mxu2 }
  0xc7   : > { %v494_v49 = vpop.f32.mrf.mxu3 }
 0x138   : > { %v501_v50 = vpop.xlane.xlu0 %500 }
 0x139   : > { %v502_v51 = vrot.slane %v501_v50, 4 }
 0x13b   : > { %v503_v52 = vadd.f32 %v502_v51, %v501_v50 }
 0x13d   : > { %v504_v53 = vrot.slane %v503_v52, 2 }
 0x13f   : > { %v505_v54 = vadd.f32 %v504_v53, %v503_v52 }
 0x141   : > { %v506_v55 = vrot.slane %v505_v54, 1 }
 0x143   : > { %v507_v56 = vadd.f32 %v506_v55, %v505_v54 }
 0x145   : > { %826 = vpush %v507_v56 }
 0x176   : > { %s827_s8 = spop %826 }
 0x177   : > { %s509_s9 = smul.f32 0.001953125, %s827_s8 }
 0x179   : > { %v510_v57 = vstv %s509_s9 }
 0x17a   : > { %v511_v58 = vsub.f32 %v467_v39, %v510_v57  ;;  %v512_v59 = vsub.f32 %v493_v43, %v510_v57 }
 0x17c   : > { %v513_v60 = vmul.f32 %v511_v58, %v511_v58  ;;  %v514_v61 = vmul.f32 %v512_v59, %v512_v59 }
 0x17e   : > { %v515_v62 = vsel %vm496_vm0, %v513_v60, 0.0  ;;  %v516_v63 = vsel %vm496_vm0, %v514_v61, 0.0 }
 0x17f   : > { %v517_v0 = vadd.f32 %v516_v63, %v515_v62 }
 0x181   : > { %518 = vadd.xlane.f32.xlu0 %v517_v0 }
 0x1f4   : > { %v519_v1 = vpop.xlane.xlu0 %518 }
 0x1f5   : > { %v520_v2 = vrot.slane %v519_v1, 4 }
 0x1f7   : > { %v521_v3 = vadd.f32 %v520_v2, %v519_v1 }
 0x1f9   : > { %v522_v4 = vrot.slane %v521_v3, 2 }
 0x1fb   : > { %v523_v5 = vadd.f32 %v522_v4, %v521_v3 }
 0x1fd   : > { %v524_v6 = vrot.slane %v523_v5, 1 }
 0x1ff   : > { %v525_v7 = vadd.f32 %v524_v6, %v523_v5 }
 0x201   : > { %828 = vpush %v525_v7 }
 0x232   : > { %s829_s10 = spop %828 }
 0x233   : > { %s527_s11 = smul.f32 0.001953125, %s829_s10 }
 0x235   : > { %s528_s12 = sadd.f32 1e-05, %s527_s11 }
 0x237   : > { %v529_v8 = vstv %s528_s12 }
 0x238   : > { %861 = vrsqrt.f32 %v529_v8  ;;  %vm536_vm2 = vweird.f32 %v529_v8 }
 0x23e   : > { %v862_v9 = vpop.eup %861 }
 0x23f   : > { %v531_v10 = vmul.f32 %v862_v9, %v529_v8  ;;  %vm537_vm1 = vweird.f32 %v862_v9 }
 0x240   : > { %vm538_vm3 = vmor %vm536_vm2, %vm537_vm1 }
 0x241   : > { %v532_v11 = vmul.f32 %v862_v9, %v531_v10 }
 0x243   : > { %v533_v12 = vmul.f32 0.5, %v532_v11 }
 0x245   : > { %v534_v13 = vsub.f32 1.5, %v533_v12 }
 0x247   : > { %v535_v14 = vmul.f32 %v862_v9, %v534_v13 }
 0x249   : > { %v539_v15 = vsel %vm538_vm3, %v862_v9, %v535_v14 }
 0x24a   : > { %830 = vpush %v539_v15 }
 0x27b   : > { %s831_s17 = spop %830 }
 0x27c   : > { %v541_v16 = vstv %s831_s17 }
 0x27d   : > { %v542_v18 = vmul.f32 %v541_v16, %v511_v58  ;;  %v543_v19 = vmul.f32 %v541_v16, %v512_v59 }
 0x27f   : > { %v546_v21 = vmul.f32 %v545_v17, %v542_v18  ;;  %v547_v22 = vmul.f32 %v545_v17, %v543_v19 }
 0x281   : > { %v550_v23 = vadd.f32 %v549_v20, %v546_v21  ;;  %v551_v24 = vadd.f32 %v549_v20, %v547_v22 }
 0x283   : > { %v552_v25 = vpack.c.bf16 %v551_v24, %v550_v23 }
 0x285   : > { %v554_v26 = vrot.slane %v552_v25, 3 }
 0x287   : > { %v558_v27 = vsel %vm555_vm4, %v552_v25, %v554_v26 }
 0x288   : > { %560 = vst [vmem:[%s242_s21] sm:$0x3] %v558_v27 }
 0x289 PF: > { %s16_s15 = sadd.s32 1, %s907_s15  }
 0x28a   : > { %p13_p7 = scmp.ge.s32.totalorder %s16_s15, 6  }
 0x28c   :  { %15 = sbr.rel (!%p13_p7) target bundleno = 2 (0x2), region = 78 }
 0x291   :  { %580 = vsyncpa [#allocation3], 1 }
 0x292   :  { %582 = vsyncpa [#allocation3 + $0x1], 1 }
 0x293   :  { %583 = vsyncpa [#allocation5], 1 }

// kernel: gf_block_forward.3
= control target key start
LH: loop header
LB: loop body
LE: loop exit
PB: predicated region body
PF: predicated region fallthrough
CT: control target
= control target key end

     0   :  { %s2924_s0 = inlined_call_operand.vmem [shape: bf16[4,2,18,18], index: 0, kind: input, shape index: {}]   ;;  %s2925_s1 = inlined_call_operand.vmem [shape: f32[144], index: 1, kind: input, shape index: {}]   ;;  %s2926_s2 = inlined_call_operand.vmem [shape: f32[4], index: 2, kind: input, shape index: {}]   ;;  %s2927_s3 = inlined_call_operand.vmem [shape: f32[4], index: 3, kind: input, shape index: {}]   ;;  %s2928_s4 = inlined_call_operand.vmem [shape: f32[2,4,16,16], index: 4, kind: input, shape index: {}]   ;;  %s2929_s5 = inlined_call_operand.hbm [shape: f32[2,4,16,16], index: 5, kind: output, shape index: {}]  }
   0x1   :  { %2935 = sst [smem:[#allocation15_spill]] %s2925_s1 }
   0x2   :  { %2936 = sst [smem:[#allocation16_spill]] %s2926_s2 }
   0x3   :  { %10 = vsyncpa [#allocation4], 0 }
   0x4   :  { %11 = vsyncpa [#allocation6], 0 }
   0x5   :  { %12 = vsyncpa [#allocation3], 0 }
   0x6   :  { %14 = vsyncpa [#allocation3 + $0x1], 0  ;;  %s2050_s18 = smov 0   ;;  %s2052_s19 = smov 0  }
   0x7   :  { %s2054_s20 = smov 0   ;;  %s2056_s21 = smov 0  }
   0x8 LB: > { %s2071_s22 = sadd.s32 4294967295, %s2006_s21   ;;  %s1784_s23 = sadd.s32 4294967294, %s2006_s21   ;;  %s2006_s21 = sphi %s2056_s21, %s2949_s21   ;;  %s2002_s20 = sphi %s2054_s20, %s2948_s20   ;;  %s1998_s19 = sphi %s2052_s19, %s2947_s19   ;;  %s1994_s18 = sphi %s2050_s18, %s2946_s18  }
   0x9   : > { %s2075_s24 = sadd.s32 1, %s2006_s21   ;;  %s111_s25 = sadd.s32 1, %s2002_s20 }
   0xa   : > { %s108_s26 = ssub.s32 %s2006_s21, %s2075_s24  ;;  %p118_p0 = scmp.ne.s32.totalorder %s2002_s20, %s1998_s19 }
   0xb   : > { %p109_p1 = scmp.eq.s32.totalorder %s108_s26, 0  ;;  %p119_p2 = scmp.eq.s32.totalorder %s2006_s21, 0 }
   0xc   : > { %p148_p3 = scmp.eq.s32.totalorder %s2071_s22, 3  ;;  %p153_p4 = scmp.ne.s32.totalorder %s1998_s19, %s1994_s18 }
   0xd   : > { %s2087_s27 = scalar_select %p109_p1, %s2002_s20, %s111_s25  }
   0xe   : > { %p2089_p5 = por %p119_p2, %p118_p0  ;;  %p2093_p6 = por %p148_p3, %p118_p0 }
   0xf   : > { %p154_p7 = scmp.eq.s32.totalorder %s1784_s23, 3  ;;  %p1785_p8 = scmp.ge.s32.totalorder %s2006_s21, 1 }
  0x10   : > { %p161_p9 = scmp.lt.s32.totalorder %s2006_s21, 5  ;;  %p1866_p11 = scmp.eq.s32.totalorder %s2071_s22, 0 }
  0x11   : > { %p2099_p10 = por %p154_p7, %p153_p4  ;;  %s2941_s2 = sld [smem:[#allocation16_spill]] }
  0x12   : > { %p2104_p12 = pnand %p1785_p8, %p161_p9  ;;  %s2942_s1 = sld [smem:[#allocation15_spill]] }
  0x13   : > { %s196_s15 = sshll.u32 %s2927_s3, 4  ;;  %s2008_s16 = smov [#allocation5]   ;;  %s197_s15 = int_to_ptr.vmem [resolvable:$true] %s196_s15 }
  0x14   : > { %p1852_p13 = pneg %p2104_p12  ;;  %s2009_s17 = smov [#allocation2]  }
  0x15   : > { %s2010_s23 = smov [#allocation7]   ;;  %p1789_p1 = scmp.ge.s32.totalorder %s2006_s21, 4 }
  0x16   : > { %p1853_p0 = pnand %p1866_p11, %p1852_p13 }
  0x17   : > { %s186_s9 = sshll.u32 %s2941_s2, 4  ;;  %203 = sbr.rel (%p1789_p1) target bundleno = 36 (0x24), region = 32  ;;  %s187_s9 = int_to_ptr.vmem [resolvable:$true] %s186_s9 }
  0x18   : > { %s176_s12 = sshll.u32 %s2942_s1, 4  ;;  %s177_s12 = int_to_ptr.vmem [resolvable:$true] %s176_s12 }
  0x19   : > { %1858 = dma.vmem_to_smem (!%p1853_p0), %s187_s9, 16, %s2008_s16, [#allocation6]  }
  0x1a   : > { %1855 = dma.vmem_to_smem (!%p1853_p0), %s177_s12, 32, %s2009_s17, [#allocation4]  }
  0x1b   : > { %1861 = dma.vmem_to_smem (!%p1853_p0), %s197_s15, 16, %s2010_s23, [#allocation6]  }
  0x1c   : > { %206 = sbr.rel (!%p2089_p5) target bundleno = 36 (0x24), region = 36  ;;  %s208_s25 = sand.u32 (%p2089_p5), 1, %s2002_s20  }
  0x1d   : > { %s1805_s26 = sshll.u32 (%p2089_p5), %s2006_s21, 4  ;;  %s1790_s7 = sshll.u32 (%p2089_p5), %s208_s25, 5 }
  0x1e   : > { %s213_s11 = scalar_lea.vmem (%p2089_p5), %s2928_s4, %s1805_s26  ;;  %s210_s9 = scalar_lea.vmem (%p2089_p5), [#allocation8], %s1790_s7 }
  0x1f   : > { %v248_v0 = vld [vmem:[%s213_s11] sm:$0xff] (%p2089_p5)  ;;  %v250_v1 = vld [vmem:[%s213_s11 + $0x8] sm:$0xff] (%p2089_p5) }
  0x20   : > { %v252_v2 = vld [vmem:[%s213_s11 + $0x40] sm:$0xff] (%p2089_p5)  ;;  %249 = vst [vmem:[%s210_s9] sm:$0xff] (%p2089_p5), %v248_v0  ;;  %v254_v3 = vld [vmem:[%s213_s11 + $0x48] sm:$0xff] (%p2089_p5) }
  0x21   : > { %251 = vst [vmem:[%s210_s9 + $0x8] sm:$0xff] %v250_v1 }
  0x22   : > { %253 = vst [vmem:[%s210_s9 + $0x10] sm:$0xff] %v252_v2 }
  0x23   : > { %255 = vst [vmem:[%s210_s9 + $0x18] sm:$0xff] %v254_v3 }
  0x24 PF: > { %264 = sbr.rel (%p2104_p12) target bundleno = 898 (0x382), region = 74 }
  0x29   : > { %1981 = dma.done.wait (%p1866_p11), [#allocation4], 32  }
  0x2a   : > { %1983 = vsyncadd (%p1866_p11), [#allocation4], 4294967264 }
  0x2b   : > { %1985 = dma.done.wait (%p1866_p11), [#allocation6], 32  }
  0x2c   : > { %1987 = vsyncadd (%p1866_p11), [#allocation6], 4294967264  ;;  %s2930_s28 = sand.u32 1, %s1998_s19  }
  0x2d   : > { %s2142_s12 = sshll.u32 %s2930_s28, 5 }
  0x2e   : > { %s2145_s6 = scalar_lea.vmem [#allocation8], %s2142_s12 }
  0x2f   : > { %288 = sfence }
  0x30   : > { %s2148_s13 = smul.u32 36, %s2071_s22  ;;  %v313_v4 = vld [vmem:[%s2924_s0 + $0xc] sm:$0xff]   ;;  %v1808_v5 = vld [vmem:[%s2924_s0] sm:$0xff]   ;;  %s2931_s16 = smov 127   ;;  %v312_v19 = vld [vmem:[%s2924_s0 + $0x8] sm:$0x1] }
  0x31   : > { %s403_s14 = smul.u32 12, %s2071_s22  ;;  %v2163_v6 = vunpack.c.l.bf16 %v313_v4  ;;  %v2165_v7 = vunpack.c.l.bf16 %v1808_v5  ;;  %v2168_v9 = vunpack.c.h.bf16 %v1808_v5  ;;  %s2933_s17 = smov 126   ;;  %v2177_v14 = vunpack.c.h.bf16 %v313_v4  ;;  %v315_v30 = vld [vmem:[%s2924_s0 + $0x14] sm:$0x1] }
  0x32   : > { %s349_s15 = sadd.s32 1, %s2148_s13  ;;  %s376_s7 = sadd.s32 2, %s2148_s13  ;;  %v2192_v22 = vunpack.c.l.bf16 %v312_v19  ;;  %vm422_vm0 = vcmask 1046528   ;;  %v2209_v34 = vunpack.c.l.bf16 %v315_v30  ;;  %vm539_vm1 = vcmask 1045504  }
  0x33   : > { %s350_s23 = sld [smem:[#allocation2 + %s349_s15]]  ;;  %s404_s10 = sadd.s32 1, %s403_s14  ;;  %vm1556_vm2 = vcmask 130048  }
  0x34   : > { %s377_s8 = sld [smem:[#allocation2 + %s376_s7]]  ;;  %s2161_s11 = smul.u32 3, %s404_s10 }
  0x35   : > { %s2237_s7 = sshll.u32 %s2071_s22, 2 }
  0x36   : > { %s441_s9 = sadd.s32 1, %s2161_s11 }
  0x37   : > { %s442_s15 = sld [smem:[#allocation2 + %s441_s9]] }
  0x39   : > { %v351_v8 = vstv %s350_s23  ;;  %s482_s23 = sadd.s32 2, %s2161_s11 }
  0x3a   : > { %v354_v10 = vmul.f32 %v351_v8, %v2163_v6  ;;  %v352_v11 = vmul.f32 %v2165_v7, %v351_v8  ;;  %v378_v12 = vstv %s377_s8  ;;  %v353_v16 = vmul.f32 %v2168_v9, %v351_v8  ;;  %s483_s25 = sld [smem:[#allocation2 + %s482_s23]]  ;;  %s523_s8 = sadd.s32 2, %s403_s14 }
  0x3b   : > { %v380_v13 = vmul.f32 %v2168_v9, %v378_v12  ;;  %v379_v15 = vmul.f32 %v2165_v7, %v378_v12  ;;  %v355_v17 = vmul.f32 %v351_v8, %v2177_v14  ;;  %s2194_s10 = smul.u32 3, %s523_s8  ;;  %v382_v24 = vmul.f32 %v378_v12, %v2177_v14  ;;  %s641_s8 = sadd.s32 1, %s2237_s7 }
  0x3c   : > { %364 = vrot.lane.b32.xlu1 %v354_v10, %s2931_s16  ;;  %360 = vrot.lane.b32.xlu0 %v352_v11, %s2931_s16  ;;  %v381_v25 = vmul.f32 %v378_v12, %v2163_v6  ;;  %s2249_s14 = smul.u32 9, %s641_s8 }
  0x3d   : > { %389 = vrot.lane.b32.xlu2 %v380_v13, %s2933_s17  ;;  %v443_v18 = vstv %s442_s15  ;;  %s558_s15 = sadd.s32 1, %s2194_s10 }
  0x3e   : > { %v444_v20 = vmul.f32 %v2165_v7, %v443_v18  ;;  %v445_v21 = vmul.f32 %v2168_v9, %v443_v18  ;;  %v447_v27 = vmul.f32 %v443_v18, %v2163_v6  ;;  %v448_v28 = vmul.f32 %v443_v18, %v2177_v14  ;;  %s559_s23 = sld [smem:[#allocation2 + %s558_s15]]  ;;  %s657_s9 = sadd.s32 1, %s2249_s14 }
  0x3f   : > { %v446_v29 = vmul.f32 %v443_v18, %v2192_v22  ;;  %v449_v40 = vmul.f32 %v443_v18, %v2209_v34  ;;  %s2259_s15 = smul.u32 3, %s641_s8  ;;  %s335_s8 = sld [smem:[#allocation2 + %s2148_s13]] }
  0x40   : > { %v456_v23 = vrot.slane %v444_v20, 1  ;;  %v457_v26 = vrot.slane %v445_v21, 1  ;;  %v484_v31 = vstv %s483_s25  ;;  %v461_v36 = vrot.slane %v447_v27, 1  ;;  %s599_s25 = sadd.s32 2, %s2194_s10  ;;  %s946_s13 = sadd.s32 2, %s2237_s7 }
  0x41   : > { %v485_v33 = vmul.f32 %v2165_v7, %v484_v31  ;;  %v486_v35 = vmul.f32 %v2168_v9, %v484_v31  ;;  %v462_v37 = vrot.slane %v448_v28, 1  ;;  %v459_v38 = vrot.slane %v446_v29, 1  ;;  %s600_s26 = sld [smem:[#allocation2 + %s599_s25]]  ;;  %s712_s25 = sadd.s32 1, %s2259_s15 }
  0x42   : > { %v458_v32 = vsel %vm422_vm0, %v456_v23, %v457_v26  ;;  %v487_v44 = vmul.f32 %v484_v31, %v2192_v22  ;;  %v488_v46 = vmul.f32 %v484_v31, %v2163_v6  ;;  %v464_v47 = vrot.slane %v449_v40, 1  ;;  %s2270_s28 = smul.u32 3, %s712_s25 }
  0x43   : > { %v497_v39 = vrot.slane %v485_v33, 1  ;;  %v498_v41 = vrot.slane %v486_v35, 1  ;;  %v463_v42 = vsel %vm422_vm0, %v461_v36, %v462_v37  ;;  %v460_v43 = vsel %vm422_vm0, %v457_v26, %v459_v38  ;;  %v319_v35 = vld [vmem:[%s2924_s0 + $0x24] sm:$0xff]  }
  0x44   : > { %387 = vrot.lane.b32.xlu1 %v379_v15, %s2933_s17  ;;  %362 = vrot.lane.b32.xlu0 %v353_v16, %s2931_s16  ;;  %v489_v48 = vmul.f32 %v484_v31, %v2177_v14  ;;  %v500_v49 = vrot.slane %v487_v44, 1  ;;  %v560_v50 = vstv %s559_s23  ;;  %v502_v51 = vrot.slane %v488_v46, 1  ;;  %s658_s23 = sld [smem:[#allocation2 + %s657_s9]]  ;;  %s2943_s9 = smov 127  }
  0x45   : > { %366 = vrot.lane.b32.xlu2 %v355_v17, %s2931_s16  ;;  %v499_v45 = vsel %vm422_vm0, %v497_v39, %v498_v41  ;;  %v465_v52 = vsel %vm422_vm0, %v462_v37, %v464_v47  ;;  %v561_v55 = vmul.f32 %v2165_v7, %v560_v50  ;;  %v562_v56 = vmul.f32 %v2168_v9, %v560_v50  ;;  %s789_s2 = sadd.s32 2, %s2270_s28 }
  0x46   : > { %v503_v53 = vrot.slane %v489_v48, 1  ;;  %v501_v54 = vsel %vm422_vm0, %v498_v41, %v500_v49  ;;  %v490_v57 = vmul.f32 %v484_v31, %v2209_v34  ;;  %v563_v59 = vmul.f32 %v560_v50, %v2192_v22  ;;  %v318_v49 = vld [vmem:[%s2924_s0 + $0x20] sm:$0x1] }
  0x47   : > { %v573_v60 = vrot.slane %v561_v55, 2  ;;  %v574_v61 = vrot.slane %v562_v56, 2  ;;  %v601_v63 = vstv %s600_s26  ;;  %v564_v5 = vmul.f32 %v560_v50, %v2163_v6  ;;  %s748_s26 = sadd.s32 1, %s2270_s28 }
  0x48   : > { %v504_v58 = vsel %vm422_vm0, %v502_v51, %v503_v53  ;;  %v505_v62 = vrot.slane %v490_v57, 1  ;;  %v576_v0 = vrot.slane %v563_v59, 2  ;;  %v602_v1 = vmul.f32 %v2165_v7, %v601_v63  ;;  %s749_s1 = sld [smem:[#allocation2 + %s748_s26]] }
  0x49   : > { %v603_v2 = vmul.f32 %v2168_v9, %v601_v63  ;;  %v575_v3 = vsel %vm539_vm1, %v573_v60, %v574_v61  ;;  %v565_v8 = vmul.f32 %v560_v50, %v2177_v14  ;;  %v604_v11 = vmul.f32 %v601_v63, %v2192_v22  ;;  %v321_v60 = vld [vmem:[%s2924_s0 + $0x2c] sm:$0x1] }
  0x4a   : > { %v506_v4 = vsel %vm422_vm0, %v503_v53, %v505_v62  ;;  %v577_v10 = vsel %vm539_vm1, %v574_v61, %v576_v0  ;;  %v614_v12 = vrot.slane %v602_v1, 2  ;;  %v578_v15 = vrot.slane %v564_v5, 2 }
  0x4b   : > { %v615_v13 = vrot.slane %v603_v2, 2  ;;  %v579_v16 = vrot.slane %v565_v8, 2  ;;  %v617_v17 = vrot.slane %v604_v11, 2  ;;  %v605_v20 = vmul.f32 %v601_v63, %v2163_v6 }
  0x4c   : > { %393 = vrot.lane.b32.xlu1 %v382_v24, %s2933_s17  ;;  %391 = vrot.lane.b32.xlu0 %v381_v25, %s2933_s17  ;;  %v606_v21 = vmul.f32 %v601_v63, %v2177_v14  ;;  %v566_v23 = vmul.f32 %v560_v50, %v2209_v34  ;;  %v607_v25 = vmul.f32 %v601_v63, %v2209_v34  ;;  %v659_v38 = vstv %s658_s23 }
  0x4d   : > { %466 = vrot.lane.b32.xlu2 %v458_v32, %s2931_s16  ;;  %v616_v18 = vsel %vm539_vm1, %v614_v12, %v615_v13  ;;  %v580_v19 = vsel %vm539_vm1, %v578_v15, %v579_v16  ;;  %v618_v24 = vsel %vm539_vm1, %v615_v13, %v617_v17  ;;  %v619_v26 = vrot.slane %v605_v20, 2  ;;  %v1823_v32 = vld [vmem:[%s2924_s0 + $0x18] sm:$0xff]  }
  0x4e   : > { %v620_v27 = vrot.slane %v606_v21, 2  ;;  %v581_v28 = vrot.slane %v566_v23, 2  ;;  %v622_v29 = vrot.slane %v607_v25, 2  ;;  %v2279_v36 = vunpack.c.h.bf16 %v1823_v32 }
  0x4f   : > { %v2281_v37 = vunpack.c.l.bf16 %v1823_v32  ;;  %v2284_v39 = vunpack.c.l.bf16 %v319_v35  ;;  %v2294_v44 = vunpack.c.h.bf16 %v319_v35  ;;  %v750_v48 = vstv %s749_s1  ;;  %s2372_s1 = smul.u32 9, %s946_s13 }
  0x50   : > { %v621_v30 = vsel %vm539_vm1, %v619_v26, %v620_v27  ;;  %v582_v31 = vsel %vm539_vm1, %v579_v16, %v581_v28  ;;  %v623_v33 = vsel %vm539_vm1, %v620_v27, %v622_v29  ;;  %v661_v40 = vmul.f32 %v2279_v36, %v659_v38 }
  0x51   : > { %v660_v41 = vmul.f32 %v2281_v37, %v659_v38  ;;  %v663_v47 = vmul.f32 %v659_v38, %v2294_v44  ;;  %v751_v50 = vmul.f32 %v2281_v37, %v750_v48  ;;  %v752_v51 = vmul.f32 %v2279_v36, %v750_v48 }
  0x52   : > { %v754_v57 = vmul.f32 %v750_v48, %v2284_v39  ;;  %v2325_v0 = vunpack.c.l.bf16 %v321_v60  ;;  %v2350_v32 = vstv %s335_s8 }
  0x53   : > { %v763_v53 = vrot.slane %v751_v50, 1  ;;  %v764_v56 = vrot.slane %v752_v51, 1 }
  0x54   : > { %470 = vrot.lane.b32.xlu1 %v463_v42, %s2931_s16  ;;  %468 = vrot.lane.b32.xlu0 %v460_v43, %s2931_s16  ;;  %v662_v42 = vmul.f32 %v659_v38, %v2284_v39  ;;  %v768_v2 = vrot.slane %v754_v57, 1  ;;  %v756_v8 = vmul.f32 %v750_v48, %v2325_v0 }
  0x55   : > { %507 = vrot.lane.b32.xlu2 %v499_v45, %s2933_s17  ;;  %v765_v62 = vsel %vm422_vm0, %v763_v53, %v764_v56 }
  0x56   : > { %v771_v17 = vrot.slane %v756_v8, 1  ;;  %v341_v8 = vmul.f32 %v2165_v7, %v2350_v32 }
  0x5c   : > { %472 = vrot.lane.b32.xlu1 %v465_v52, %s2931_s16  ;;  %509 = vrot.lane.b32.xlu0 %v501_v54, %s2933_s17  ;;  %v2308_v52 = vunpack.c.l.bf16 %v318_v49 }
  0x5d   : > { %511 = vrot.lane.b32.xlu2 %v504_v58, %s2933_s17  ;;  %v755_v58 = vmul.f32 %v750_v48, %v2294_v44 }
  0x5e   : > { %v753_v59 = vmul.f32 %v750_v48, %v2308_v52 }
  0x64   : > { %583 = vrot.lane.b32.xlu1 %v575_v3, %s2931_s16  ;;  %513 = vrot.lane.b32.xlu0 %v506_v4, %s2933_s17  ;;  %v769_v3 = vrot.slane %v755_v58, 1  ;;  %v766_v4 = vrot.slane %v753_v59, 1 }
  0x65   : > { %585 = vrot.lane.b32.xlu2 %v577_v10, %s2931_s16 }
  0x66   : > { %v770_v11 = vsel %vm422_vm0, %v768_v2, %v769_v3  ;;  %v767_v12 = vsel %vm422_vm0, %v764_v56, %v766_v4 }
  0x6c   : > { %624 = vrot.lane.b32.xlu1 %v616_v18, %s2933_s17  ;;  %587 = vrot.lane.b32.xlu0 %v580_v19, %s2931_s16  ;;  %s684_s16 = sadd.s32 2, %s2249_s14 }
  0x6d   : > { %626 = vrot.lane.b32.xlu2 %v618_v24, %s2933_s17  ;;  %s685_s25 = sld [smem:[#allocation2 + %s684_s16]]  ;;  %v772_v24 = vsel %vm422_vm0, %v769_v3, %v771_v17 }
  0x6e   : > { %s790_s16 = sld [smem:[#allocation2 + %s789_s2]] }
  0x73   : > { %v686_v43 = vstv %s685_s25  ;;  %s830_s25 = sadd.s32 2, %s2259_s15  ;;  %s406_s15 = sld [smem:[#allocation2 + %s2161_s11]] }
  0x74   : > { %628 = vrot.lane.b32.xlu1 %v621_v30, %s2933_s17  ;;  %589 = vrot.lane.b32.xlu0 %v582_v31, %s2943_s9  ;;  %v688_v45 = vmul.f32 %v2279_v36, %v686_v43  ;;  %v687_v46 = vmul.f32 %v2281_v37, %v686_v43  ;;  %s2310_s26 = smul.u32 3, %s830_s25  ;;  %v690_v54 = vmul.f32 %v686_v43, %v2294_v44  ;;  %v791_v61 = vstv %s790_s16  ;;  %s962_s11 = sadd.s32 1, %s2372_s1 }
  0x75   : > { %630 = vrot.lane.b32.xlu2 %v623_v33, %s2933_s17  ;;  %v689_v55 = vmul.f32 %v686_v43, %v2284_v39  ;;  %v792_v63 = vmul.f32 %v2281_v37, %v791_v61  ;;  %v793_v1 = vmul.f32 %v2279_v36, %v791_v61  ;;  %v794_v13 = vmul.f32 %v791_v61, %v2308_v52 }
  0x76   : > { %s864_s2 = sadd.s32 1, %s2310_s26  ;;  %v795_v16 = vmul.f32 %v791_v61, %v2284_v39  ;;  %s905_s23 = sadd.s32 2, %s2310_s26  ;;  %v796_v18 = vmul.f32 %v791_v61, %v2294_v44  ;;  %v797_v29 = vmul.f32 %v791_v61, %v2325_v0  ;;  %v344_v33 = vmul.f32 %v2350_v32, %v2177_v14 }
  0x77   : > { %v804_v5 = vrot.slane %v792_v63, 1  ;;  %s865_s16 = sld [smem:[#allocation2 + %s864_s2]]  ;;  %v805_v10 = vrot.slane %v793_v1, 1  ;;  %v807_v19 = vrot.slane %v794_v13, 1 }
  0x78   : > { %s906_s25 = sld [smem:[#allocation2 + %s905_s23]]  ;;  %v809_v21 = vrot.slane %v795_v16, 1  ;;  %v810_v25 = vrot.slane %v796_v18, 1 }
  0x79   : > { %v806_v15 = vsel %vm422_vm0, %v804_v5, %v805_v10  ;;  %v808_v26 = vsel %vm422_vm0, %v805_v10, %v807_v19  ;;  %s2378_s2 = sld [smem:[#allocation2 + %s2194_s10]]  ;;  %v343_v5 = vmul.f32 %v2350_v32, %v2163_v6  ;;  %v409_v10 = vstv %s406_s15  ;;  %s2391_s10 = smul.u32 3, %s946_s13 }
  0x7a   : > { %v811_v30 = vsel %vm422_vm0, %v809_v21, %v810_v25  ;;  %v410_v17 = vmul.f32 %v2165_v7, %v409_v10  ;;  %v411_v18 = vmul.f32 %v2168_v9, %v409_v10  ;;  %s989_s15 = sadd.s32 2, %s2372_s1 }
  0x7b   : > { %s1017_s23 = sadd.s32 1, %s2391_s10 }
  0x7c   : > { %670 = vrot.lane.b32.xlu1 %v661_v40, %s2943_s9  ;;  %668 = vrot.lane.b32.xlu0 %v660_v41, %s2943_s9  ;;  %v812_v40 = vrot.slane %v797_v29, 1  ;;  %s2412_s13 = smul.u32 3, %s1017_s23 }
  0x7d   : > { %672 = vrot.lane.b32.xlu2 %v662_v42, %s2943_s9  ;;  %v866_v20 = vstv %s865_s16  ;;  %s2395_s16 = sld [smem:[#allocation2 + %s962_s11]] }
  0x7e   : > { %v867_v27 = vmul.f32 %v2281_v37, %v866_v20  ;;  %v868_v28 = vmul.f32 %v2279_v36, %v866_v20  ;;  %v869_v31 = vmul.f32 %v866_v20, %v2308_v52  ;;  %v907_v41 = vstv %s906_s25  ;;  %s1094_s8 = sadd.s32 2, %s2412_s13 }
  0x7f   : > { %v813_v49 = vsel %vm422_vm0, %v810_v25, %v812_v40  ;;  %v870_v50 = vmul.f32 %v866_v20, %v2284_v39  ;;  %v871_v51 = vmul.f32 %v866_v20, %v2294_v44  ;;  %v911_v63 = vmul.f32 %v907_v41, %v2284_v39  ;;  %v1824_v25 = vld [vmem:[%s2924_s0 + $0x30] sm:$0xff]   ;;  %s1095_s25 = sld [smem:[#allocation2 + %s1094_s8]] }
  0x80   : > { %v879_v35 = vrot.slane %v867_v27, 2  ;;  %v880_v38 = vrot.slane %v868_v28, 2  ;;  %v882_v42 = vrot.slane %v869_v31, 2  ;;  %v912_v1 = vmul.f32 %v907_v41, %v2294_v44 }
  0x81   : > { %v884_v57 = vrot.slane %v870_v50, 2  ;;  %v885_v58 = vrot.slane %v871_v51, 2  ;;  %v872_v2 = vmul.f32 %v866_v20, %v2325_v0  ;;  %v913_v4 = vmul.f32 %v907_v41, %v2325_v0 }
  0x82   : > { %v881_v48 = vsel %vm539_vm1, %v879_v35, %v880_v38  ;;  %v883_v53 = vsel %vm539_vm1, %v880_v38, %v882_v42  ;;  %v2410_v29 = vstv %s2378_s2  ;;  %v424_v31 = vrot.slane %v411_v18, 1  ;;  %v325_v35 = vld [vmem:[%s2924_s0 + $0x3c] sm:$0xff]   ;;  %s2944_s2 = smov 126  }
  0x83   : > { %v887_v13 = vrot.slane %v872_v2, 2  ;;  %v928_v19 = vrot.slane %v913_v4, 2  ;;  %v342_v38 = vmul.f32 %v2168_v9, %v2350_v32  ;;  %v2421_v40 = vunpack.c.h.bf16 %v1824_v25 }
  0x84   : > { %697 = vrot.lane.b32.xlu1 %v688_v45, %s2933_s17  ;;  %695 = vrot.lane.b32.xlu0 %v687_v46, %s2933_s17  ;;  %v908_v46 = vmul.f32 %v2281_v37, %v907_v41  ;;  %v964_v42 = vstv %s2395_s16  ;;  %v2435_v32 = vunpack.c.l.bf16 %v325_v35  ;;  %v413_v51 = vmul.f32 %v409_v10, %v2163_v6  ;;  %s1053_s16 = sadd.s32 1, %s2412_s13 }
  0x85   : > { %674 = vrot.lane.b32.xlu2 %v663_v47, %s2943_s9  ;;  %v909_v47 = vmul.f32 %v2279_v36, %v907_v41  ;;  %v888_v28 = vsel %vm539_vm1, %v885_v58, %v887_v13  ;;  %s1054_s23 = sld [smem:[#allocation2 + %s1053_s16]] }
  0x86   : > { %v428_v2 = vrot.slane %v413_v51, 1 }
  0x87   : > { %v921_v56 = vrot.slane %v909_v47, 2  ;;  %v527_v47 = vmul.f32 %v2165_v7, %v2410_v29  ;;  %v966_v7 = vmul.f32 %v2421_v40, %v964_v42 }
  0x8c   : > { %701 = vrot.lane.b32.xlu1 %v690_v54, %s2933_s17  ;;  %699 = vrot.lane.b32.xlu0 %v689_v55, %s2933_s17  ;;  %v910_v54 = vmul.f32 %v907_v41, %v2308_v52  ;;  %v920_v55 = vrot.slane %v908_v46, 2  ;;  %v2423_v41 = vunpack.c.l.bf16 %v1824_v25  ;;  %v2430_v46 = vmul.f32 %v2168_v9, %v2410_v29 }
  0x8d   : > { %773 = vrot.lane.b32.xlu2 %v765_v62, %s2943_s9  ;;  %v886_v62 = vsel %vm539_vm1, %v884_v57, %v885_v58 }
  0x8e   : > { %v923_v59 = vrot.slane %v910_v54, 2  ;;  %v922_v61 = vsel %vm539_vm1, %v920_v55, %v921_v56  ;;  %v415_v54 = vmul.f32 %v409_v10, %v2209_v34  ;;  %v965_v57 = vmul.f32 %v2423_v41, %v964_v42 }
  0x90   : > { %v924_v3 = vsel %vm539_vm1, %v921_v56, %v923_v59  ;;  %v541_v59 = vrot.slane %v2430_v46, 2  ;;  %v431_v4 = vrot.slane %v415_v54, 1 }
  0x94   : > { %777 = vrot.lane.b32.xlu1 %v770_v11, %s2943_s9  ;;  %775 = vrot.lane.b32.xlu0 %v767_v12, %s2943_s9  ;;  %v925_v11 = vrot.slane %v911_v63, 2  ;;  %v926_v12 = vrot.slane %v912_v1, 2  ;;  %v967_v1 = vmul.f32 %v964_v42, %v2435_v32 }
  0x95   : > { %814 = vrot.lane.b32.xlu2 %v806_v15, %s2933_s17 }
  0x96   : > { %v927_v27 = vsel %vm539_vm1, %v925_v11, %v926_v12 }
  0x97   : > { %v2341_v23 = vpop.permute.xlu2 %389 }
  0x9c   : > { %779 = vrot.lane.b32.xlu1 %v772_v24, %s2943_s9  ;;  %816 = vrot.lane.b32.xlu0 %v808_v26, %s2933_s17  ;;  %v412_v26 = vmul.f32 %v409_v10, %v2192_v22 }
  0x9d   : > { %818 = vrot.lane.b32.xlu2 %v811_v30, %s2933_s17  ;;  %v423_v30 = vrot.slane %v410_v17, 1 }
  0x9f   : > { %v367_v43 = vpop.permute.xlu2 %366 }
  0xa0   : > { %v2357_v45 = vadd.f32 %v367_v43, %v344_v33  ;;  %v929_v33 = vsel %vm539_vm1, %v926_v12, %v928_v19  ;;  %v426_v43 = vrot.slane %v412_v26, 1  ;;  %v2464_v19 = vunpack.c.h.bf16 %v325_v35 }
  0xa1   : > { %v530_v26 = vmul.f32 %v2410_v29, %v2163_v6 }
  0xa2   : > { %v427_v58 = vsel %vm422_vm0, %v424_v31, %v426_v43 }
  0xa4   : > { %889 = vrot.lane.b32.xlu1 %v881_v48, %s2943_s9  ;;  %820 = vrot.lane.b32.xlu0 %v813_v49, %s2933_s17  ;;  %v425_v48 = vsel %vm422_vm0, %v423_v30, %v424_v31  ;;  %v1055_v30 = vstv %s1054_s23  ;;  %v324_v31 = vld [vmem:[%s2924_s0 + $0x38] sm:$0x1] }
  0xa5   : > { %891 = vrot.lane.b32.xlu2 %v883_v53, %s2943_s9  ;;  %v414_v53 = vmul.f32 %v409_v10, %v2177_v14  ;;  %v1057_v6 = vmul.f32 %v2421_v40, %v1055_v30 }
  0xa7   : > { %v2374_v60 = vpop.permute.xlu2 %466 }
  0xac   : > { %930 = vrot.lane.b32.xlu1 %v922_v61, %s2933_s17  ;;  %893 = vrot.lane.b32.xlu0 %v886_v62, %s2943_s9  ;;  %v540_v61 = vrot.slane %v527_v47, 2  ;;  %v529_v47 = vmul.f32 %v2410_v29, %v2192_v22 }
  0xad   : > { %932 = vrot.lane.b32.xlu2 %v924_v3, %s2933_s17  ;;  %s990_s17 = sld [smem:[#allocation2 + %s989_s15]]  ;;  %v429_v3 = vrot.slane %v414_v53, 1 }
  0xae   : > { %v365_v15 = vpop.permute.xlu1 %364  ;;  %v361_v16 = vpop.permute.xlu0 %360  ;;  %v542_v10 = vsel %vm539_vm1, %v540_v61, %v541_v59  ;;  %v1096_v61 = vstv %s1095_s25 }
  0xaf   : > { %v2400_v20 = vadd.f32 %v365_v15, %v343_v5  ;;  %v372_v21 = vadd.f32 %v361_v16, %v341_v8  ;;  %v508_v24 = vpop.permute.xlu2 %507  ;;  %v430_v15 = vsel %vm422_vm0, %v428_v2, %v429_v3  ;;  %v432_v16 = vsel %vm422_vm0, %v429_v3, %v431_v4 }
  0xb0   : > { %v1097_v2 = vmul.f32 %v2423_v41, %v1096_v61 }
  0xb4   : > { %934 = vrot.lane.b32.xlu1 %v927_v27, %s2944_s2  ;;  %895 = vrot.lane.b32.xlu0 %v888_v28, %s2943_s9  ;;  %v2474_v27 = vmul.f32 %v2410_v29, %v2177_v14  ;;  %v545_v14 = vrot.slane %v530_v26, 2 }
  0xb5   : > { %936 = vrot.lane.b32.xlu2 %v929_v33, %s2944_s2  ;;  %v1056_v33 = vmul.f32 %v2423_v41, %v1055_v30 }
  0xb6   : > { %v388_v49 = vpop.permute.xlu1 %387  ;;  %v363_v50 = vpop.permute.xlu0 %362  ;;  %v546_v35 = vrot.slane %v2474_v27, 2 }
  0xb7   : > { %v399_v9 = vadd.f32 %v388_v49, %v372_v21  ;;  %v373_v55 = vadd.f32 %v363_v50, %v342_v38  ;;  %v2443_v56 = vpop.permute.xlu2 %511  ;;  %v2487_v38 = vunpack.c.l.bf16 %v324_v31 }
  0xb8   : > { %v547_v22 = vsel %vm539_vm1, %v545_v14, %v546_v35 }
  0xb9   : > { %v437_v62 = vadd.f32 %v425_v48, %v399_v9  ;;  %v400_v63 = vadd.f32 %v2341_v23, %v373_v55  ;;  %v991_v23 = vstv %s990_s17  ;;  %s1135_s17 = sadd.s32 2, %s2391_s10  ;;  %v1068_v48 = vrot.slane %v1056_v33, 1  ;;  %s2496_s10 = sld [smem:[#allocation2 + %s2249_s14]] }
  0xba   : > { %v992_v25 = vmul.f32 %v2423_v41, %v991_v23  ;;  %s2489_s16 = smul.u32 3, %s1135_s17  ;;  %v995_v51 = vmul.f32 %v991_v23, %v2464_v19  ;;  %v994_v53 = vmul.f32 %v991_v23, %v2435_v32  ;;  %v1059_v9 = vmul.f32 %v1055_v30, %v2435_v32  ;;  %s714_s17 = sld [smem:[#allocation2 + %s2270_s28]] }
  0xbb   : > { %v478_v5 = vadd.f32 %v2374_v60, %v437_v62  ;;  %v438_v8 = vadd.f32 %v427_v58, %v400_v63  ;;  %v2500_v55 = vmul.f32 %v1055_v30, %v2464_v19  ;;  %v1058_v58 = vmul.f32 %v1055_v30, %v2487_v38 }
  0xbc   : > { %975 = vrot.lane.b32.xlu1 %v966_v7, %s2943_s9  ;;  %973 = vrot.lane.b32.xlu0 %v965_v57, %s2943_s9  ;;  %v1069_v7 = vrot.slane %v1057_v6, 1  ;;  %v543_v62 = vrot.slane %v529_v47, 2  ;;  %s1169_s8 = sadd.s32 1, %s2489_s16  ;;  %s1210_s15 = sadd.s32 2, %s2489_s16  ;;  %v1101_v6 = vmul.f32 %v1096_v61, %v2464_v19 }
  0xbd   : > { %v519_v11 = vadd.f32 %v508_v24, %v478_v5  ;;  %977 = vrot.lane.b32.xlu2 %v967_v1, %s2943_s9  ;;  %v993_v24 = vmul.f32 %v2421_v40, %v991_v23  ;;  %v327_v1 = vld [vmem:[%s2924_s0 + $0x44] sm:$0x1]  ;;  %v1074_v4 = vrot.slane %v2500_v55, 1  ;;  %v1098_v5 = vmul.f32 %v2421_v40, %v1096_v61  ;;  %s1170_s25 = sld [smem:[#allocation2 + %s1169_s8]] }
  0xbe   : > { %v394_v12 = vpop.permute.xlu1 %393  ;;  %v392_v13 = vpop.permute.xlu0 %391  ;;  %v1070_v63 = vsel %vm422_vm0, %v1068_v48, %v1069_v7  ;;  %v544_v23 = vsel %vm539_vm1, %v541_v59, %v543_v62  ;;  %s1211_s11 = sld [smem:[#allocation2 + %s1210_s15]] }
  0xbf   : > { %v402_v60 = vadd.f32 %v394_v12, %v2357_v45  ;;  %v401_v17 = vadd.f32 %v392_v13, %v2400_v20  ;;  %v2462_v18 = vpop.permute.xlu2 %585  ;;  %v2466_v21 = vadd.f32 %v542_v10, %v519_v11  ;;  %v968_v20 = vmul.f32 %v964_v42, %v2464_v19 }
  0xc0   : > { %v2520_v10 = vunpack.c.l.bf16 %v327_v1  ;;  %v1109_v13 = vrot.slane %v1097_v2, 1  ;;  %v2531_v26 = vstv %s2496_s10  ;;  %s1251_s10 = sadd.s32 3, %s2237_s7  ;;  %s2599_s7 = sld [smem:[#allocation2 + %s2310_s26]] }
  0xc1   : > { %v439_v45 = vadd.f32 %v430_v15, %v401_v17  ;;  %v440_v28 = vadd.f32 %v432_v16, %v402_v60  ;;  %v532_v15 = vmul.f32 %v2410_v29, %v2209_v34  ;;  %v1100_v34 = vmul.f32 %v1096_v61, %v2435_v32  ;;  %s2589_s28 = smul.u32 9, %s1251_s10 }
  0xc2   : > { %v1061_v59 = vmul.f32 %v1055_v30, %v2520_v10  ;;  %s2608_s23 = smul.u32 3, %s1251_s10  ;;  %s948_s10 = sld [smem:[#allocation2 + %s2372_s1]] }
  0xc3   : > { %v548_v33 = vrot.slane %v532_v15, 2  ;;  %s1267_s14 = sadd.s32 1, %s2589_s28  ;;  %s2770_s1 = sld [smem:[#allocation2 + %s2412_s13]] }
  0xc4   : > { %1002 = vrot.lane.b32.xlu1 %v993_v24, %s2944_s2  ;;  %1000 = vrot.lane.b32.xlu0 %v992_v25, %s2944_s2  ;;  %v1110_v25 = vrot.slane %v1098_v5, 1  ;;  %v1076_v14 = vrot.slane %v1061_v59, 1  ;;  %v1212_v2 = vstv %s1211_s11  ;;  %s1268_s26 = sld [smem:[#allocation2 + %s1267_s14]]  ;;  %s1322_s8 = sadd.s32 1, %s2608_s23 }
  0xc5   : > { %979 = vrot.lane.b32.xlu2 %v968_v20, %s2943_s9  ;;  %v1099_v20 = vmul.f32 %v1096_v61, %v2487_v38  ;;  %v1214_v15 = vmul.f32 %v2421_v40, %v1212_v2  ;;  %s2631_s11 = smul.u32 3, %s1322_s8  ;;  %s1440_s14 = sadd.s32 2, %s2608_s23 }
  0xc6   : > { %v471_v42 = vpop.permute.xlu1 %470  ;;  %v469_v43 = vpop.permute.xlu0 %468  ;;  %v1111_v31 = vsel %vm422_vm0, %v1109_v13, %v1110_v25  ;;  %v1213_v13 = vmul.f32 %v2423_v41, %v1212_v2  ;;  %s2704_s23 = smul.u32 3, %s1440_s14  ;;  %s2790_s13 = sld [smem:[#allocation2 + %s2489_s16]] }
  0xc7   : > { %v480_v49 = vadd.f32 %v471_v42, %v439_v45  ;;  %v479_v50 = vadd.f32 %v469_v43, %v438_v8  ;;  %v627_v54 = vpop.permute.xlu2 %626  ;;  %v1071_v8 = vrot.slane %v1058_v58, 1  ;;  %v1112_v42 = vrot.slane %v1099_v20, 1  ;;  %s1358_s8 = sadd.s32 1, %s2631_s11 }
  0xc8   : > { %v2546_v43 = vstv %s1170_s25  ;;  %v1226_v59 = vrot.slane %v1214_v15, 2  ;;  %v651_v20 = vmul.f32 %v2531_v26, %v2284_v39  ;;  %v331_v15 = vld [vmem:[%s2924_s0 + $0x54] sm:$0xff]   ;;  %s1399_s25 = sadd.s32 2, %s2631_s11  ;;  %s1442_s16 = sld [smem:[#allocation2 + %s2704_s23]] }
  0xc9   : > { %v521_v57 = vadd.f32 %v2443_v56, %v480_v49  ;;  %v1073_v56 = vrot.slane %v1059_v9, 1  ;;  %v1072_v46 = vsel %vm422_vm0, %v1069_v7, %v1071_v8  ;;  %v1114_v49 = vrot.slane %v1100_v34, 1  ;;  %s1400_s15 = sld [smem:[#allocation2 + %s1399_s25]] }
  0xca   : > { %v1172_v9 = vmul.f32 %v2423_v41, %v2546_v43  ;;  %v1173_v55 = vmul.f32 %v2421_v40, %v2546_v43  ;;  %v1115_v7 = vrot.slane %v1101_v6, 1  ;;  %v1113_v27 = vsel %vm422_vm0, %v1110_v25, %v1112_v42 }
  0xcb   : > { %v2513_v3 = vadd.f32 %v547_v22, %v521_v57  ;;  %v1075_v24 = vsel %vm422_vm0, %v1073_v56, %v1074_v4  ;;  %v1077_v22 = vsel %vm422_vm0, %v1074_v4, %v1076_v14  ;;  %v1174_v58 = vmul.f32 %v2546_v43, %v2487_v38 }
  0xcc   : > { %1006 = vrot.lane.b32.xlu1 %v995_v51, %s2944_s2  ;;  %1004 = vrot.lane.b32.xlu0 %v994_v53, %s2944_s2  ;;  %v1184_v62 = vrot.slane %v1172_v9, 2  ;;  %v652_v14 = vmul.f32 %v2531_v26, %v2294_v44  ;;  %v1177_v9 = vmul.f32 %v2546_v43, %v2520_v10 }
  0xcd   : > { %1078 = vrot.lane.b32.xlu2 %v1070_v63, %s2943_s9  ;;  %v1185_v63 = vrot.slane %v1173_v55, 2  ;;  %v1187_v5 = vrot.slane %v1174_v58, 2  ;;  %v717_v55 = vstv %s714_s17  ;;  %s1294_s17 = sadd.s32 2, %s2589_s28 }
  0xce   : > { %v473_v11 = vpop.permute.xlu1 %472  ;;  %v510_v12 = vpop.permute.xlu0 %509  ;;  %v719_v58 = vmul.f32 %v2279_v36, %v717_v55 }
  0xcf   : > { %v481_v16 = vadd.f32 %v473_v11, %v440_v28  ;;  %v520_v60 = vadd.f32 %v510_v12, %v479_v50  ;;  %v2527_v17 = vpop.permute.xlu2 %630  ;;  %v650_v28 = vmul.f32 %v2279_v36, %v2531_v26  ;;  %v1186_v12 = vsel %vm539_vm1, %v1184_v62, %v1185_v63 }
  0xd1   : > { %v555_v45 = vadd.f32 %v544_v23, %v520_v60  ;;  %v1175_v60 = vmul.f32 %v2546_v43, %v2435_v32 }
  0xd3   : > { %v596_v29 = vadd.f32 %v2462_v18, %v555_v45  ;;  %v549_v18 = vsel %vm539_vm1, %v546_v35, %v548_v33  ;;  %v1102_v35 = vmul.f32 %v1096_v61, %v2520_v10  ;;  %v649_v61 = vmul.f32 %v2281_v37, %v2531_v26 }
  0xd4   : > { %1082 = vrot.lane.b32.xlu1 %v1075_v24, %s2943_s9  ;;  %1080 = vrot.lane.b32.xlu0 %v1072_v46, %s2943_s9  ;;  %v1176_v24 = vmul.f32 %v2546_v43, %v2464_v19  ;;  %v1188_v45 = vsel %vm539_vm1, %v1185_v63, %v1187_v5  ;;  %v1225_v46 = vrot.slane %v1213_v13, 2 }
  0xd5   : > { %v637_v30 = vadd.f32 %v627_v54, %v596_v29  ;;  %1119 = vrot.lane.b32.xlu2 %v1111_v31, %s2944_s2  ;;  %v1117_v1 = vrot.slane %v1102_v35, 1  ;;  %v1189_v31 = vrot.slane %v1175_v60, 2 }
  0xd6   : > { %v584_v47 = vpop.permute.xlu1 %583  ;;  %v514_v48 = vpop.permute.xlu0 %513  ;;  %v1190_v33 = vrot.slane %v1176_v24, 2 }
  0xd7   : > { %v595_v50 = vadd.f32 %v584_v47, %v2466_v21  ;;  %v522_v51 = vadd.f32 %v514_v48, %v481_v16  ;;  %v2552_v53 = vpop.permute.xlu2 %672  ;;  %v2554_v54 = vadd.f32 %v650_v28, %v637_v30  ;;  %v1116_v21 = vsel %vm422_vm0, %v1114_v49, %v1115_v7 }
  0xd8   : > { %v1118_v16 = vsel %vm422_vm0, %v1115_v7, %v1117_v1  ;;  %v1227_v47 = vsel %vm539_vm1, %v1225_v46, %v1226_v59  ;;  %v1216_v48 = vmul.f32 %v1212_v2, %v2435_v32  ;;  %v1218_v7 = vmul.f32 %v1212_v2, %v2520_v10 }
  0xd9   : > { %v557_v57 = vadd.f32 %v549_v18, %v522_v51  ;;  %v1217_v18 = vmul.f32 %v1212_v2, %v2464_v19  ;;  %v1191_v51 = vsel %vm539_vm1, %v1189_v31, %v1190_v33  ;;  %v720_v1 = vmul.f32 %v717_v55, %v2308_v52 }
  0xda   : > { %v1233_v63 = vrot.slane %v1218_v7, 2  ;;  %v2652_v46 = vunpack.c.l.bf16 %v331_v15  ;;  %v721_v31 = vmul.f32 %v717_v55, %v2284_v39 }
  0xdb   : > { %v1231_v35 = vrot.slane %v1217_v18, 2 }
  0xdc   : > { %1084 = vrot.lane.b32.xlu1 %v1077_v22, %s2943_s9  ;;  %1121 = vrot.lane.b32.xlu0 %v1113_v27, %s2944_s2 }
  0xdd   : > { %1123 = vrot.lane.b32.xlu2 %v1116_v21, %s2944_s2  ;;  %v718_v21 = vmul.f32 %v2281_v37, %v717_v55  ;;  %v1234_v13 = vsel %vm539_vm1, %v1231_v35, %v1233_v63 }
  0xde   : > { %v625_v56 = vpop.permute.xlu1 %624  ;;  %v588_v4 = vpop.permute.xlu0 %587 }
  0xdf   : > { %v636_v8 = vadd.f32 %v625_v56, %v595_v50  ;;  %v597_v11 = vadd.f32 %v588_v4, %v2513_v3  ;;  %v675_v23 = vpop.permute.xlu2 %674  ;;  %v1215_v3 = vmul.f32 %v1212_v2, %v2487_v38 }
  0xe1   : > { %v653_v25 = vadd.f32 %v649_v61, %v636_v8  ;;  %v1228_v28 = vrot.slane %v1215_v3, 2  ;;  %v730_v8 = vrot.slane %v718_v21, 1  ;;  %v1269_v3 = vstv %s1268_s26  ;;  %s1359_s26 = sld [smem:[#allocation2 + %s1358_s8]] }
  0xe2   : > { %s1618_s8 = sld [smem:[#allocation5 + %s2071_s22]] }
  0xe3   : > { %v1229_v26 = vsel %vm539_vm1, %v1226_v59, %v1228_v28 }
  0xe4   : > { %1194 = vrot.lane.b32.xlu1 %v1186_v12, %s2943_s9  ;;  %1125 = vrot.lane.b32.xlu0 %v1118_v16, %s2944_s2  ;;  %v2629_v12 = vstv %s2599_s7  ;;  %s1295_s7 = sld [smem:[#allocation2 + %s1294_s17]] }
  0xe5   : > { %1196 = vrot.lane.b32.xlu2 %v1188_v45, %s2943_s9  ;;  %v2646_v24 = vmul.f32 %v2279_v36, %v2629_v12 }
  0xe6   : > { %v629_v34 = vpop.permute.xlu1 %628  ;;  %v590_v29 = vpop.permute.xlu0 %589 }
  0xe7   : > { %v638_v6 = vadd.f32 %v629_v34, %v597_v11  ;;  %v598_v30 = vadd.f32 %v590_v29, %v557_v57  ;;  %v2593_v42 = vpop.permute.xlu2 %773  ;;  %v1192_v57 = vrot.slane %v1177_v9, 2  ;;  %v731_v11 = vrot.slane %v719_v58, 1 }
  0xe8   : > { %v723_v34 = vmul.f32 %v717_v55, %v2325_v0 }
  0xe9   : > { %v655_v49 = vadd.f32 %v651_v20, %v638_v6  ;;  %v639_v50 = vadd.f32 %v2527_v17, %v598_v30  ;;  %v1230_v17 = vrot.slane %v1216_v48, 2  ;;  %v1193_v5 = vsel %vm539_vm1, %v1190_v33, %v1192_v57 }
  0xea   : > { %v732_v45 = vsel %vm422_vm0, %v730_v8, %v731_v11  ;;  %v722_v33 = vmul.f32 %v717_v55, %v2294_v44  ;;  %v738_v9 = vrot.slane %v723_v34, 1  ;;  %v330_v8 = vld [vmem:[%s2924_s0 + $0x50] sm:$0x1] }
  0xeb   : > { %v656_v22 = vadd.f32 %v652_v14, %v639_v50  ;;  %v2611_v27 = vadd.f32 %v2552_v53, %v655_v49  ;;  %v1232_v4 = vsel %vm539_vm1, %v1230_v17, %v1231_v35  ;;  %v847_v14 = vrot.slane %v2646_v24, 2 }
  0xec   : > { %1235 = vrot.lane.b32.xlu1 %v1227_v47, %s2944_s2  ;;  %1198 = vrot.lane.b32.xlu0 %v1191_v51, %s2943_s9  ;;  %v1272_v49 = vmul.f32 %v1269_v3, %v2652_v46  ;;  %v735_v50 = vrot.slane %v721_v31, 1  ;;  %v736_v51 = vrot.slane %v722_v33, 1 }
  0xed   : > { %v2615_v43 = vadd.f32 %v675_v23, %v656_v22  ;;  %1237 = vrot.lane.b32.xlu2 %v1229_v26, %s2944_s2  ;;  %v1825_v23 = vld [vmem:[%s2924_s0 + $0x48] sm:$0xff]   ;;  %v1296_v22 = vstv %s1295_s7 }
  0xee   : > { %v671_v53 = vpop.permute.xlu1 %670  ;;  %v669_v62 = vpop.permute.xlu0 %668  ;;  %v2640_v16 = vunpack.c.h.bf16 %v1825_v23  ;;  %v2642_v60 = vunpack.c.l.bf16 %v1825_v23  ;;  %v737_v57 = vsel %vm422_vm0, %v735_v50, %v736_v51  ;;  %v739_v21 = vsel %vm422_vm0, %v736_v51, %v738_v9 }
  0xef   : > { %v681_v2 = vadd.f32 %v671_v53, %v2554_v54  ;;  %v680_v61 = vadd.f32 %v669_v62, %v653_v25  ;;  %v815_v56 = vpop.permute.xlu2 %814  ;;  %v733_v54 = vrot.slane %v720_v1, 1  ;;  %v834_v25 = vmul.f32 %v2281_v37, %v2629_v12 }
  0xf0   : > { %v1271_v6 = vmul.f32 %v2640_v16, %v1269_v3  ;;  %v1270_v30 = vmul.f32 %v2642_v60, %v1269_v3  ;;  %v2677_v62 = vunpack.c.h.bf16 %v331_v15  ;;  %v1298_v1 = vmul.f32 %v2640_v16, %v1296_v22 }
  0xf1   : > { %v734_v36 = vsel %vm422_vm0, %v731_v11, %v733_v54  ;;  %v846_v47 = vrot.slane %v834_v25, 2  ;;  %v836_v25 = vmul.f32 %v2629_v12, %v2308_v52  ;;  %v1299_v33 = vmul.f32 %v1296_v22, %v2652_v46 }
  0xf3   : > { %v848_v26 = vsel %vm539_vm1, %v846_v47, %v847_v14  ;;  %v1401_v47 = vstv %s1400_s15  ;;  %s1515_s15 = sadd.s32 2, %s2704_s23 }
  0xf4   : > { %1239 = vrot.lane.b32.xlu1 %v1232_v4, %s2944_s2  ;;  %1200 = vrot.lane.b32.xlu0 %v1193_v5, %s2943_s9  ;;  %v1360_v5 = vstv %s1359_s26  ;;  %s1474_s26 = sadd.s32 1, %s2704_s23  ;;  %v1403_v51 = vmul.f32 %v2640_v16, %v1401_v47  ;;  %s1516_s17 = sld [smem:[#allocation2 + %s1515_s15]] }
  0xf5   : > { %1241 = vrot.lane.b32.xlu2 %v1234_v13, %s2944_s2  ;;  %v1361_v11 = vmul.f32 %v2642_v60, %v1360_v5  ;;  %v2700_v13 = vunpack.c.l.bf16 %v330_v8  ;;  %v1365_v52 = vmul.f32 %v1360_v5, %v2677_v62  ;;  %s1475_s25 = sld [smem:[#allocation2 + %s1474_s26]]  ;;  %s309_s15 = scalar_lea.vmem [#allocation9], %s2142_s12 }
  0xf6   : > { %v698_v59 = vpop.permute.xlu1 %697  ;;  %v696_v20 = vpop.permute.xlu0 %695  ;;  %s1624_s26 = sld [smem:[#allocation7 + %s2071_s22]] }
  0xf7   : > { %v708_v37 = vadd.f32 %v698_v59, %v681_v2  ;;  %v707_v29 = vadd.f32 %v696_v20, %v680_v61  ;;  %v819_v28 = vpop.permute.xlu2 %818  ;;  %v1297_v2 = vmul.f32 %v2642_v60, %v1296_v22  ;;  %v837_v61 = vmul.f32 %v2629_v12, %v2284_v39 }
  0xf8   : > { %v1362_v39 = vmul.f32 %v2640_v16, %v1360_v5  ;;  %v1300_v20 = vmul.f32 %v1296_v22, %v2677_v62 }
  0xf9   : > { %v744_v48 = vadd.f32 %v732_v45, %v707_v29  ;;  %v745_v18 = vadd.f32 %v734_v36, %v708_v37  ;;  %v1373_v45 = vrot.slane %v1361_v11, 1  ;;  %v1364_v36 = vmul.f32 %v1360_v5, %v2652_v46 }
  0xfa   : > { %v1374_v34 = vrot.slane %v1362_v39, 1  ;;  %v1405_v11 = vmul.f32 %v1401_v47, %v2652_v46 }
  0xfb   : > { %v785_v55 = vadd.f32 %v2593_v42, %v744_v48  ;;  %v849_v48 = vrot.slane %v836_v25, 2  ;;  %v1378_v9 = vrot.slane %v1364_v36, 1 }
  0xfc   : > { %1280 = vrot.lane.b32.xlu1 %v1271_v6, %s2943_s9  ;;  %1278 = vrot.lane.b32.xlu0 %v1270_v30, %s2943_s9  ;;  %v1363_v6 = vmul.f32 %v1360_v5, %v2700_v13  ;;  %v333_v30 = vld [vmem:[%s2924_s0 + $0x5c] sm:$0x1]  ;;  %v1419_v25 = vrot.slane %v1405_v11, 1 }
  0xfd   : > { %v826_v7 = vadd.f32 %v815_v56, %v785_v55  ;;  %1282 = vrot.lane.b32.xlu2 %v1272_v49, %s2943_s9  ;;  %v2687_v56 = vmul.f32 %v2629_v12, %v2294_v44  ;;  %v851_v44 = vrot.slane %v837_v61, 2  ;;  %v1402_v49 = vmul.f32 %v2642_v60, %v1401_v47 }
  0xfe   : > { %v702_v17 = vpop.permute.xlu1 %701  ;;  %v700_v35 = vpop.permute.xlu0 %699  ;;  %v1379_v55 = vrot.slane %v1365_v52, 1  ;;  %v850_v22 = vsel %vm539_vm1, %v847_v14, %v849_v48  ;;  %v1415_v61 = vrot.slane %v1403_v51, 1 }
  0xff   : > { %v710_v42 = vadd.f32 %v702_v17, %v2615_v43  ;;  %v709_v58 = vadd.f32 %v700_v35, %v2611_v27  ;;  %v2675_v53 = vpop.permute.xlu2 %891  ;;  %v2679_v63 = vadd.f32 %v848_v26, %v826_v7  ;;  %v1273_v27 = vmul.f32 %v1269_v3, %v2677_v62 }
 0x100   : > { %v852_v23 = vrot.slane %v2687_v56, 2  ;;  %v1376_v26 = vrot.slane %v1363_v6, 1  ;;  %v1414_v35 = vrot.slane %v1402_v49, 1  ;;  %v1380_v24 = vsel %vm422_vm0, %v1378_v9, %v1379_v55 }
 0x101   : > { %v746_v43 = vadd.f32 %v737_v57, %v709_v58  ;;  %v747_v4 = vadd.f32 %v739_v21, %v710_v42  ;;  %v839_v57 = vmul.f32 %v2629_v12, %v2325_v0 }
 0x102   : > { %v853_v37 = vsel %vm539_vm1, %v851_v44, %v852_v23  ;;  %v1377_v14 = vsel %vm422_vm0, %v1374_v34, %v1376_v26 }
 0x103   : > { %v854_v8 = vrot.slane %v839_v57, 2 }
 0x104   : > { %1307 = vrot.lane.b32.xlu1 %v1298_v1, %s2944_s2  ;;  %1305 = vrot.lane.b32.xlu0 %v1297_v2, %s2944_s2  ;;  %v1404_v2 = vmul.f32 %v1401_v47, %v2700_v13 }
 0x105   : > { %1284 = vrot.lane.b32.xlu2 %v1273_v27, %s2943_s9  ;;  %v1416_v27 = vsel %vm422_vm0, %v1414_v35, %v1415_v61 }
 0x106   : > { %v778_v54 = vpop.permute.xlu1 %777  ;;  %v776_v15 = vpop.permute.xlu0 %775 }
 0x107   : > { %v787_v3 = vadd.f32 %v778_v54, %v746_v43  ;;  %v786_v59 = vadd.f32 %v776_v15, %v745_v18  ;;  %v933_v31 = vpop.permute.xlu2 %932  ;;  %v1375_v18 = vsel %vm422_vm0, %v1373_v45, %v1374_v34  ;;  %v1476_v15 = vstv %s1475_s25 }
 0x108   : > { %v1477_v36 = vmul.f32 %v2642_v60, %v1476_v15  ;;  %v1478_v34 = vmul.f32 %v2640_v16, %v1476_v15  ;;  %v1481_v35 = vmul.f32 %v1476_v15, %v2677_v62 }
 0x109   : > { %v828_v29 = vadd.f32 %v819_v28, %v787_v3  ;;  %v2724_v28 = vunpack.c.l.bf16 %v333_v30  ;;  %v1517_v30 = vstv %s1516_s17  ;;  %s2945_s17 = sand.u32 1, %s1998_s19  }
 0x10a   : > { %v1490_v52 = vrot.slane %v1478_v34, 2  ;;  %v1519_v26 = vmul.f32 %v2640_v16, %v1517_v30 }
 0x10b   : > { %v2719_v50 = vadd.f32 %v853_v37, %v828_v29  ;;  %v1366_v1 = vmul.f32 %v1360_v5, %v2724_v28  ;;  %v1406_v5 = vmul.f32 %v1401_v47, %v2677_v62  ;;  %v1407_v37 = vmul.f32 %v1401_v47, %v2724_v28 }
 0x10c   : > { %1311 = vrot.lane.b32.xlu1 %v1300_v20, %s2944_s2  ;;  %1309 = vrot.lane.b32.xlu0 %v1299_v33, %s2944_s2  ;;  %v1479_v29 = vmul.f32 %v1476_v15, %v2700_v13 }
 0x10d   : > { %1383 = vrot.lane.b32.xlu2 %v1375_v18, %s2943_s9  ;;  %v1381_v12 = vrot.slane %v1366_v1, 1  ;;  %v1420_v33 = vrot.slane %v1406_v5, 1  ;;  %v1422_v6 = vrot.slane %v1407_v37, 1  ;;  %v1531_v1 = vrot.slane %v1519_v26, 2 }
 0x10e   : > { %v780_v7 = vpop.permute.xlu1 %779  ;;  %v817_v17 = vpop.permute.xlu0 %816  ;;  %v1492_v47 = vrot.slane %v1479_v29, 2 }
 0x10f   : > { %v788_v21 = vadd.f32 %v780_v7, %v747_v4  ;;  %v827_v42 = vadd.f32 %v817_v17, %v786_v59  ;;  %v2733_v58 = vpop.permute.xlu2 %936  ;;  %v1417_v4 = vrot.slane %v1404_v2, 1  ;;  %v1382_v20 = vsel %vm422_vm0, %v1379_v55, %v1381_v12 }
 0x110   : > { %v1518_v55 = vmul.f32 %v2642_v60, %v1517_v30  ;;  %v1480_v17 = vmul.f32 %v1476_v15, %v2652_v46  ;;  %v1493_v57 = vsel %vm539_vm1, %v1490_v52, %v1492_v47 }
 0x111   : > { %v861_v43 = vadd.f32 %v850_v22, %v827_v42  ;;  %v1423_v22 = vsel %vm422_vm0, %v1420_v33, %v1422_v6 }
 0x112   : > { %v1530_v42 = vrot.slane %v1518_v55, 2 }
 0x113   : > { %v902_v0 = vadd.f32 %v2675_v53, %v861_v43  ;;  %v855_v53 = vsel %vm539_vm1, %v852_v23, %v854_v8  ;;  %v1421_v23 = vsel %vm422_vm0, %v1419_v25, %v1420_v33  ;;  %v1495_v43 = vrot.slane %v1481_v35, 2 }
 0x114   : > { %1387 = vrot.lane.b32.xlu1 %v1380_v24, %s2943_s9  ;;  %1385 = vrot.lane.b32.xlu0 %v1377_v14, %s2943_s9  ;;  %v1482_v25 = vmul.f32 %v1476_v15, %v2724_v28 }
 0x115   : > { %v2746_v39 = vadd.f32 %v933_v31, %v902_v0  ;;  %1424 = vrot.lane.b32.xlu2 %v1416_v27, %s2944_s2  ;;  %v1418_v31 = vsel %vm422_vm0, %v1415_v61, %v1417_v4  ;;  %v1494_v61 = vrot.slane %v1480_v17, 2 }
 0x116   : > { %v890_v44 = vpop.permute.xlu1 %889  ;;  %v821_v54 = vpop.permute.xlu0 %820 }
 0x117   : > { %v901_v45 = vadd.f32 %v890_v44, %v2679_v63  ;;  %v829_v3 = vadd.f32 %v821_v54, %v788_v21  ;;  %v2753_v59 = vpop.permute.xlu2 %977  ;;  %v1489_v63 = vrot.slane %v1477_v36, 2  ;;  %v1520_v21 = vmul.f32 %v1517_v30, %v2700_v13 }
 0x118   : > { %v1532_v44 = vsel %vm539_vm1, %v1530_v42, %v1531_v1  ;;  %v1521_v54 = vmul.f32 %v1517_v30, %v2652_v46  ;;  %v1523_v36 = vmul.f32 %v1517_v30, %v2724_v28 }
 0x119   : > { %v863_v56 = vadd.f32 %v855_v53, %v829_v3  ;;  %v1491_v7 = vsel %vm539_vm1, %v1489_v63, %v1490_v52  ;;  %v1533_v8 = vrot.slane %v1520_v21, 2  ;;  %v1522_v53 = vmul.f32 %v1517_v30, %v2677_v62 }
 0x11a   : > { %v1535_v15 = vrot.slane %v1521_v54, 2 }
 0x11b   : > { %v1534_v33 = vsel %vm539_vm1, %v1531_v1, %v1533_v8 }
 0x11c   : > { %1389 = vrot.lane.b32.xlu1 %v1382_v20, %s2943_s9  ;;  %1426 = vrot.lane.b32.xlu0 %v1418_v31, %s2944_s2  ;;  %v1496_v20 = vsel %vm539_vm1, %v1494_v61, %v1495_v43  ;;  %v1022_v31 = vstv %s2770_s1 }
 0x11d   : > { %1428 = vrot.lane.b32.xlu2 %v1421_v23, %s2944_s2  ;;  %v1497_v23 = vrot.slane %v1482_v25, 2  ;;  %v1023_v29 = vmul.f32 %v2423_v41, %v1022_v31  ;;  %v1024_v6 = vmul.f32 %v2421_v40, %v1022_v31  ;;  %v1026_v1 = vmul.f32 %v1022_v31, %v2435_v32 }
 0x11e   : > { %v931_v48 = vpop.permute.xlu1 %930  ;;  %v894_v18 = vpop.permute.xlu0 %893 }
 0x11f   : > { %v942_v49 = vadd.f32 %v931_v48, %v901_v45  ;;  %v903_v51 = vadd.f32 %v894_v18, %v2719_v50  ;;  %v980_v9 = vpop.permute.xlu2 %979  ;;  %v953_v50 = vstv %s948_s10  ;;  %v1025_v48 = vmul.f32 %v1022_v31, %v2487_v38  ;;  %s1647_s10 = scalar_lea.sflag [#allocation3], %s2945_s17 }
 0x120   : > { %v956_v2 = vmul.f32 %v953_v50, %v2435_v32  ;;  %v955_v27 = vmul.f32 %v2421_v40, %v953_v50  ;;  %v957_v12 = vmul.f32 %v953_v50, %v2464_v19  ;;  %v954_v4 = vmul.f32 %v2423_v41, %v953_v50 }
 0x121   : > { %v1538_v18 = vrot.slane %v1523_v36, 2 }
 0x122   : > { %v959_v63 = vadd.f32 %v955_v27, %v2746_v39  ;;  %v958_v52 = vadd.f32 %v954_v4, %v942_v49  ;;  %v1138_v39 = vstv %s2790_s13  ;;  %v1038_v49 = vrot.slane %v1025_v48, 1 }
 0x123   : > { %v1140_v35 = vmul.f32 %v2421_v40, %v1138_v39 }
 0x124   : > { %1499 = vrot.lane.b32.xlu1 %v1491_v7, %s2943_s9  ;;  %1430 = vrot.lane.b32.xlu0 %v1423_v22, %s2944_s2  ;;  %v1035_v7 = vrot.slane %v1023_v29, 1  ;;  %v1036_v22 = vrot.slane %v1024_v6, 1 }
 0x125   : > { %1501 = vrot.lane.b32.xlu2 %v1493_v57, %s2943_s9  ;;  %v1139_v57 = vmul.f32 %v2423_v41, %v1138_v39  ;;  %v1152_v27 = vrot.slane %v1140_v35, 2 }
 0x126   : > { %v935_v24 = vpop.permute.xlu1 %934  ;;  %v896_v14 = vpop.permute.xlu0 %895  ;;  %v1037_v21 = vsel %vm422_vm0, %v1035_v7, %v1036_v22  ;;  %v1039_v61 = vsel %vm422_vm0, %v1036_v22, %v1038_v49 }
 0x127   : > { %v944_v11 = vadd.f32 %v935_v24, %v903_v51  ;;  %v904_v0 = vadd.f32 %v896_v14, %v863_v56  ;;  %v1079_v5 = vpop.permute.xlu2 %1078  ;;  %v1536_v56 = vrot.slane %v1522_v53, 2  ;;  %v1151_v40 = vrot.slane %v1139_v57, 2 }
 0x129   : > { %v960_v45 = vadd.f32 %v956_v2, %v944_v11  ;;  %v945_v3 = vadd.f32 %v2733_v58, %v904_v0  ;;  %v1537_v26 = vsel %vm539_vm1, %v1535_v15, %v1536_v56  ;;  %v1539_v17 = vsel %vm539_vm1, %v1536_v56, %v1538_v18 }
 0x12a   : > { %v1027_v2 = vmul.f32 %v1022_v31, %v2464_v19  ;;  %v1040_v0 = vrot.slane %v1026_v1, 1  ;;  %v1153_v54 = vsel %vm539_vm1, %v1151_v40, %v1152_v27  ;;  %v1143_v15 = vmul.f32 %v1138_v39, %v2464_v19 }
 0x12b   : > { %v961_v34 = vadd.f32 %v957_v12, %v945_v3  ;;  %v987_v37 = vadd.f32 %v2753_v59, %v960_v45 }
 0x12c   : > { %1540 = vrot.lane.b32.xlu1 %v1532_v44, %s2944_s2  ;;  %1503 = vrot.lane.b32.xlu0 %v1496_v20, %s2943_s9  ;;  %v1041_v12 = vrot.slane %v1027_v2, 1 }
 0x12d   : > { %v988_v58 = vadd.f32 %v980_v9, %v961_v34  ;;  %1542 = vrot.lane.b32.xlu2 %v1534_v33, %s2944_s2  ;;  %v1498_v9 = vsel %vm539_vm1, %v1495_v43, %v1497_v23  ;;  %v1028_v43 = vmul.f32 %v1022_v31, %v2520_v10  ;;  %v1142_v34 = vmul.f32 %v1138_v39, %v2435_v32 }
 0x12e   : > { %v976_v30 = vpop.permute.xlu1 %975  ;;  %v974_v59 = vpop.permute.xlu0 %973  ;;  %v1042_v3 = vsel %vm422_vm0, %v1040_v0, %v1041_v12 }
 0x12f   : > { %v986_v47 = vadd.f32 %v976_v30, %v959_v63  ;;  %v985_v51 = vadd.f32 %v974_v59, %v958_v52  ;;  %v1120_v55 = vpop.permute.xlu2 %1119  ;;  %v1043_v4 = vrot.slane %v1028_v43, 1  ;;  %v1157_v63 = vrot.slane %v1143_v15, 2 }
 0x130   : > { %v1141_v30 = vmul.f32 %v1138_v39, %v2487_v38 }
 0x131   : > { %v1044_v20 = vsel %vm422_vm0, %v1041_v12, %v1043_v4 }
 0x134   : > { %1544 = vrot.lane.b32.xlu1 %v1537_v26, %s2944_s2  ;;  %1505 = vrot.lane.b32.xlu0 %v1498_v9, %s2943_s9  ;;  %v1144_v26 = vmul.f32 %v1138_v39, %v2520_v10  ;;  %s1324_s9 = sld [smem:[#allocation2 + %s2631_s11]] }
 0x135   : > { %1546 = vrot.lane.b32.xlu2 %v1539_v17, %s2944_s2  ;;  %s1253_s2 = sld [smem:[#allocation2 + %s2589_s28]] }
 0x136   : > { %v1003_v50 = vpop.permute.xlu1 %1002  ;;  %v1001_v42 = vpop.permute.xlu0 %1000  ;;  %v1159_v49 = vrot.slane %v1144_v26, 2 }
 0x137   : > { %v1013_v24 = vadd.f32 %v1003_v50, %v986_v47  ;;  %v1012_v14 = vadd.f32 %v1001_v42, %v985_v51  ;;  %v1124_v41 = vpop.permute.xlu2 %1123 }
 0x138   : > { %v1160_v35 = vsel %vm539_vm1, %v1157_v63, %v1159_v49 }
 0x139   : > { %v1049_v8 = vadd.f32 %v1037_v21, %v1012_v14  ;;  %v1050_v11 = vadd.f32 %v1039_v61, %v1013_v24 }
 0x13a   : > { %v1327_v4 = vstv %s1324_s9 }
 0x13b   : > { %v1090_v44 = vadd.f32 %v1079_v5, %v1049_v8  ;;  %v1156_v5 = vrot.slane %v1142_v34, 2  ;;  %v1330_v34 = vmul.f32 %v1327_v4, %v2700_v13 }
 0x13d   : > { %v1131_v53 = vadd.f32 %v1120_v55, %v1090_v44  ;;  %v1158_v18 = vsel %vm539_vm1, %v1156_v5, %v1157_v63  ;;  %v1258_v44 = vstv %s1253_s2 }
 0x13e   : > { %v1007_v25 = vpop.permute.xlu1 %1006  ;;  %v1005_v45 = vpop.permute.xlu0 %1004 }
 0x13f   : > { %v1015_v31 = vadd.f32 %v1007_v25, %v988_v58  ;;  %v1014_v33 = vadd.f32 %v1005_v45, %v987_v37  ;;  %v1165_v36 = vadd.f32 %v1153_v54, %v1131_v53  ;;  %v1197_v29 = vpop.permute.xlu2 %1196  ;;  %v1154_v37 = vrot.slane %v1141_v30, 2 }
 0x140   : > { %v1259_v53 = vmul.f32 %v2642_v60, %v1258_v44  ;;  %v1328_v25 = vmul.f32 %v2642_v60, %v1327_v4  ;;  %v1329_v45 = vmul.f32 %v2640_v16, %v1327_v4 }
 0x141   : > { %v1051_v56 = vadd.f32 %v1042_v3, %v1014_v33  ;;  %v1052_v23 = vadd.f32 %v1044_v20, %v1015_v31  ;;  %v1155_v19 = vsel %vm539_vm1, %v1152_v27, %v1154_v37  ;;  %v1260_v33 = vmul.f32 %v2640_v16, %v1258_v44 }
 0x142   : > { %v1341_v5 = vrot.slane %v1329_v45, 1  ;;  %v1331_v37 = vmul.f32 %v1327_v4, %v2652_v46 }
 0x146   : > { %v1083_v52 = vpop.permute.xlu1 %1082  ;;  %v1081_v6 = vpop.permute.xlu0 %1080 }
 0x147   : > { %v1092_v59 = vadd.f32 %v1083_v52, %v1051_v56  ;;  %v1091_v48 = vadd.f32 %v1081_v6, %v1050_v11  ;;  %v1238_v51 = vpop.permute.xlu2 %1237 }
 0x149   : > { %v1133_v58 = vadd.f32 %v1124_v41, %v1092_v59  ;;  %v1343_v59 = vrot.slane %v1330_v34, 1 }
 0x14b   : > { %v1167_v47 = vadd.f32 %v1158_v18, %v1133_v58 }
 0x14e   : > { %v1085_v32 = vpop.permute.xlu1 %1084  ;;  %v1122_v55 = vpop.permute.xlu0 %1121 }
 0x14f   : > { %v1093_v9 = vadd.f32 %v1085_v32, %v1052_v23  ;;  %v1132_v7 = vadd.f32 %v1122_v55, %v1091_v48  ;;  %v1242_v21 = vpop.permute.xlu2 %1241  ;;  %v1261_v23 = vmul.f32 %v1258_v44, %v2652_v46  ;;  %v1443_v32 = vstv %s1442_s16 }
 0x150   : > { %v1446_v49 = vmul.f32 %v1443_v32, %v2700_v13 }
 0x151   : > { %v1166_v22 = vadd.f32 %v1155_v19, %v1132_v7 }
 0x153   : > { %v1207_v0 = vadd.f32 %v1197_v29, %v1166_v22  ;;  %v1340_v29 = vrot.slane %v1328_v25, 1  ;;  %v1344_v22 = vsel %vm422_vm0, %v1341_v5, %v1343_v59  ;;  %v1448_v25 = vmul.f32 %v1443_v32, %v2677_v62 }
 0x155   : > { %v1248_v31 = vadd.f32 %v1238_v51, %v1207_v0  ;;  %v1342_v58 = vsel %vm422_vm0, %v1340_v29, %v1341_v5 }
 0x156   : > { %v1195_v17 = vpop.permute.xlu1 %1194  ;;  %v1126_v38 = vpop.permute.xlu0 %1125 }
 0x157   : > { %v1134_v57 = vadd.f32 %v1126_v38, %v1093_v9  ;;  %v1283_v2 = vpop.permute.xlu2 %1282  ;;  %v1206_v12 = vadd.f32 %v1195_v17, %v1165_v36  ;;  %v1264_v6 = vadd.f32 %v1260_v33, %v1248_v31  ;;  %v1262_v9 = vmul.f32 %v1258_v44, %v2677_v62 }
 0x158   : > { %v1445_v38 = vmul.f32 %v2640_v16, %v1443_v32  ;;  %v1449_v33 = vmul.f32 %v1443_v32, %v2724_v28 }
 0x159   : > { %v1168_v50 = vadd.f32 %v1160_v35, %v1134_v57  ;;  %v1345_v35 = vrot.slane %v1331_v37, 1 }
 0x15e   : > { %v1236_v42 = vpop.permute.xlu1 %1235  ;;  %v1199_v1 = vpop.permute.xlu0 %1198 }
 0x15f   : > { %v2829_v24 = vpop.permute.xlu2 %1284  ;;  %v1247_v54 = vadd.f32 %v1236_v42, %v1206_v12  ;;  %v1208_v15 = vadd.f32 %v1199_v1, %v1167_v47  ;;  %v1332_v47 = vmul.f32 %v1327_v4, %v2677_v62  ;;  %v1444_v42 = vmul.f32 %v2642_v60, %v1443_v32 }
 0x160   : > { %v1457_v12 = vrot.slane %v1445_v38, 2 }
 0x161   : > { %v1263_v56 = vadd.f32 %v1259_v53, %v1247_v54  ;;  %v1346_v57 = vrot.slane %v1332_v47, 1  ;;  %v1456_v44 = vrot.slane %v1444_v42, 2 }
 0x163   : > { %v1347_v0 = vsel %vm422_vm0, %v1345_v35, %v1346_v57  ;;  %v1458_v31 = vsel %vm539_vm1, %v1456_v44, %v1457_v12 }
 0x166   : > { %v1240_v61 = vpop.permute.xlu1 %1239  ;;  %v1201_v43 = vpop.permute.xlu0 %1200 }
 0x167   : > { %v1384_v14 = vpop.permute.xlu2 %1383  ;;  %v1249_v63 = vadd.f32 %v1240_v61, %v1208_v15  ;;  %v1209_v52 = vadd.f32 %v1201_v43, %v1168_v50  ;;  %v1333_v50 = vmul.f32 %v1327_v4, %v2724_v28 }
 0x169   : > { %v1265_v55 = vadd.f32 %v1261_v23, %v1249_v63  ;;  %v1250_v26 = vadd.f32 %v1242_v21, %v1209_v52  ;;  %v1348_v13 = vrot.slane %v1333_v50, 1  ;;  %v1464_v63 = vrot.slane %v1449_v33, 2 }
 0x16b   : > { %v1266_v1 = vadd.f32 %v1262_v9, %v1250_v26  ;;  %v1292_v61 = vadd.f32 %v1283_v2, %v1265_v55  ;;  %v1447_v2 = vmul.f32 %v1443_v32, %v2652_v46 }
 0x16d   : > { %v1293_v53 = vadd.f32 %v2829_v24, %v1266_v1  ;;  %v1461_v15 = vrot.slane %v1447_v2, 2 }
 0x16e   : > { %v1281_v10 = vpop.permute.xlu1 %1280  ;;  %v1279_v39 = vpop.permute.xlu0 %1278 }
 0x16f   : > { %v2835_v11 = vpop.permute.xlu2 %1424  ;;  %v1290_v30 = vadd.f32 %v1279_v39, %v1263_v56  ;;  %v1291_v48 = vadd.f32 %v1281_v10, %v1264_v6  ;;  %v1459_v10 = vrot.slane %v1446_v49, 2  ;;  %v1462_v56 = vrot.slane %v1448_v25, 2 }
 0x171   : > { %v1460_v60 = vsel %vm539_vm1, %v1457_v12, %v1459_v10  ;;  %v1465_v28 = vsel %vm539_vm1, %v1462_v56, %v1464_v63 }
 0x176   : > { %v1308_v27 = vpop.permute.xlu1 %1307  ;;  %v1306_v40 = vpop.permute.xlu0 %1305 }
 0x177   : > { %v2843_v36 = vpop.permute.xlu2 %1428  ;;  %v1317_v18 = vadd.f32 %v1306_v40, %v1290_v30  ;;  %v1318_v7 = vadd.f32 %v1308_v27, %v1291_v48  ;;  %v1463_v30 = vsel %vm539_vm1, %v1461_v15, %v1462_v56 }
 0x179   : > { %v1354_v17 = vadd.f32 %v1342_v58, %v1317_v18  ;;  %v1355_v43 = vadd.f32 %v1344_v22, %v1318_v7 }
 0x17b   : > { %v1395_v39 = vadd.f32 %v1384_v14, %v1354_v17 }
 0x17d   : > { %v1436_v14 = vadd.f32 %v2835_v11, %v1395_v39 }
 0x17e   : > { %v2833_v8 = vpop.permute.xlu1 %1311  ;;  %v1310_v41 = vpop.permute.xlu0 %1309 }
 0x17f   : > { %v1502_v21 = vpop.permute.xlu2 %1501  ;;  %v1319_v27 = vadd.f32 %v1310_v41, %v1292_v61  ;;  %v1320_v41 = vadd.f32 %v2833_v8, %v1293_v53  ;;  %v1470_v46 = vadd.f32 %v1458_v31, %v1436_v14 }
 0x181   : > { %v1356_v45 = vadd.f32 %v1347_v0, %v1319_v27 }
 0x186   : > { %v1388_v3 = vpop.permute.xlu1 %1387  ;;  %v1386_v20 = vpop.permute.xlu0 %1385 }
 0x187   : > { %v1396_v40 = vadd.f32 %v1386_v20, %v1355_v43  ;;  %v1349_v20 = vsel %vm422_vm0, %v1346_v57, %v1348_v13  ;;  %v1397_v34 = vadd.f32 %v1388_v3, %v1356_v45  ;;  %v1543_v29 = vpop.permute.xlu2 %1542 }
 0x188   : > { %v1357_v23 = vadd.f32 %v1349_v20, %v1320_v41 }
 0x189   : > { %v1438_v11 = vadd.f32 %v2843_v36, %v1397_v34 }
 0x18b   : > { %v1472_v18 = vadd.f32 %v1463_v30, %v1438_v11  ;;  %v1619_v11 = vstv %s1618_s8 }
 0x18e   : > { %v1390_v51 = vpop.permute.xlu1 %1389  ;;  %v1427_v19 = vpop.permute.xlu0 %1426 }
 0x18f   : > { %v1437_v4 = vadd.f32 %v1427_v19, %v1396_v40  ;;  %v1398_v8 = vadd.f32 %v1390_v51, %v1357_v23  ;;  %v1547_v32 = vpop.permute.xlu2 %1546 }
 0x191   : > { %v1471_v24 = vadd.f32 %v1460_v60, %v1437_v4 }
 0x193   : > { %v1512_v52 = vadd.f32 %v1502_v21, %v1471_v24 }
 0x195   : > { %v1553_v3 = vadd.f32 %v1543_v29, %v1512_v52 }
 0x196   : > { %v1500_v16 = vpop.permute.xlu1 %1499  ;;  %v1431_v54 = vpop.permute.xlu0 %1430 }
 0x197   : > { %v1511_v6 = vadd.f32 %v1500_v16, %v1470_v46  ;;  %v1439_v59 = vadd.f32 %v1431_v54, %v1398_v8  ;;  %v1558_v36 = vsel %vm1556_vm2, %v1553_v3, 0.0 }
 0x199   : > { %v1473_v47 = vadd.f32 %v1465_v28, %v1439_v59  ;;  %v1625_v59 = vstv %s1624_s26 }
 0x19e   : > { %v1541_v5 = vpop.permute.xlu1 %1540  ;;  %v1504_v62 = vpop.permute.xlu0 %1503 }
 0x19f   : > { %v1552_v48 = vadd.f32 %v1541_v5, %v1511_v6  ;;  %v1513_v37 = vadd.f32 %v1504_v62, %v1472_v18 }
 0x1a1   : > { %v1557_v58 = vsel %vm1556_vm2, %v1552_v48, 0.0 }
 0x1a2   : > { %v1559_v9 = vadd.f32 %v1558_v36, %v1557_v58  ;;  %v1632_v36 = vld [vmem:[%s2145_s6 + $0x10] sm:$0xff] }
 0x1a6   : > { %v1545_v19 = vpop.permute.xlu1 %1544  ;;  %v1506_v55 = vpop.permute.xlu0 %1505 }
 0x1a7   : > { %v1554_v51 = vadd.f32 %v1545_v19, %v1513_v37  ;;  %v1514_v26 = vadd.f32 %v1506_v55, %v1473_v47  ;;  %v1630_v19 = vld [vmem:[%s2145_s6] sm:$0xff]  ;;  %v1631_v55 = vld [vmem:[%s2145_s6 + $0x8] sm:$0xff] }
 0x1a9   : > { %v1560_v7 = vsel %vm1556_vm2, %v1554_v51, 0.0  ;;  %v1555_v22 = vadd.f32 %v1547_v32, %v1514_v26 }
 0x1aa   : > { %v1561_v49 = vadd.f32 %v1560_v7, %v1559_v9 }
 0x1ab   : > { %v1562_v17 = vsel %vm1556_vm2, %v1555_v22, 0.0 }
 0x1ac   : > { %v1563_v38 = vadd.f32 %v1562_v17, %v1561_v49 }
 0x1ae   : > { %1564 = vadd.xlane.f32.xlu0 %v1563_v38 }
 0x221   : > { %v1565_v35 = vpop.xlane.xlu0 %1564 }
 0x222   : > { %v1566_v57 = vrot.slane %v1565_v35, 4 }
 0x224   : > { %v1567_v50 = vadd.f32 %v1566_v57, %v1565_v35 }
 0x226   : > { %v1568_v42 = vrot.slane %v1567_v50, 2 }
 0x228   : > { %v1569_v1 = vadd.f32 %v1568_v42, %v1567_v50 }
 0x22a   : > { %v1570_v61 = vrot.slane %v1569_v1, 1 }
 0x22c   : > { %v1571_v43 = vadd.f32 %v1570_v61, %v1569_v1 }
 0x22e   : > { %1826 = vpush %v1571_v43 }
 0x25f   : > { %s1827_s28 = spop %1826 }
 0x260   : > { %s1573_s11 = smul.f32 0.001953125, %s1827_s28 }
 0x262   : > { %v1574_v21 = vstv %s1573_s11 }
 0x263   : > { %v1575_v10 = vsub.f32 %v1552_v48, %v1574_v21  ;;  %v1576_v39 = vsub.f32 %v1553_v3, %v1574_v21  ;;  %v1577_v27 = vsub.f32 %v1554_v51, %v1574_v21  ;;  %v1578_v40 = vsub.f32 %v1555_v22, %v1574_v21  ;;  %v1633_v51 = vld [vmem:[%s2145_s6 + $0x18] sm:$0xff] }
 0x265   : > { %v1579_v0 = vmul.f32 %v1575_v10, %v1575_v10  ;;  %v1580_v13 = vmul.f32 %v1576_v39, %v1576_v39  ;;  %v1581_v12 = vmul.f32 %v1577_v27, %v1577_v27  ;;  %v1582_v44 = vmul.f32 %v1578_v40, %v1578_v40 }
 0x267   : > { %v1583_v16 = vsel %vm1556_vm2, %v1579_v0, 0.0  ;;  %v1584_v54 = vsel %vm1556_vm2, %v1580_v13, 0.0  ;;  %v1586_v4 = vsel %vm1556_vm2, %v1581_v12, 0.0  ;;  %v1588_v2 = vsel %vm1556_vm2, %v1582_v44, 0.0 }
 0x268   : > { %v1585_v53 = vadd.f32 %v1584_v54, %v1583_v16 }
 0x26a   : > { %v1587_v60 = vadd.f32 %v1586_v4, %v1585_v53 }
 0x26c   : > { %v1589_v25 = vadd.f32 %v1588_v2, %v1587_v60 }
 0x26e   : > { %1590 = vadd.xlane.f32.xlu1 %v1589_v25 }
 0x2e1   : > { %v1591_v14 = vpop.xlane.xlu1 %1590 }
 0x2e2   : > { %v1592_v41 = vrot.slane %v1591_v14, 4 }
 0x2e4   : > { %v1593_v45 = vadd.f32 %v1592_v41, %v1591_v14 }
 0x2e6   : > { %v1594_v20 = vrot.slane %v1593_v45, 2 }
 0x2e8   : > { %v1595_v31 = vadd.f32 %v1594_v20, %v1593_v45 }
 0x2ea   : > { %v1596_v33 = vrot.slane %v1595_v31, 1 }
 0x2ec   : > { %v1597_v34 = vadd.f32 %v1596_v33, %v1595_v31 }
 0x2ee   : > { %1828 = vpush %v1597_v34 }
 0x31f   : > { %s1829_s14 = spop %1828 }
 0x320   : > { %s1599_s23 = smul.f32 0.001953125, %s1829_s14 }
 0x322   : > { %s1600_s7 = sadd.f32 1e-05, %s1599_s23 }
 0x324   : > { %v1601_v24 = vstv %s1600_s7 }
 0x325   : > { %1917 = vrsqrt.f32 %v1601_v24  ;;  %vm1608_vm4 = vweird.f32 %v1601_v24 }
 0x32b   : > { %v1918_v15 = vpop.eup %1917 }
 0x32c   : > { %v1603_v56 = vmul.f32 %v1918_v15, %v1601_v24  ;;  %vm1609_vm3 = vweird.f32 %v1918_v15 }
 0x32d   : > { %vm1610_vm5 = vmor %vm1608_vm4, %vm1609_vm3 }
 0x32e   : > { %v1604_v23 = vmul.f32 %v1918_v15, %v1603_v56 }
 0x330   : > { %v1605_v29 = vmul.f32 0.5, %v1604_v23 }
 0x332   : > { %v1606_v46 = vsub.f32 1.5, %v1605_v29 }
 0x334   : > { %v1607_v5 = vmul.f32 %v1918_v15, %v1606_v46 }
 0x336   : > { %v1611_v62 = vsel %vm1610_vm5, %v1918_v15, %v1607_v5 }
 0x337   : > { %1830 = vpush %v1611_v62 }
 0x368   : > { %s1831_s25 = spop %1830 }
 0x369   : > { %v1613_v63 = vstv %s1831_s25 }
 0x36a   : > { %v1614_v8 = vmul.f32 %v1613_v63, %v1575_v10  ;;  %v1615_v52 = vmul.f32 %v1613_v63, %v1576_v39  ;;  %v1616_v6 = vmul.f32 %v1613_v63, %v1577_v27  ;;  %v1617_v30 = vmul.f32 %v1613_v63, %v1578_v40 }
 0x36c   : > { %v1620_v48 = vmul.f32 %v1619_v11, %v1614_v8  ;;  %v1621_v28 = vmul.f32 %v1619_v11, %v1615_v52  ;;  %v1622_v3 = vmul.f32 %v1619_v11, %v1616_v6  ;;  %v1623_v18 = vmul.f32 %v1619_v11, %v1617_v30 }
 0x36e   : > { %v1626_v58 = vadd.f32 %v1625_v59, %v1620_v48  ;;  %v1627_v37 = vadd.f32 %v1625_v59, %v1621_v28  ;;  %v1628_v47 = vadd.f32 %v1625_v59, %v1622_v3  ;;  %v1629_v32 = vadd.f32 %v1625_v59, %v1623_v18 }
 0x370   : > { %v1634_v26 = vmax.f32 %v1626_v58, 0.0  ;;  %v1635_v9 = vmax.f32 %v1627_v37, 0.0  ;;  %v1636_v7 = vmax.f32 %v1628_v47, 0.0  ;;  %v1637_v22 = vmax.f32 %v1629_v32, 0.0 }
 0x372   : > { %v1638_v49 = vadd.f32 %v1634_v26, %v1630_v19  ;;  %v1639_v17 = vadd.f32 %v1635_v9, %v1631_v55  ;;  %v1640_v38 = vadd.f32 %v1636_v7, %v1632_v36  ;;  %v1641_v35 = vadd.f32 %v1637_v22, %v1633_v51 }
 0x374   : > { %1642 = vst.msk [vmem:[%s309_s15] sm:$0xff] %vm1556_vm2, %v1638_v49 }
 0x375   : > { %1643 = vst.msk [vmem:[%s309_s15 + $0x8] sm:$0xff] %vm1556_vm2, %v1639_v17 }
 0x376   : > { %1644 = vst.msk [vmem:[%s309_s15 + $0x10] sm:$0xff] %vm1556_vm2, %v1640_v38 }
 0x377   : > { %1645 = vst.msk [vmem:[%s309_s15 + $0x18] sm:$0xff] %vm1556_vm2, %v1641_v35 }
 0x378   : > { %s1806_s6 = sshll.u32 %s2071_s22, 4  ;;  %s1669_s1 = sshll.u32 %s309_s15, 4  ;;  %s1670_s1 = int_to_ptr.vmem [resolvable:$true] %s1669_s1 }
 0x379   : > { %s1658_s9 = scalar_lea.hbm %s2929_s5, %s1806_s6  ;;  %s2013_s16 = smov 256  }
 0x37a   : > { %s1671_s2 = sshll.u32 %s1658_s9, 4  ;;  %1844 = sst [smem:[#allocation11]] (%p2093_p6), %s2013_s16  ;;  %s1672_s2 = int_to_ptr.hbm [resolvable:$true] %s1671_s2 }
 0x37b   : > { %s2014_s28 = smov 1024   ;;  %s2015_s11 = smov 2  }
 0x37c   : > { %1845 = sst [smem:[#allocation11 + $0x1]] (%p2093_p6), %s2014_s28  ;;  %s2016_s22 = smov 128  }
 0x37d   : > { %1846 = sst [smem:[#allocation11 + $0x2]] (%p2093_p6), %s2015_s11  ;;  %s2017_s14 = smov 8  }
 0x37e   : > { %1847 = sst [smem:[#allocation11 + $0x3]] (%p2093_p6), %s2016_s22  ;;  %s2018_s23 = smov [#allocation10]  }
 0x37f   : > { %1848 = sst [smem:[#allocation11 + $0x4]] (%p2093_p6), %s2016_s22  ;;  %s2019_s7 = smov 0  }
 0x380   : > { %1849 = sst [smem:[#allocation11 + $0x5]] (%p2093_p6), %s2017_s14 }
 0x381   : > { %1850 = dma.general (%p2093_p6), %s1670_s1, 512, %s1672_s2, %s1647_s10, %s2018_s23, [#allocation11], %s2019_s7, 0  }
 0x382 PF: > { %p1872_p2 = scmp.ge.s32.totalorder %s2006_s21, 2  ;;  %s1699_s8 = sand.u32 1, %s1994_s18  }
 0x383   : > { %s1700_s26 = scalar_lea.sflag [#allocation3], %s1699_s8 }
 0x384   : > { %p1863_p3 = pnand %p1872_p2, %p2099_p10 }
 0x386   : > { %p1864_p4 = pneg %p1863_p3 }
 0x388   : > { %1989 = dma.done.wait (%p1864_p4), %s1700_s26, 512  }
 0x389   : > { %1991 = vsyncadd (%p1864_p4), %s1700_s26, 4294966784  ;;  %p17_p5 = scmp.ge.s32.totalorder %s2075_s24, 6   ;;  %s2946_s18 = smov %s1998_s19 }
 0x38a   : > { %s2947_s19 = smov %s2002_s20  ;;  %s2948_s20 = smov %s2087_s27 }
 0x38b   : > { %s2949_s21 = smov %s2075_s24  ;;  %19 = sbr.rel (!%p17_p5) target bundleno = 8 (0x8), region = 136 }
 0x390   :  { %1706 = vsyncpa [#allocation3], 1 }
 0x391   :  { %1708 = vsyncpa [#allocation3 + $0x1], 1 }
 0x392   :  { %1709 = vsyncpa [#allocation4], 1 }
 0x393   :  { %1711 = vsyncpa [#allocation4 + $0x1], 1 }
 0x394   :  { %1712 = vsyncpa [#allocation6], 1 }

</bundles_post_ra>
